<compile_context>
chip_gen: v7x
topology: tpu7x:2x2x1
jax: 0.10.0
libtpu: 0.0.40
codegen_flags: <defaults>
</compile_context>

<pallas_src>
import functools

import jax
import jax.numpy as jnp
import numpy as np
from jax import lax
from jax.experimental import pallas as pl
from jax.experimental.pallas import tpu as pltpu

_LANE = 128


# ------------------------------- fused kernel --------------------------------

def _fused_net_kernel(y_ref,                       # (N,) int32, SMEM (prefetch)
                      x_ref,                       # (1, P_in, Cin0) bf16 (flat, haloed)
                      w1_ref, b1_ref, w2_ref, b2_ref,
                      w3_ref, b3_ref, w4_ref, b4_ref,
                      wc_ref,                      # (D_feat, 128) f32, pre-transposed
                      o_ref,                       # (1, 1, 128) f32 scores
                      act_s, wp_s, xa_s, xb_s,     # VMEM scratch
                      *, dims, d_feat, scale, margin):
    """Whole BaselineTrain forward for one image.

    Activations are kept flat as (row*(w+2)+col, channels) with a zero halo, so
    each conv layer is 9 shift-and-accumulate MXU matmuls; the 2 junk columns
    per output row produced by this layout are discarded by the pooling step.
    Output channels / classes are zero-padded to 128 lanes and stay exactly
    zero through ReLU / pooling / normalization.
    """
    conv_params = ((w1_ref, b1_ref), (w2_ref, b2_ref),
                   (w3_ref, b3_ref), (w4_ref, b4_ref))
    src = (None, xa_s, xb_s, xa_s)     # where layer l reads its padded input
    dst = (xa_s, xb_s, xa_s, None)     # where layer l writes the next padded input

    n_layers = len(dims)
    feat = None
    for l in range(n_layers):
        h, w, _cin = dims[l]
        w_ref, b_ref = conv_params[l]
        wp1 = w + 2                      # padded row stride
        rows = h * wp1                   # conv rows (incl. 2 junk cols per row)
        hh, wh = h // 2, w // 2
        half = rows // 2                 # = h * (wh + 1)

        # ---- conv3x3 (SAME) + bias: 9 shift-and-accumulate MXU matmuls ------
        act_s[pl.ds(0, rows), :] = jnp.broadcast_to(b_ref[...], (rows, _LANE))
        for dh in range(3):
            for dw in range(3):
                off = dh * wp1 + dw
                if l == 0:
                    lhs = x_ref[0, pl.ds(off, rows), :]                  # bf16
                else:
                    lhs = src[l][pl.ds(off, rows), :].astype(jnp.bfloat16)
                act_s[pl.ds(0, rows), :] += jnp.dot(
                    lhs, w_ref[dh * 3 + dw],
                    preferred_element_type=jnp.float32)
        # ReLU in f32 (epilogue stays f32 on all generations incl. v5e).
        act_s[pl.ds(0, rows), :] = jnp.maximum(act_s[pl.ds(0, rows), :], 0.0)

        # ---- 2x2 / stride-2 max pool --------------------------------------
        # Width pool: row stride (w+2) is even, so even/odd flat indices are
        # exactly the even/odd columns.  Result has row stride wh+1; the last
        # entry of each row is junk and is skipped by the height pool below.
        wp_s[pl.ds(0, half), :] = jnp.maximum(
            act_s[pl.ds(0, half, stride=2), :],
            act_s[pl.ds(1, half, stride=2), :])

        if l + 1 < n_layers:
            nxt = dst[l]
            _h2, w_next, c_next = dims[l + 1]
            nxt[...] = jnp.zeros(nxt.shape, nxt.dtype)   # zero halo for next layer
            for pr in range(hh):                         # height pool + scatter
                prow = jnp.maximum(
                    wp_s[pl.ds((2 * pr) * (wh + 1), wh), :],
                    wp_s[pl.ds((2 * pr + 1) * (wh + 1), wh), :])
                nxt[pl.ds((pr + 1) * (w_next + 2) + 1, wh), :] = prow[:, :c_next]
        else:
            # Final layer pools down to 1x1 -> feature (lanes >= d_feat are 0).
            feat = jnp.maximum(wp_s[pl.ds(0, wh), :],
                               wp_s[pl.ds(wh + 1, wh), :])       # (1, 128) f32

    # ---- CosFace-style margin metric classifier -----------------------------
    f = feat.astype(jnp.bfloat16).astype(jnp.float32)            # match bf16 feature
    fn = f * lax.rsqrt(jnp.sum(f * f, axis=-1, keepdims=True) + 1e-12)
    wt = wc_ref[...]                                             # (d_feat, 128) f32
    wn = wt * lax.rsqrt(jnp.sum(wt * wt, axis=0, keepdims=True) + 1e-12)
    cos = jnp.dot(fn[:, :d_feat].astype(jnp.bfloat16),
                  wn.astype(jnp.bfloat16),
                  preferred_element_type=jnp.float32)            # (1, 128)
    yv = y_ref[pl.program_id(0)]
    onehot = (lax.broadcasted_iota(jnp.int32, (1, _LANE), 1) == yv
              ).astype(jnp.float32)
    # Single vectorized lane-dense store (no per-row read-modify-write).
    o_ref[0] = scale * cos - (scale * margin) * onehot


# ------------------------------ wrappers --------------------------------------

def prepare_params(params):
    """One-time parameter prep (pad / cast / transpose), outside the hot path."""
    conv_w, conv_b = [], []
    for w, b in params["conv"]:
        kh, kw, cin, cout = w.shape
        wp = jnp.zeros((kh * kw, cin, _LANE), jnp.bfloat16)
        wp = wp.at[:, :, :cout].set(
            w.reshape(kh * kw, cin, cout).astype(jnp.bfloat16))
        bp = jnp.zeros((1, _LANE), jnp.float32).at[0, :cout].set(
            b.astype(jnp.float32))
        conv_w.append(wp)
        conv_b.append(bp)
    c, d = params["cls_w"].shape
    wct = jnp.zeros((d, _LANE), jnp.float32).at[:, :c].set(
        jnp.transpose(params["cls_w"]).astype(jnp.float32))
    return {"conv_w": tuple(conv_w), "conv_b": tuple(conv_b), "cls_w_t": wct}


@functools.partial(jax.jit, static_argnames=("scale", "margin", "num_class"))
def baseline_train_forward(x_nchw, y, prepped, *, scale, margin, num_class):
    """BaselineTrain.forward: feature = backbone(x); scores = classifier(feature, y)."""
    conv_w = prepped["conv_w"]
    conv_b = prepped["conv_b"]
    wct = prepped["cls_w_t"]
    n_layers = len(conv_w)
    assert n_layers == 4
    n, cin0, h0, w0 = x_nchw.shape
    d_feat = wct.shape[0]

    # Static per-layer (h, w, cin), derived from weight shapes.
    dims = []
    h, w = h0, w0
    for l in range(n_layers):
        assert h % 2 == 0 and w % 2 == 0, "2x2/stride-2 pool needs even h, w"
        dims.append((h, w, conv_w[l].shape[1]))
        h //= 2
        w //= 2
    assert h == 1 and w == 1, "flatten assumes final spatial extent 1x1"
    assert all(c == dims[1][2] for (_, _, c) in dims[1:])
    dims = tuple(dims)

    # Stage the input once: NCHW -> NHWC, bf16, zero halo, flatten, slack rows
    # so the tap slices (offset up to 2*(w+2)+2) stay in-bounds.
    xh = jnp.transpose(x_nchw, (0, 2, 3, 1)).astype(jnp.bfloat16)
    xp = jnp.pad(xh, ((0, 0), (1, 1), (1, 1), (0, 0)))
    p_img = (h0 + 2) * (w0 + 2)
    p_in = p_img + 8
    xf = jnp.pad(xp.reshape(n, p_img, cin0), ((0, 0), (0, p_in - p_img), (0, 0)))

    act_rows = max(hl * (wl + 2) for hl, wl, _ in dims)
    wp_rows = act_rows // 2
    nxt_rows = max((hl + 2) * (wl + 2) for hl, wl, _ in dims[1:]) + 8
    c_mid = dims[1][2]

    kernel = functools.partial(_fused_net_kernel, dims=dims, d_feat=d_feat,
                               scale=scale, margin=margin)

    conv_specs = []
    for l in range(n_layers):
        conv_specs.append(pl.BlockSpec((9, dims[l][2], _LANE),
                                       lambda i, yy: (0, 0, 0)))     # resident
        conv_specs.append(pl.BlockSpec((1, _LANE), lambda i, yy: (0, 0)))

    scores_pad = pl.pallas_call(
        kernel,
        out_shape=jax.ShapeDtypeStruct((n, 1, _LANE), jnp.float32),
        grid_spec=pltpu.PrefetchScalarGridSpec(
            num_scalar_prefetch=1,                 # y lands in SMEM
            grid=(n,),                             # >=2 parallel blocks for v7x
            in_specs=[pl.BlockSpec((1, p_in, cin0), lambda i, yy: (i, 0, 0))]
                     + conv_specs
                     + [pl.BlockSpec((d_feat, _LANE), lambda i, yy: (0, 0))],
            out_specs=pl.BlockSpec((1, 1, _LANE), lambda i, yy: (i, 0, 0)),
            scratch_shapes=[
                pltpu.VMEM((act_rows, _LANE), jnp.float32),   # conv accumulator
                pltpu.VMEM((wp_rows, _LANE), jnp.float32),    # width-pooled slab
                pltpu.VMEM((nxt_rows, c_mid), jnp.float32),   # ping (padded acts)
                pltpu.VMEM((nxt_rows, c_mid), jnp.float32),   # pong (padded acts)
            ],
        ),
        compiler_params=pltpu.CompilerParams(
            dimension_semantics=("parallel",),
            vmem_limit_bytes=32 * 1024 * 1024,
        ),
    )(y.astype(jnp.int32), xf,
      conv_w[0], conv_b[0], conv_w[1], conv_b[1],
      conv_w[2], conv_b[2], conv_w[3], conv_b[3], wct)

    return scores_pad.reshape(n, _LANE)[:, :num_class], y


# ------------------------------ pure-JAX reference ----------------------------

def reference_forward(x_nchw, y, params, *, scale, margin):
    """Reference with the same precision policy (bf16 MXU inputs, f32 accum/epilogue)."""
    x = jnp.transpose(x_nchw, (0, 2, 3, 1)).astype(jnp.bfloat16)
    for w_hwio, b in params["conv"]:
        conv = lax.conv_general_dilated(
            x, w_hwio.astype(jnp.bfloat16),
            window_strides=(1, 1), padding="SAME",
            dimension_numbers=("NHWC", "HWIO", "NHWC"),
            preferred_element_type=jnp.float32)
        act = jnp.maximum(conv + b.astype(jnp.float32), 0.0)
        pooled = lax.reduce_window(act, -jnp.inf, lax.max,
                                   (1, 2, 2, 1), (1, 2, 2, 1), "VALID")
        x = pooled.astype(jnp.bfloat16)
    f = x.reshape(x.shape[0], -1).astype(jnp.float32)
    w = params["cls_w"].astype(jnp.float32)
    fn = f * lax.rsqrt(jnp.sum(f * f, axis=-1, keepdims=True) + 1e-12)
    wn = w * lax.rsqrt(jnp.sum(w * w, axis=-1, keepdims=True) + 1e-12)
    cos = lax.dot_general(fn.astype(jnp.bfloat16), wn.astype(jnp.bfloat16),
                          (((1,), (1,)), ((), ())),
                          preferred_element_type=jnp.float32)
    onehot = jax.nn.one_hot(y, w.shape[0], dtype=cos.dtype)
    return scale * (cos - margin * onehot)


# ----------------------------------- main -------------------------------------

if __name__ == "__main__":
    key = jax.random.PRNGKey(0)
    in_ch, hid, num_class = 3, 16, 5
    scale, margin = 10.0, 0.2                 # metric_params
    chans = [in_ch, hid, hid, hid, hid]

    params = {"conv": []}
    for i in range(4):
        key, k_w, k_b = jax.random.split(key, 3)
        w = 0.1 * jax.random.normal(k_w, (3, 3, chans[i], chans[i + 1]), jnp.float32)
        b = 0.01 * jax.random.normal(k_b, (chans[i + 1],), jnp.float32)
        params["conv"].append((w, b))
    key, k_c = jax.random.split(key)
    params["cls_w"] = 0.1 * jax.random.normal(k_c, (num_class, hid), jnp.float32)

    # Inputs: NCHW like PyTorch, small shapes.
    key, k_x, k_y = jax.random.split(key, 3)
    x = jax.random.normal(k_x, (2, in_ch, 16, 16), jnp.float32)
    y = jax.random.randint(k_y, (2,), 0, num_class, dtype=jnp.int32)

    prepped = prepare_params(params)          # one-time prep, outside the hot path
    scores, y_out = baseline_train_forward(
        x, y, prepped, scale=scale, margin=margin, num_class=num_class)
    scores = jax.block_until_ready(scores)

    ref = reference_forward(x, y, params, scale=scale, margin=margin)
    np.testing.assert_allclose(np.asarray(scores), np.asarray(ref),
                               rtol=5e-3, atol=5e-3)
    assert scores.shape == (2, num_class)
    print("KERNEL_OK")
</pallas_src>

<mosaic_0001>
module attributes {stable_mosaic.version = 11 : i64} {
  func.func @_fused_net_kernel(%arg0: i32, %arg1: memref<2xi32, #tpu.memory_space<smem>>, %arg2: memref<1x332x3xbf16, #tpu.memory_space<vmem>>, %arg3: memref<9x3x128xbf16, #tpu.memory_space<vmem>>, %arg4: memref<1x128xf32, #tpu.memory_space<vmem>>, %arg5: memref<9x16x128xbf16, #tpu.memory_space<vmem>>, %arg6: memref<1x128xf32, #tpu.memory_space<vmem>>, %arg7: memref<9x16x128xbf16, #tpu.memory_space<vmem>>, %arg8: memref<1x128xf32, #tpu.memory_space<vmem>>, %arg9: memref<9x16x128xbf16, #tpu.memory_space<vmem>>, %arg10: memref<1x128xf32, #tpu.memory_space<vmem>>, %arg11: memref<16x128xf32, #tpu.memory_space<vmem>>, %arg12: memref<1x1x128xf32, #tpu.memory_space<vmem>>, %arg13: memref<288x128xf32, #tpu.memory_space<vmem>>, %arg14: memref<144x128xf32, #tpu.memory_space<vmem>>, %arg15: memref<108x16xf32, #tpu.memory_space<vmem>>, %arg16: memref<108x16xf32, #tpu.memory_space<vmem>>) attributes {dimension_semantics = [#tpu.dimension_semantics<parallel>], iteration_bounds = array<i64: 2>, scalar_prefetch = 1 : i64, scratch_operands = 4 : i64, tpu.core_type = #tpu.core_type<tc>, window_params = [{transform_indices = @transform_0, window_bounds = array<i64: 1, 332, 3>}, {pipeline_mode = #tpu.pipeline_mode<synchronous>, transform_indices = @transform_1, window_bounds = array<i64: 9, 3, 128>}, {pipeline_mode = #tpu.pipeline_mode<synchronous>, transform_indices = @transform_2, window_bounds = array<i64: 1, 128>}, {pipeline_mode = #tpu.pipeline_mode<synchronous>, transform_indices = @transform_3, window_bounds = array<i64: 9, 16, 128>}, {pipeline_mode = #tpu.pipeline_mode<synchronous>, transform_indices = @transform_4, window_bounds = array<i64: 1, 128>}, {pipeline_mode = #tpu.pipeline_mode<synchronous>, transform_indices = @transform_5, window_bounds = array<i64: 9, 16, 128>}, {pipeline_mode = #tpu.pipeline_mode<synchronous>, transform_indices = @transform_6, window_bounds = array<i64: 1, 128>}, {pipeline_mode = #tpu.pipeline_mode<synchronous>, transform_indices = @transform_7, window_bounds = array<i64: 9, 16, 128>}, {pipeline_mode = #tpu.pipeline_mode<synchronous>, transform_indices = @transform_8, window_bounds = array<i64: 1, 128>}, {pipeline_mode = #tpu.pipeline_mode<synchronous>, transform_indices = @transform_9, window_bounds = array<i64: 16, 128>}, {transform_indices = @transform_10, window_bounds = array<i64: 1, 1, 128>}]} {
    %c0 = arith.constant 0 : index
    %c0_0 = arith.constant 0 : index
    %0 = vector.load %arg4[%c0, %c0_0] : memref<1x128xf32, #tpu.memory_space<vmem>>, vector<1x128xf32>
    %1 = vector.shape_cast %0 : vector<1x128xf32> to vector<1x128xf32>
    %2 = vector.broadcast %1 : vector<1x128xf32> to vector<288x128xf32>
    %c0_1 = arith.constant 0 : index
    %c0_2 = arith.constant 0 : index
    %3 = vector.load %arg13[%c0_1, %c0_2] : memref<288x128xf32, #tpu.memory_space<vmem>>, vector<288x128xf32>
    tpu.vector_store %arg13[%c0_1, %c0_2], %2 {strides = array<i32>} : memref<288x128xf32, #tpu.memory_space<vmem>>, vector<288x128xf32>,
    %c0_3 = arith.constant 0 : index
    %c0_4 = arith.constant 0 : index
    %c0_5 = arith.constant 0 : index
    %4 = vector.load %arg2[%c0_3, %c0_4, %c0_5] : memref<1x332x3xbf16, #tpu.memory_space<vmem>>, vector<1x288x3xbf16>
    %5 = vector.shape_cast %4 : vector<1x288x3xbf16> to vector<288x3xbf16>
    %c0_6 = arith.constant 0 : index
    %c0_7 = arith.constant 0 : index
    %6 = vector.load %arg13[%c0_6, %c0_7] : memref<288x128xf32, #tpu.memory_space<vmem>>, vector<288x128xf32>
    %c0_8 = arith.constant 0 : index
    %c0_9 = arith.constant 0 : index
    %c0_10 = arith.constant 0 : index
    %7 = vector.load %arg3[%c0_8, %c0_9, %c0_10] : memref<9x3x128xbf16, #tpu.memory_space<vmem>>, vector<1x3x128xbf16>
    %8 = vector.shape_cast %7 : vector<1x3x128xbf16> to vector<3x128xbf16>
    %cst = arith.constant dense<0.000000e+00> : vector<288x128xf32>
    %9 = tpu.matmul %5, %8, %cst {dimension_numbers = #tpu.dot_dimension_numbers<[1], [0], [0], [1], [0, 0, 1, 1], [], []>} : vector<288x3xbf16>, vector<3x128xbf16>, vector<288x128xf32> -> vector<288x128xf32>
    %10 = arith.addf %6, %9 : vector<288x128xf32>
    %c0_11 = arith.constant 0 : index
    %c0_12 = arith.constant 0 : index
    %11 = vector.load %arg13[%c0_11, %c0_12] : memref<288x128xf32, #tpu.memory_space<vmem>>, vector<288x128xf32>
    tpu.vector_store %arg13[%c0_11, %c0_12], %10 {strides = array<i32>} : memref<288x128xf32, #tpu.memory_space<vmem>>, vector<288x128xf32>,
    %c0_13 = arith.constant 0 : index
    %c1 = arith.constant 1 : index
    %c0_14 = arith.constant 0 : index
    %12 = vector.load %arg2[%c0_13, %c1, %c0_14] : memref<1x332x3xbf16, #tpu.memory_space<vmem>>, vector<1x288x3xbf16>
    %13 = vector.shape_cast %12 : vector<1x288x3xbf16> to vector<288x3xbf16>
    %c0_15 = arith.constant 0 : index
    %c0_16 = arith.constant 0 : index
    %14 = vector.load %arg13[%c0_15, %c0_16] : memref<288x128xf32, #tpu.memory_space<vmem>>, vector<288x128xf32>
    %c1_17 = arith.constant 1 : index
    %c0_18 = arith.constant 0 : index
    %c0_19 = arith.constant 0 : index
    %15 = vector.load %arg3[%c1_17, %c0_18, %c0_19] : memref<9x3x128xbf16, #tpu.memory_space<vmem>>, vector<1x3x128xbf16>
    %16 = vector.shape_cast %15 : vector<1x3x128xbf16> to vector<3x128xbf16>
    %cst_20 = arith.constant dense<0.000000e+00> : vector<288x128xf32>
    %17 = tpu.matmul %13, %16, %cst_20 {dimension_numbers = #tpu.dot_dimension_numbers<[1], [0], [0], [1], [0, 0, 1, 1], [], []>} : vector<288x3xbf16>, vector<3x128xbf16>, vector<288x128xf32> -> vector<288x128xf32>
    %18 = arith.addf %14, %17 : vector<288x128xf32>
    %c0_21 = arith.constant 0 : index
    %c0_22 = arith.constant 0 : index
    %19 = vector.load %arg13[%c0_21, %c0_22] : memref<288x128xf32, #tpu.memory_space<vmem>>, vector<288x128xf32>
    tpu.vector_store %arg13[%c0_21, %c0_22], %18 {strides = array<i32>} : memref<288x128xf32, #tpu.memory_space<vmem>>, vector<288x128xf32>,
    %c0_23 = arith.constant 0 : index
    %c2 = arith.constant 2 : index
    %c0_24 = arith.constant 0 : index
    %20 = vector.load %arg2[%c0_23, %c2, %c0_24] : memref<1x332x3xbf16, #tpu.memory_space<vmem>>, vector<1x288x3xbf16>
    %21 = vector.shape_cast %20 : vector<1x288x3xbf16> to vector<288x3xbf16>
    %c0_25 = arith.constant 0 : index
    %c0_26 = arith.constant 0 : index
    %22 = vector.load %arg13[%c0_25, %c0_26] : memref<288x128xf32, #tpu.memory_space<vmem>>, vector<288x128xf32>
    %c2_27 = arith.constant 2 : index
    %c0_28 = arith.constant 0 : index
    %c0_29 = arith.constant 0 : index
    %23 = vector.load %arg3[%c2_27, %c0_28, %c0_29] : memref<9x3x128xbf16, #tpu.memory_space<vmem>>, vector<1x3x128xbf16>
    %24 = vector.shape_cast %23 : vector<1x3x128xbf16> to vector<3x128xbf16>
    %cst_30 = arith.constant dense<0.000000e+00> : vector<288x128xf32>
    %25 = tpu.matmul %21, %24, %cst_30 {dimension_numbers = #tpu.dot_dimension_numbers<[1], [0], [0], [1], [0, 0, 1, 1], [], []>} : vector<288x3xbf16>, vector<3x128xbf16>, vector<288x128xf32> -> vector<288x128xf32>
    %26 = arith.addf %22, %25 : vector<288x128xf32>
    %c0_31 = arith.constant 0 : index
    %c0_32 = arith.constant 0 : index
    %27 = vector.load %arg13[%c0_31, %c0_32] : memref<288x128xf32, #tpu.memory_space<vmem>>, vector<288x128xf32>
    tpu.vector_store %arg13[%c0_31, %c0_32], %26 {strides = array<i32>} : memref<288x128xf32, #tpu.memory_space<vmem>>, vector<288x128xf32>,
    %c0_33 = arith.constant 0 : index
    %c18 = arith.constant 18 : index
    %c0_34 = arith.constant 0 : index
    %28 = vector.load %arg2[%c0_33, %c18, %c0_34] : memref<1x332x3xbf16, #tpu.memory_space<vmem>>, vector<1x288x3xbf16>
    %29 = vector.shape_cast %28 : vector<1x288x3xbf16> to vector<288x3xbf16>
    %c0_35 = arith.constant 0 : index
    %c0_36 = arith.constant 0 : index
    %30 = vector.load %arg13[%c0_35, %c0_36] : memref<288x128xf32, #tpu.memory_space<vmem>>, vector<288x128xf32>
    %c3 = arith.constant 3 : index
    %c0_37 = arith.constant 0 : index
    %c0_38 = arith.constant 0 : index
    %31 = vector.load %arg3[%c3, %c0_37, %c0_38] : memref<9x3x128xbf16, #tpu.memory_space<vmem>>, vector<1x3x128xbf16>
    %32 = vector.shape_cast %31 : vector<1x3x128xbf16> to vector<3x128xbf16>
    %cst_39 = arith.constant dense<0.000000e+00> : vector<288x128xf32>
    %33 = tpu.matmul %29, %32, %cst_39 {dimension_numbers = #tpu.dot_dimension_numbers<[1], [0], [0], [1], [0, 0, 1, 1], [], []>} : vector<288x3xbf16>, vector<3x128xbf16>, vector<288x128xf32> -> vector<288x128xf32>
    %34 = arith.addf %30, %33 : vector<288x128xf32>
    %c0_40 = arith.constant 0 : index
    %c0_41 = arith.constant 0 : index
    %35 = vector.load %arg13[%c0_40, %c0_41] : memref<288x128xf32, #tpu.memory_space<vmem>>, vector<288x128xf32>
    tpu.vector_store %arg13[%c0_40, %c0_41], %34 {strides = array<i32>} : memref<288x128xf32, #tpu.memory_space<vmem>>, vector<288x128xf32>,
    %c0_42 = arith.constant 0 : index
    %c19 = arith.constant 19 : index
    %c0_43 = arith.constant 0 : index
    %36 = vector.load %arg2[%c0_42, %c19, %c0_43] : memref<1x332x3xbf16, #tpu.memory_space<vmem>>, vector<1x288x3xbf16>
    %37 = vector.shape_cast %36 : vector<1x288x3xbf16> to vector<288x3xbf16>
    %c0_44 = arith.constant 0 : index
    %c0_45 = arith.constant 0 : index
    %38 = vector.load %arg13[%c0_44, %c0_45] : memref<288x128xf32, #tpu.memory_space<vmem>>, vector<288x128xf32>
    %c4 = arith.constant 4 : index
    %c0_46 = arith.constant 0 : index
    %c0_47 = arith.constant 0 : index
    %39 = vector.load %arg3[%c4, %c0_46, %c0_47] : memref<9x3x128xbf16, #tpu.memory_space<vmem>>, vector<1x3x128xbf16>
    %40 = vector.shape_cast %39 : vector<1x3x128xbf16> to vector<3x128xbf16>
    %cst_48 = arith.constant dense<0.000000e+00> : vector<288x128xf32>
    %41 = tpu.matmul %37, %40, %cst_48 {dimension_numbers = #tpu.dot_dimension_numbers<[1], [0], [0], [1], [0, 0, 1, 1], [], []>} : vector<288x3xbf16>, vector<3x128xbf16>, vector<288x128xf32> -> vector<288x128xf32>
    %42 = arith.addf %38, %41 : vector<288x128xf32>
    %c0_49 = arith.constant 0 : index
    %c0_50 = arith.constant 0 : index
    %43 = vector.load %arg13[%c0_49, %c0_50] : memref<288x128xf32, #tpu.memory_space<vmem>>, vector<288x128xf32>
    tpu.vector_store %arg13[%c0_49, %c0_50], %42 {strides = array<i32>} : memref<288x128xf32, #tpu.memory_space<vmem>>, vector<288x128xf32>,
    %c0_51 = arith.constant 0 : index
    %c20 = arith.constant 20 : index
    %c0_52 = arith.constant 0 : index
    %44 = vector.load %arg2[%c0_51, %c20, %c0_52] : memref<1x332x3xbf16, #tpu.memory_space<vmem>>, vector<1x288x3xbf16>
    %45 = vector.shape_cast %44 : vector<1x288x3xbf16> to vector<288x3xbf16>
    %c0_53 = arith.constant 0 : index
    %c0_54 = arith.constant 0 : index
    %46 = vector.load %arg13[%c0_53, %c0_54] : memref<288x128xf32, #tpu.memory_space<vmem>>, vector<288x128xf32>
    %c5 = arith.constant 5 : index
    %c0_55 = arith.constant 0 : index
    %c0_56 = arith.constant 0 : index
    %47 = vector.load %arg3[%c5, %c0_55, %c0_56] : memref<9x3x128xbf16, #tpu.memory_space<vmem>>, vector<1x3x128xbf16>
    %48 = vector.shape_cast %47 : vector<1x3x128xbf16> to vector<3x128xbf16>
    %cst_57 = arith.constant dense<0.000000e+00> : vector<288x128xf32>
    %49 = tpu.matmul %45, %48, %cst_57 {dimension_numbers = #tpu.dot_dimension_numbers<[1], [0], [0], [1], [0, 0, 1, 1], [], []>} : vector<288x3xbf16>, vector<3x128xbf16>, vector<288x128xf32> -> vector<288x128xf32>
    %50 = arith.addf %46, %49 : vector<288x128xf32>
    %c0_58 = arith.constant 0 : index
    %c0_59 = arith.constant 0 : index
    %51 = vector.load %arg13[%c0_58, %c0_59] : memref<288x128xf32, #tpu.memory_space<vmem>>, vector<288x128xf32>
    tpu.vector_store %arg13[%c0_58, %c0_59], %50 {strides = array<i32>} : memref<288x128xf32, #tpu.memory_space<vmem>>, vector<288x128xf32>,
    %c0_60 = arith.constant 0 : index
    %c36 = arith.constant 36 : index
    %c0_61 = arith.constant 0 : index
    %52 = vector.load %arg2[%c0_60, %c36, %c0_61] : memref<1x332x3xbf16, #tpu.memory_space<vmem>>, vector<1x288x3xbf16>
    %53 = vector.shape_cast %52 : vector<1x288x3xbf16> to vector<288x3xbf16>
    %c0_62 = arith.constant 0 : index
    %c0_63 = arith.constant 0 : index
    %54 = vector.load %arg13[%c0_62, %c0_63] : memref<288x128xf32, #tpu.memory_space<vmem>>, vector<288x128xf32>
    %c6 = arith.constant 6 : index
    %c0_64 = arith.constant 0 : index
    %c0_65 = arith.constant 0 : index
    %55 = vector.load %arg3[%c6, %c0_64, %c0_65] : memref<9x3x128xbf16, #tpu.memory_space<vmem>>, vector<1x3x128xbf16>
    %56 = vector.shape_cast %55 : vector<1x3x128xbf16> to vector<3x128xbf16>
    %cst_66 = arith.constant dense<0.000000e+00> : vector<288x128xf32>
    %57 = tpu.matmul %53, %56, %cst_66 {dimension_numbers = #tpu.dot_dimension_numbers<[1], [0], [0], [1], [0, 0, 1, 1], [], []>} : vector<288x3xbf16>, vector<3x128xbf16>, vector<288x128xf32> -> vector<288x128xf32>
    %58 = arith.addf %54, %57 : vector<288x128xf32>
    %c0_67 = arith.constant 0 : index
    %c0_68 = arith.constant 0 : index
    %59 = vector.load %arg13[%c0_67, %c0_68] : memref<288x128xf32, #tpu.memory_space<vmem>>, vector<288x128xf32>
    tpu.vector_store %arg13[%c0_67, %c0_68], %58 {strides = array<i32>} : memref<288x128xf32, #tpu.memory_space<vmem>>, vector<288x128xf32>,
    %c0_69 = arith.constant 0 : index
    %c37 = arith.constant 37 : index
    %c0_70 = arith.constant 0 : index
    %60 = vector.load %arg2[%c0_69, %c37, %c0_70] : memref<1x332x3xbf16, #tpu.memory_space<vmem>>, vector<1x288x3xbf16>
    %61 = vector.shape_cast %60 : vector<1x288x3xbf16> to vector<288x3xbf16>
    %c0_71 = arith.constant 0 : index
    %c0_72 = arith.constant 0 : index
    %62 = vector.load %arg13[%c0_71, %c0_72] : memref<288x128xf32, #tpu.memory_space<vmem>>, vector<288x128xf32>
    %c7 = arith.constant 7 : index
    %c0_73 = arith.constant 0 : index
    %c0_74 = arith.constant 0 : index
    %63 = vector.load %arg3[%c7, %c0_73, %c0_74] : memref<9x3x128xbf16, #tpu.memory_space<vmem>>, vector<1x3x128xbf16>
    %64 = vector.shape_cast %63 : vector<1x3x128xbf16> to vector<3x128xbf16>
    %cst_75 = arith.constant dense<0.000000e+00> : vector<288x128xf32>
    %65 = tpu.matmul %61, %64, %cst_75 {dimension_numbers = #tpu.dot_dimension_numbers<[1], [0], [0], [1], [0, 0, 1, 1], [], []>} : vector<288x3xbf16>, vector<3x128xbf16>, vector<288x128xf32> -> vector<288x128xf32>
    %66 = arith.addf %62, %65 : vector<288x128xf32>
    %c0_76 = arith.constant 0 : index
    %c0_77 = arith.constant 0 : index
    %67 = vector.load %arg13[%c0_76, %c0_77] : memref<288x128xf32, #tpu.memory_space<vmem>>, vector<288x128xf32>
    tpu.vector_store %arg13[%c0_76, %c0_77], %66 {strides = array<i32>} : memref<288x128xf32, #tpu.memory_space<vmem>>, vector<288x128xf32>,
    %c0_78 = arith.constant 0 : index
    %c38 = arith.constant 38 : index
    %c0_79 = arith.constant 0 : index
    %68 = vector.load %arg2[%c0_78, %c38, %c0_79] : memref<1x332x3xbf16, #tpu.memory_space<vmem>>, vector<1x288x3xbf16>
    %69 = vector.shape_cast %68 : vector<1x288x3xbf16> to vector<288x3xbf16>
    %c0_80 = arith.constant 0 : index
    %c0_81 = arith.constant 0 : index
    %70 = vector.load %arg13[%c0_80, %c0_81] : memref<288x128xf32, #tpu.memory_space<vmem>>, vector<288x128xf32>
    %c8 = arith.constant 8 : index
    %c0_82 = arith.constant 0 : index
    %c0_83 = arith.constant 0 : index
    %71 = vector.load %arg3[%c8, %c0_82, %c0_83] : memref<9x3x128xbf16, #tpu.memory_space<vmem>>, vector<1x3x128xbf16>
    %72 = vector.shape_cast %71 : vector<1x3x128xbf16> to vector<3x128xbf16>
    %cst_84 = arith.constant dense<0.000000e+00> : vector<288x128xf32>
    %73 = tpu.matmul %69, %72, %cst_84 {dimension_numbers = #tpu.dot_dimension_numbers<[1], [0], [0], [1], [0, 0, 1, 1], [], []>} : vector<288x3xbf16>, vector<3x128xbf16>, vector<288x128xf32> -> vector<288x128xf32>
    %74 = arith.addf %70, %73 : vector<288x128xf32>
    %c0_85 = arith.constant 0 : index
    %c0_86 = arith.constant 0 : index
    %75 = vector.load %arg13[%c0_85, %c0_86] : memref<288x128xf32, #tpu.memory_space<vmem>>, vector<288x128xf32>
    tpu.vector_store %arg13[%c0_85, %c0_86], %74 {strides = array<i32>} : memref<288x128xf32, #tpu.memory_space<vmem>>, vector<288x128xf32>,
    %c0_87 = arith.constant 0 : index
    %c0_88 = arith.constant 0 : index
    %76 = vector.load %arg13[%c0_87, %c0_88] : memref<288x128xf32, #tpu.memory_space<vmem>>, vector<288x128xf32>
    %cst_89 = arith.constant 0.000000e+00 : f32
    %77 = vector.broadcast %cst_89 : f32 to vector<288x128xf32>
    %78 = arith.maximumf %76, %77 : vector<288x128xf32>
    %c0_90 = arith.constant 0 : index
    %c0_91 = arith.constant 0 : index
    %79 = vector.load %arg13[%c0_90, %c0_91] : memref<288x128xf32, #tpu.memory_space<vmem>>, vector<288x128xf32>
    tpu.vector_store %arg13[%c0_90, %c0_91], %78 {strides = array<i32>} : memref<288x128xf32, #tpu.memory_space<vmem>>, vector<288x128xf32>,
    %c0_92 = arith.constant 0 : index
    %c0_93 = arith.constant 0 : index
    %80 = tpu.strided_load %arg13[%c0_92, %c0_93] {strides = array<i32: 2, 1>} : memref<288x128xf32, #tpu.memory_space<vmem>>, vector<144x128xf32>
    %c1_94 = arith.constant 1 : index
    %c0_95 = arith.constant 0 : index
    %81 = tpu.strided_load %arg13[%c1_94, %c0_95] {strides = array<i32: 2, 1>} : memref<288x128xf32, #tpu.memory_space<vmem>>, vector<144x128xf32>
    %82 = arith.maximumf %80, %81 : vector<144x128xf32>
    %c0_96 = arith.constant 0 : index
    %c0_97 = arith.constant 0 : index
    %83 = vector.load %arg14[%c0_96, %c0_97] : memref<144x128xf32, #tpu.memory_space<vmem>>, vector<144x128xf32>
    tpu.vector_store %arg14[%c0_96, %c0_97], %82 {strides = array<i32>} : memref<144x128xf32, #tpu.memory_space<vmem>>, vector<144x128xf32>,
    %cst_98 = arith.constant 0.000000e+00 : f32
    %84 = vector.broadcast %cst_98 : f32 to vector<108x16xf32>
    %c0_99 = arith.constant 0 : index
    %c0_100 = arith.constant 0 : index
    %85 = vector.load %arg15[%c0_99, %c0_100] : memref<108x16xf32, #tpu.memory_space<vmem>>, vector<108x16xf32>
    tpu.vector_store %arg15[%c0_99, %c0_100], %84 {strides = array<i32>} : memref<108x16xf32, #tpu.memory_space<vmem>>, vector<108x16xf32>,
    %c0_101 = arith.constant 0 : index
    %c0_102 = arith.constant 0 : index
    %86 = vector.load %arg14[%c0_101, %c0_102] : memref<144x128xf32, #tpu.memory_space<vmem>>, vector<8x128xf32>
    %c9 = arith.constant 9 : index
    %c0_103 = arith.constant 0 : index
    %87 = vector.load %arg14[%c9, %c0_103] : memref<144x128xf32, #tpu.memory_space<vmem>>, vector<8x128xf32>
    %88 = arith.maximumf %86, %87 : vector<8x128xf32>
    %89 = vector.extract_strided_slice %88 {offsets = [0, 0], sizes = [8, 16], strides = [1, 1]} : vector<8x128xf32> to vector<8x16xf32>
    %c11 = arith.constant 11 : index
    %c0_104 = arith.constant 0 : index
    %90 = vector.load %arg15[%c11, %c0_104] : memref<108x16xf32, #tpu.memory_space<vmem>>, vector<8x16xf32>
    tpu.vector_store %arg15[%c11, %c0_104], %89 {strides = array<i32>} : memref<108x16xf32, #tpu.memory_space<vmem>>, vector<8x16xf32>,
    %c18_105 = arith.constant 18 : index
    %c0_106 = arith.constant 0 : index
    %91 = vector.load %arg14[%c18_105, %c0_106] : memref<144x128xf32, #tpu.memory_space<vmem>>, vector<8x128xf32>
    %c27 = arith.constant 27 : index
    %c0_107 = arith.constant 0 : index
    %92 = vector.load %arg14[%c27, %c0_107] : memref<144x128xf32, #tpu.memory_space<vmem>>, vector<8x128xf32>
    %93 = arith.maximumf %91, %92 : vector<8x128xf32>
    %94 = vector.extract_strided_slice %93 {offsets = [0, 0], sizes = [8, 16], strides = [1, 1]} : vector<8x128xf32> to vector<8x16xf32>
    %c21 = arith.constant 21 : index
    %c0_108 = arith.constant 0 : index
    %95 = vector.load %arg15[%c21, %c0_108] : memref<108x16xf32, #tpu.memory_space<vmem>>, vector<8x16xf32>
    tpu.vector_store %arg15[%c21, %c0_108], %94 {strides = array<i32>} : memref<108x16xf32, #tpu.memory_space<vmem>>, vector<8x16xf32>,
    %c36_109 = arith.constant 36 : index
    %c0_110 = arith.constant 0 : index
    %96 = vector.load %arg14[%c36_109, %c0_110] : memref<144x128xf32, #tpu.memory_space<vmem>>, vector<8x128xf32>
    %c45 = arith.constant 45 : index
    %c0_111 = arith.constant 0 : index
    %97 = vector.load %arg14[%c45, %c0_111] : memref<144x128xf32, #tpu.memory_space<vmem>>, vector<8x128xf32>
    %98 = arith.maximumf %96, %97 : vector<8x128xf32>
    %99 = vector.extract_strided_slice %98 {offsets = [0, 0], sizes = [8, 16], strides = [1, 1]} : vector<8x128xf32> to vector<8x16xf32>
    %c31 = arith.constant 31 : index
    %c0_112 = arith.constant 0 : index
    %100 = vector.load %arg15[%c31, %c0_112] : memref<108x16xf32, #tpu.memory_space<vmem>>, vector<8x16xf32>
    tpu.vector_store %arg15[%c31, %c0_112], %99 {strides = array<i32>} : memref<108x16xf32, #tpu.memory_space<vmem>>, vector<8x16xf32>,
    %c54 = arith.constant 54 : index
    %c0_113 = arith.constant 0 : index
    %101 = vector.load %arg14[%c54, %c0_113] : memref<144x128xf32, #tpu.memory_space<vmem>>, vector<8x128xf32>
    %c63 = arith.constant 63 : index
    %c0_114 = arith.constant 0 : index
    %102 = vector.load %arg14[%c63, %c0_114] : memref<144x128xf32, #tpu.memory_space<vmem>>, vector<8x128xf32>
    %103 = arith.maximumf %101, %102 : vector<8x128xf32>
    %104 = vector.extract_strided_slice %103 {offsets = [0, 0], sizes = [8, 16], strides = [1, 1]} : vector<8x128xf32> to vector<8x16xf32>
    %c41 = arith.constant 41 : index
    %c0_115 = arith.constant 0 : index
    %105 = vector.load %arg15[%c41, %c0_115] : memref<108x16xf32, #tpu.memory_space<vmem>>, vector<8x16xf32>
    tpu.vector_store %arg15[%c41, %c0_115], %104 {strides = array<i32>} : memref<108x16xf32, #tpu.memory_space<vmem>>, vector<8x16xf32>,
    %c72 = arith.constant 72 : index
    %c0_116 = arith.constant 0 : index
    %106 = vector.load %arg14[%c72, %c0_116] : memref<144x128xf32, #tpu.memory_space<vmem>>, vector<8x128xf32>
    %c81 = arith.constant 81 : index
    %c0_117 = arith.constant 0 : index
    %107 = vector.load %arg14[%c81, %c0_117] : memref<144x128xf32, #tpu.memory_space<vmem>>, vector<8x128xf32>
    %108 = arith.maximumf %106, %107 : vector<8x128xf32>
    %109 = vector.extract_strided_slice %108 {offsets = [0, 0], sizes = [8, 16], strides = [1, 1]} : vector<8x128xf32> to vector<8x16xf32>
    %c51 = arith.constant 51 : index
    %c0_118 = arith.constant 0 : index
    %110 = vector.load %arg15[%c51, %c0_118] : memref<108x16xf32, #tpu.memory_space<vmem>>, vector<8x16xf32>
    tpu.vector_store %arg15[%c51, %c0_118], %109 {strides = array<i32>} : memref<108x16xf32, #tpu.memory_space<vmem>>, vector<8x16xf32>,
    %c90 = arith.constant 90 : index
    %c0_119 = arith.constant 0 : index
    %111 = vector.load %arg14[%c90, %c0_119] : memref<144x128xf32, #tpu.memory_space<vmem>>, vector<8x128xf32>
    %c99 = arith.constant 99 : index
    %c0_120 = arith.constant 0 : index
    %112 = vector.load %arg14[%c99, %c0_120] : memref<144x128xf32, #tpu.memory_space<vmem>>, vector<8x128xf32>
    %113 = arith.maximumf %111, %112 : vector<8x128xf32>
    %114 = vector.extract_strided_slice %113 {offsets = [0, 0], sizes = [8, 16], strides = [1, 1]} : vector<8x128xf32> to vector<8x16xf32>
    %c61 = arith.constant 61 : index
    %c0_121 = arith.constant 0 : index
    %115 = vector.load %arg15[%c61, %c0_121] : memref<108x16xf32, #tpu.memory_space<vmem>>, vector<8x16xf32>
    tpu.vector_store %arg15[%c61, %c0_121], %114 {strides = array<i32>} : memref<108x16xf32, #tpu.memory_space<vmem>>, vector<8x16xf32>,
    %c108 = arith.constant 108 : index
    %c0_122 = arith.constant 0 : index
    %116 = vector.load %arg14[%c108, %c0_122] : memref<144x128xf32, #tpu.memory_space<vmem>>, vector<8x128xf32>
    %c117 = arith.constant 117 : index
    %c0_123 = arith.constant 0 : index
    %117 = vector.load %arg14[%c117, %c0_123] : memref<144x128xf32, #tpu.memory_space<vmem>>, vector<8x128xf32>
    %118 = arith.maximumf %116, %117 : vector<8x128xf32>
    %119 = vector.extract_strided_slice %118 {offsets = [0, 0], sizes = [8, 16], strides = [1, 1]} : vector<8x128xf32> to vector<8x16xf32>
    %c71 = arith.constant 71 : index
    %c0_124 = arith.constant 0 : index
    %120 = vector.load %arg15[%c71, %c0_124] : memref<108x16xf32, #tpu.memory_space<vmem>>, vector<8x16xf32>
    tpu.vector_store %arg15[%c71, %c0_124], %119 {strides = array<i32>} : memref<108x16xf32, #tpu.memory_space<vmem>>, vector<8x16xf32>,
    %c126 = arith.constant 126 : index
    %c0_125 = arith.constant 0 : index
    %121 = vector.load %arg14[%c126, %c0_125] : memref<144x128xf32, #tpu.memory_space<vmem>>, vector<8x128xf32>
    %c135 = arith.constant 135 : index
    %c0_126 = arith.constant 0 : index
    %122 = vector.load %arg14[%c135, %c0_126] : memref<144x128xf32, #tpu.memory_space<vmem>>, vector<8x128xf32>
    %123 = arith.maximumf %121, %122 : vector<8x128xf32>
    %124 = vector.extract_strided_slice %123 {offsets = [0, 0], sizes = [8, 16], strides = [1, 1]} : vector<8x128xf32> to vector<8x16xf32>
    %c81_127 = arith.constant 81 : index
    %c0_128 = arith.constant 0 : index
    %125 = vector.load %arg15[%c81_127, %c0_128] : memref<108x16xf32, #tpu.memory_space<vmem>>, vector<8x16xf32>
    tpu.vector_store %arg15[%c81_127, %c0_128], %124 {strides = array<i32>} : memref<108x16xf32, #tpu.memory_space<vmem>>, vector<8x16xf32>,
    %c0_129 = arith.constant 0 : index
    %c0_130 = arith.constant 0 : index
    %126 = vector.load %arg6[%c0_129, %c0_130] : memref<1x128xf32, #tpu.memory_space<vmem>>, vector<1x128xf32>
    %127 = vector.shape_cast %126 : vector<1x128xf32> to vector<1x128xf32>
    %128 = vector.broadcast %127 : vector<1x128xf32> to vector<80x128xf32>
    %c0_131 = arith.constant 0 : index
    %c0_132 = arith.constant 0 : index
    %129 = vector.load %arg13[%c0_131, %c0_132] : memref<288x128xf32, #tpu.memory_space<vmem>>, vector<80x128xf32>
    tpu.vector_store %arg13[%c0_131, %c0_132], %128 {strides = array<i32>} : memref<288x128xf32, #tpu.memory_space<vmem>>, vector<80x128xf32>,
    %c0_133 = arith.constant 0 : index
    %c0_134 = arith.constant 0 : index
    %130 = vector.load %arg15[%c0_133, %c0_134] : memref<108x16xf32, #tpu.memory_space<vmem>>, vector<80x16xf32>
    %131 = arith.truncf %130 : vector<80x16xf32> to vector<80x16xbf16>
    %c0_135 = arith.constant 0 : index
    %c0_136 = arith.constant 0 : index
    %132 = vector.load %arg13[%c0_135, %c0_136] : memref<288x128xf32, #tpu.memory_space<vmem>>, vector<80x128xf32>
    %c0_137 = arith.constant 0 : index
    %c0_138 = arith.constant 0 : index
    %c0_139 = arith.constant 0 : index
    %133 = vector.load %arg5[%c0_137, %c0_138, %c0_139] : memref<9x16x128xbf16, #tpu.memory_space<vmem>>, vector<1x16x128xbf16>
    %134 = vector.shape_cast %133 : vector<1x16x128xbf16> to vector<16x128xbf16>
    %cst_140 = arith.constant dense<0.000000e+00> : vector<80x128xf32>
    %135 = tpu.matmul %131, %134, %cst_140 {dimension_numbers = #tpu.dot_dimension_numbers<[1], [0], [0], [1], [0, 0, 1, 1], [], []>} : vector<80x16xbf16>, vector<16x128xbf16>, vector<80x128xf32> -> vector<80x128xf32>
    %136 = arith.addf %132, %135 : vector<80x128xf32>
    %c0_141 = arith.constant 0 : index
    %c0_142 = arith.constant 0 : index
    %137 = vector.load %arg13[%c0_141, %c0_142] : memref<288x128xf32, #tpu.memory_space<vmem>>, vector<80x128xf32>
    tpu.vector_store %arg13[%c0_141, %c0_142], %136 {strides = array<i32>} : memref<288x128xf32, #tpu.memory_space<vmem>>, vector<80x128xf32>,
    %c1_143 = arith.constant 1 : index
    %c0_144 = arith.constant 0 : index
    %138 = vector.load %arg15[%c1_143, %c0_144] : memref<108x16xf32, #tpu.memory_space<vmem>>, vector<80x16xf32>
    %139 = arith.truncf %138 : vector<80x16xf32> to vector<80x16xbf16>
    %c0_145 = arith.constant 0 : index
    %c0_146 = arith.constant 0 : index
    %140 = vector.load %arg13[%c0_145, %c0_146] : memref<288x128xf32, #tpu.memory_space<vmem>>, vector<80x128xf32>
    %c1_147 = arith.constant 1 : index
    %c0_148 = arith.constant 0 : index
    %c0_149 = arith.constant 0 : index
    %141 = vector.load %arg5[%c1_147, %c0_148, %c0_149] : memref<9x16x128xbf16, #tpu.memory_space<vmem>>, vector<1x16x128xbf16>
    %142 = vector.shape_cast %141 : vector<1x16x128xbf16> to vector<16x128xbf16>
    %cst_150 = arith.constant dense<0.000000e+00> : vector<80x128xf32>
    %143 = tpu.matmul %139, %142, %cst_150 {dimension_numbers = #tpu.dot_dimension_numbers<[1], [0], [0], [1], [0, 0, 1, 1], [], []>} : vector<80x16xbf16>, vector<16x128xbf16>, vector<80x128xf32> -> vector<80x128xf32>
    %144 = arith.addf %140, %143 : vector<80x128xf32>
    %c0_151 = arith.constant 0 : index
    %c0_152 = arith.constant 0 : index
    %145 = vector.load %arg13[%c0_151, %c0_152] : memref<288x128xf32, #tpu.memory_space<vmem>>, vector<80x128xf32>
    tpu.vector_store %arg13[%c0_151, %c0_152], %144 {strides = array<i32>} : memref<288x128xf32, #tpu.memory_space<vmem>>, vector<80x128xf32>,
    %c2_153 = arith.constant 2 : index
    %c0_154 = arith.constant 0 : index
    %146 = vector.load %arg15[%c2_153, %c0_154] : memref<108x16xf32, #tpu.memory_space<vmem>>, vector<80x16xf32>
    %147 = arith.truncf %146 : vector<80x16xf32> to vector<80x16xbf16>
    %c0_155 = arith.constant 0 : index
    %c0_156 = arith.constant 0 : index
    %148 = vector.load %arg13[%c0_155, %c0_156] : memref<288x128xf32, #tpu.memory_space<vmem>>, vector<80x128xf32>
    %c2_157 = arith.constant 2 : index
    %c0_158 = arith.constant 0 : index
    %c0_159 = arith.constant 0 : index
    %149 = vector.load %arg5[%c2_157, %c0_158, %c0_159] : memref<9x16x128xbf16, #tpu.memory_space<vmem>>, vector<1x16x128xbf16>
    %150 = vector.shape_cast %149 : vector<1x16x128xbf16> to vector<16x128xbf16>
    %cst_160 = arith.constant dense<0.000000e+00> : vector<80x128xf32>
    %151 = tpu.matmul %147, %150, %cst_160 {dimension_numbers = #tpu.dot_dimension_numbers<[1], [0], [0], [1], [0, 0, 1, 1], [], []>} : vector<80x16xbf16>, vector<16x128xbf16>, vector<80x128xf32> -> vector<80x128xf32>
    %152 = arith.addf %148, %151 : vector<80x128xf32>
    %c0_161 = arith.constant 0 : index
    %c0_162 = arith.constant 0 : index
    %153 = vector.load %arg13[%c0_161, %c0_162] : memref<288x128xf32, #tpu.memory_space<vmem>>, vector<80x128xf32>
    tpu.vector_store %arg13[%c0_161, %c0_162], %152 {strides = array<i32>} : memref<288x128xf32, #tpu.memory_space<vmem>>, vector<80x128xf32>,
    %c10 = arith.constant 10 : index
    %c0_163 = arith.constant 0 : index
    %154 = vector.load %arg15[%c10, %c0_163] : memref<108x16xf32, #tpu.memory_space<vmem>>, vector<80x16xf32>
    %155 = arith.truncf %154 : vector<80x16xf32> to vector<80x16xbf16>
    %c0_164 = arith.constant 0 : index
    %c0_165 = arith.constant 0 : index
    %156 = vector.load %arg13[%c0_164, %c0_165] : memref<288x128xf32, #tpu.memory_space<vmem>>, vector<80x128xf32>
    %c3_166 = arith.constant 3 : index
    %c0_167 = arith.constant 0 : index
    %c0_168 = arith.constant 0 : index
    %157 = vector.load %arg5[%c3_166, %c0_167, %c0_168] : memref<9x16x128xbf16, #tpu.memory_space<vmem>>, vector<1x16x128xbf16>
    %158 = vector.shape_cast %157 : vector<1x16x128xbf16> to vector<16x128xbf16>
    %cst_169 = arith.constant dense<0.000000e+00> : vector<80x128xf32>
    %159 = tpu.matmul %155, %158, %cst_169 {dimension_numbers = #tpu.dot_dimension_numbers<[1], [0], [0], [1], [0, 0, 1, 1], [], []>} : vector<80x16xbf16>, vector<16x128xbf16>, vector<80x128xf32> -> vector<80x128xf32>
    %160 = arith.addf %156, %159 : vector<80x128xf32>
    %c0_170 = arith.constant 0 : index
    %c0_171 = arith.constant 0 : index
    %161 = vector.load %arg13[%c0_170, %c0_171] : memref<288x128xf32, #tpu.memory_space<vmem>>, vector<80x128xf32>
    tpu.vector_store %arg13[%c0_170, %c0_171], %160 {strides = array<i32>} : memref<288x128xf32, #tpu.memory_space<vmem>>, vector<80x128xf32>,
    %c11_172 = arith.constant 11 : index
    %c0_173 = arith.constant 0 : index
    %162 = vector.load %arg15[%c11_172, %c0_173] : memref<108x16xf32, #tpu.memory_space<vmem>>, vector<80x16xf32>
    %163 = arith.truncf %162 : vector<80x16xf32> to vector<80x16xbf16>
    %c0_174 = arith.constant 0 : index
    %c0_175 = arith.constant 0 : index
    %164 = vector.load %arg13[%c0_174, %c0_175] : memref<288x128xf32, #tpu.memory_space<vmem>>, vector<80x128xf32>
    %c4_176 = arith.constant 4 : index
    %c0_177 = arith.constant 0 : index
    %c0_178 = arith.constant 0 : index
    %165 = vector.load %arg5[%c4_176, %c0_177, %c0_178] : memref<9x16x128xbf16, #tpu.memory_space<vmem>>, vector<1x16x128xbf16>
    %166 = vector.shape_cast %165 : vector<1x16x128xbf16> to vector<16x128xbf16>
    %cst_179 = arith.constant dense<0.000000e+00> : vector<80x128xf32>
    %167 = tpu.matmul %163, %166, %cst_179 {dimension_numbers = #tpu.dot_dimension_numbers<[1], [0], [0], [1], [0, 0, 1, 1], [], []>} : vector<80x16xbf16>, vector<16x128xbf16>, vector<80x128xf32> -> vector<80x128xf32>
    %168 = arith.addf %164, %167 : vector<80x128xf32>
    %c0_180 = arith.constant 0 : index
    %c0_181 = arith.constant 0 : index
    %169 = vector.load %arg13[%c0_180, %c0_181] : memref<288x128xf32, #tpu.memory_space<vmem>>, vector<80x128xf32>
    tpu.vector_store %arg13[%c0_180, %c0_181], %168 {strides = array<i32>} : memref<288x128xf32, #tpu.memory_space<vmem>>, vector<80x128xf32>,
    %c12 = arith.constant 12 : index
    %c0_182 = arith.constant 0 : index
    %170 = vector.load %arg15[%c12, %c0_182] : memref<108x16xf32, #tpu.memory_space<vmem>>, vector<80x16xf32>
    %171 = arith.truncf %170 : vector<80x16xf32> to vector<80x16xbf16>
    %c0_183 = arith.constant 0 : index
    %c0_184 = arith.constant 0 : index
    %172 = vector.load %arg13[%c0_183, %c0_184] : memref<288x128xf32, #tpu.memory_space<vmem>>, vector<80x128xf32>
    %c5_185 = arith.constant 5 : index
    %c0_186 = arith.constant 0 : index
    %c0_187 = arith.constant 0 : index
    %173 = vector.load %arg5[%c5_185, %c0_186, %c0_187] : memref<9x16x128xbf16, #tpu.memory_space<vmem>>, vector<1x16x128xbf16>
    %174 = vector.shape_cast %173 : vector<1x16x128xbf16> to vector<16x128xbf16>
    %cst_188 = arith.constant dense<0.000000e+00> : vector<80x128xf32>
    %175 = tpu.matmul %171, %174, %cst_188 {dimension_numbers = #tpu.dot_dimension_numbers<[1], [0], [0], [1], [0, 0, 1, 1], [], []>} : vector<80x16xbf16>, vector<16x128xbf16>, vector<80x128xf32> -> vector<80x128xf32>
    %176 = arith.addf %172, %175 : vector<80x128xf32>
    %c0_189 = arith.constant 0 : index
    %c0_190 = arith.constant 0 : index
    %177 = vector.load %arg13[%c0_189, %c0_190] : memref<288x128xf32, #tpu.memory_space<vmem>>, vector<80x128xf32>
    tpu.vector_store %arg13[%c0_189, %c0_190], %176 {strides = array<i32>} : memref<288x128xf32, #tpu.memory_space<vmem>>, vector<80x128xf32>,
    %c20_191 = arith.constant 20 : index
    %c0_192 = arith.constant 0 : index
    %178 = vector.load %arg15[%c20_191, %c0_192] : memref<108x16xf32, #tpu.memory_space<vmem>>, vector<80x16xf32>
    %179 = arith.truncf %178 : vector<80x16xf32> to vector<80x16xbf16>
    %c0_193 = arith.constant 0 : index
    %c0_194 = arith.constant 0 : index
    %180 = vector.load %arg13[%c0_193, %c0_194] : memref<288x128xf32, #tpu.memory_space<vmem>>, vector<80x128xf32>
    %c6_195 = arith.constant 6 : index
    %c0_196 = arith.constant 0 : index
    %c0_197 = arith.constant 0 : index
    %181 = vector.load %arg5[%c6_195, %c0_196, %c0_197] : memref<9x16x128xbf16, #tpu.memory_space<vmem>>, vector<1x16x128xbf16>
    %182 = vector.shape_cast %181 : vector<1x16x128xbf16> to vector<16x128xbf16>
    %cst_198 = arith.constant dense<0.000000e+00> : vector<80x128xf32>
    %183 = tpu.matmul %179, %182, %cst_198 {dimension_numbers = #tpu.dot_dimension_numbers<[1], [0], [0], [1], [0, 0, 1, 1], [], []>} : vector<80x16xbf16>, vector<16x128xbf16>, vector<80x128xf32> -> vector<80x128xf32>
    %184 = arith.addf %180, %183 : vector<80x128xf32>
    %c0_199 = arith.constant 0 : index
    %c0_200 = arith.constant 0 : index
    %185 = vector.load %arg13[%c0_199, %c0_200] : memref<288x128xf32, #tpu.memory_space<vmem>>, vector<80x128xf32>
    tpu.vector_store %arg13[%c0_199, %c0_200], %184 {strides = array<i32>} : memref<288x128xf32, #tpu.memory_space<vmem>>, vector<80x128xf32>,
    %c21_201 = arith.constant 21 : index
    %c0_202 = arith.constant 0 : index
    %186 = vector.load %arg15[%c21_201, %c0_202] : memref<108x16xf32, #tpu.memory_space<vmem>>, vector<80x16xf32>
    %187 = arith.truncf %186 : vector<80x16xf32> to vector<80x16xbf16>
    %c0_203 = arith.constant 0 : index
    %c0_204 = arith.constant 0 : index
    %188 = vector.load %arg13[%c0_203, %c0_204] : memref<288x128xf32, #tpu.memory_space<vmem>>, vector<80x128xf32>
    %c7_205 = arith.constant 7 : index
    %c0_206 = arith.constant 0 : index
    %c0_207 = arith.constant 0 : index
    %189 = vector.load %arg5[%c7_205, %c0_206, %c0_207] : memref<9x16x128xbf16, #tpu.memory_space<vmem>>, vector<1x16x128xbf16>
    %190 = vector.shape_cast %189 : vector<1x16x128xbf16> to vector<16x128xbf16>
    %cst_208 = arith.constant dense<0.000000e+00> : vector<80x128xf32>
    %191 = tpu.matmul %187, %190, %cst_208 {dimension_numbers = #tpu.dot_dimension_numbers<[1], [0], [0], [1], [0, 0, 1, 1], [], []>} : vector<80x16xbf16>, vector<16x128xbf16>, vector<80x128xf32> -> vector<80x128xf32>
    %192 = arith.addf %188, %191 : vector<80x128xf32>
    %c0_209 = arith.constant 0 : index
    %c0_210 = arith.constant 0 : index
    %193 = vector.load %arg13[%c0_209, %c0_210] : memref<288x128xf32, #tpu.memory_space<vmem>>, vector<80x128xf32>
    tpu.vector_store %arg13[%c0_209, %c0_210], %192 {strides = array<i32>} : memref<288x128xf32, #tpu.memory_space<vmem>>, vector<80x128xf32>,
    %c22 = arith.constant 22 : index
    %c0_211 = arith.constant 0 : index
    %194 = vector.load %arg15[%c22, %c0_211] : memref<108x16xf32, #tpu.memory_space<vmem>>, vector<80x16xf32>
    %195 = arith.truncf %194 : vector<80x16xf32> to vector<80x16xbf16>
    %c0_212 = arith.constant 0 : index
    %c0_213 = arith.constant 0 : index
    %196 = vector.load %arg13[%c0_212, %c0_213] : memref<288x128xf32, #tpu.memory_space<vmem>>, vector<80x128xf32>
    %c8_214 = arith.constant 8 : index
    %c0_215 = arith.constant 0 : index
    %c0_216 = arith.constant 0 : index
    %197 = vector.load %arg5[%c8_214, %c0_215, %c0_216] : memref<9x16x128xbf16, #tpu.memory_space<vmem>>, vector<1x16x128xbf16>
    %198 = vector.shape_cast %197 : vector<1x16x128xbf16> to vector<16x128xbf16>
    %cst_217 = arith.constant dense<0.000000e+00> : vector<80x128xf32>
    %199 = tpu.matmul %195, %198, %cst_217 {dimension_numbers = #tpu.dot_dimension_numbers<[1], [0], [0], [1], [0, 0, 1, 1], [], []>} : vector<80x16xbf16>, vector<16x128xbf16>, vector<80x128xf32> -> vector<80x128xf32>
    %200 = arith.addf %196, %199 : vector<80x128xf32>
    %c0_218 = arith.constant 0 : index
    %c0_219 = arith.constant 0 : index
    %201 = vector.load %arg13[%c0_218, %c0_219] : memref<288x128xf32, #tpu.memory_space<vmem>>, vector<80x128xf32>
    tpu.vector_store %arg13[%c0_218, %c0_219], %200 {strides = array<i32>} : memref<288x128xf32, #tpu.memory_space<vmem>>, vector<80x128xf32>,
    %c0_220 = arith.constant 0 : index
    %c0_221 = arith.constant 0 : index
    %202 = vector.load %arg13[%c0_220, %c0_221] : memref<288x128xf32, #tpu.memory_space<vmem>>, vector<80x128xf32>
    %cst_222 = arith.constant 0.000000e+00 : f32
    %203 = vector.broadcast %cst_222 : f32 to vector<80x128xf32>
    %204 = arith.maximumf %202, %203 : vector<80x128xf32>
    %c0_223 = arith.constant 0 : index
    %c0_224 = arith.constant 0 : index
    %205 = vector.load %arg13[%c0_223, %c0_224] : memref<288x128xf32, #tpu.memory_space<vmem>>, vector<80x128xf32>
    tpu.vector_store %arg13[%c0_223, %c0_224], %204 {strides = array<i32>} : memref<288x128xf32, #tpu.memory_space<vmem>>, vector<80x128xf32>,
    %c0_225 = arith.constant 0 : index
    %c0_226 = arith.constant 0 : index
    %206 = tpu.strided_load %arg13[%c0_225, %c0_226] {strides = array<i32: 2, 1>} : memref<288x128xf32, #tpu.memory_space<vmem>>, vector<40x128xf32>
    %c1_227 = arith.constant 1 : index
    %c0_228 = arith.constant 0 : index
    %207 = tpu.strided_load %arg13[%c1_227, %c0_228] {strides = array<i32: 2, 1>} : memref<288x128xf32, #tpu.memory_space<vmem>>, vector<40x128xf32>
    %208 = arith.maximumf %206, %207 : vector<40x128xf32>
    %c0_229 = arith.constant 0 : index
    %c0_230 = arith.constant 0 : index
    %209 = vector.load %arg14[%c0_229, %c0_230] : memref<144x128xf32, #tpu.memory_space<vmem>>, vector<40x128xf32>
    tpu.vector_store %arg14[%c0_229, %c0_230], %208 {strides = array<i32>} : memref<144x128xf32, #tpu.memory_space<vmem>>, vector<40x128xf32>,
    %cst_231 = arith.constant 0.000000e+00 : f32
    %210 = vector.broadcast %cst_231 : f32 to vector<108x16xf32>
    %c0_232 = arith.constant 0 : index
    %c0_233 = arith.constant 0 : index
    %211 = vector.load %arg16[%c0_232, %c0_233] : memref<108x16xf32, #tpu.memory_space<vmem>>, vector<108x16xf32>
    tpu.vector_store %arg16[%c0_232, %c0_233], %210 {strides = array<i32>} : memref<108x16xf32, #tpu.memory_space<vmem>>, vector<108x16xf32>,
    %c0_234 = arith.constant 0 : index
    %c0_235 = arith.constant 0 : index
    %212 = vector.load %arg14[%c0_234, %c0_235] : memref<144x128xf32, #tpu.memory_space<vmem>>, vector<4x128xf32>
    %c5_236 = arith.constant 5 : index
    %c0_237 = arith.constant 0 : index
    %213 = vector.load %arg14[%c5_236, %c0_237] : memref<144x128xf32, #tpu.memory_space<vmem>>, vector<4x128xf32>
    %214 = arith.maximumf %212, %213 : vector<4x128xf32>
    %215 = vector.extract_strided_slice %214 {offsets = [0, 0], sizes = [4, 16], strides = [1, 1]} : vector<4x128xf32> to vector<4x16xf32>
    %c7_238 = arith.constant 7 : index
    %c0_239 = arith.constant 0 : index
    %216 = vector.load %arg16[%c7_238, %c0_239] : memref<108x16xf32, #tpu.memory_space<vmem>>, vector<4x16xf32>
    tpu.vector_store %arg16[%c7_238, %c0_239], %215 {strides = array<i32>} : memref<108x16xf32, #tpu.memory_space<vmem>>, vector<4x16xf32>,
    %c10_240 = arith.constant 10 : index
    %c0_241 = arith.constant 0 : index
    %217 = vector.load %arg14[%c10_240, %c0_241] : memref<144x128xf32, #tpu.memory_space<vmem>>, vector<4x128xf32>
    %c15 = arith.constant 15 : index
    %c0_242 = arith.constant 0 : index
    %218 = vector.load %arg14[%c15, %c0_242] : memref<144x128xf32, #tpu.memory_space<vmem>>, vector<4x128xf32>
    %219 = arith.maximumf %217, %218 : vector<4x128xf32>
    %220 = vector.extract_strided_slice %219 {offsets = [0, 0], sizes = [4, 16], strides = [1, 1]} : vector<4x128xf32> to vector<4x16xf32>
    %c13 = arith.constant 13 : index
    %c0_243 = arith.constant 0 : index
    %221 = vector.load %arg16[%c13, %c0_243] : memref<108x16xf32, #tpu.memory_space<vmem>>, vector<4x16xf32>
    tpu.vector_store %arg16[%c13, %c0_243], %220 {strides = array<i32>} : memref<108x16xf32, #tpu.memory_space<vmem>>, vector<4x16xf32>,
    %c20_244 = arith.constant 20 : index
    %c0_245 = arith.constant 0 : index
    %222 = vector.load %arg14[%c20_244, %c0_245] : memref<144x128xf32, #tpu.memory_space<vmem>>, vector<4x128xf32>
    %c25 = arith.constant 25 : index
    %c0_246 = arith.constant 0 : index
    %223 = vector.load %arg14[%c25, %c0_246] : memref<144x128xf32, #tpu.memory_space<vmem>>, vector<4x128xf32>
    %224 = arith.maximumf %222, %223 : vector<4x128xf32>
    %225 = vector.extract_strided_slice %224 {offsets = [0, 0], sizes = [4, 16], strides = [1, 1]} : vector<4x128xf32> to vector<4x16xf32>
    %c19_247 = arith.constant 19 : index
    %c0_248 = arith.constant 0 : index
    %226 = vector.load %arg16[%c19_247, %c0_248] : memref<108x16xf32, #tpu.memory_space<vmem>>, vector<4x16xf32>
    tpu.vector_store %arg16[%c19_247, %c0_248], %225 {strides = array<i32>} : memref<108x16xf32, #tpu.memory_space<vmem>>, vector<4x16xf32>,
    %c30 = arith.constant 30 : index
    %c0_249 = arith.constant 0 : index
    %227 = vector.load %arg14[%c30, %c0_249] : memref<144x128xf32, #tpu.memory_space<vmem>>, vector<4x128xf32>
    %c35 = arith.constant 35 : index
    %c0_250 = arith.constant 0 : index
    %228 = vector.load %arg14[%c35, %c0_250] : memref<144x128xf32, #tpu.memory_space<vmem>>, vector<4x128xf32>
    %229 = arith.maximumf %227, %228 : vector<4x128xf32>
    %230 = vector.extract_strided_slice %229 {offsets = [0, 0], sizes = [4, 16], strides = [1, 1]} : vector<4x128xf32> to vector<4x16xf32>
    %c25_251 = arith.constant 25 : index
    %c0_252 = arith.constant 0 : index
    %231 = vector.load %arg16[%c25_251, %c0_252] : memref<108x16xf32, #tpu.memory_space<vmem>>, vector<4x16xf32>
    tpu.vector_store %arg16[%c25_251, %c0_252], %230 {strides = array<i32>} : memref<108x16xf32, #tpu.memory_space<vmem>>, vector<4x16xf32>,
    %c0_253 = arith.constant 0 : index
    %c0_254 = arith.constant 0 : index
    %232 = vector.load %arg8[%c0_253, %c0_254] : memref<1x128xf32, #tpu.memory_space<vmem>>, vector<1x128xf32>
    %233 = vector.shape_cast %232 : vector<1x128xf32> to vector<1x128xf32>
    %234 = vector.broadcast %233 : vector<1x128xf32> to vector<24x128xf32>
    %c0_255 = arith.constant 0 : index
    %c0_256 = arith.constant 0 : index
    %235 = vector.load %arg13[%c0_255, %c0_256] : memref<288x128xf32, #tpu.memory_space<vmem>>, vector<24x128xf32>
    tpu.vector_store %arg13[%c0_255, %c0_256], %234 {strides = array<i32>} : memref<288x128xf32, #tpu.memory_space<vmem>>, vector<24x128xf32>,
    %c0_257 = arith.constant 0 : index
    %c0_258 = arith.constant 0 : index
    %236 = vector.load %arg16[%c0_257, %c0_258] : memref<108x16xf32, #tpu.memory_space<vmem>>, vector<24x16xf32>
    %237 = arith.truncf %236 : vector<24x16xf32> to vector<24x16xbf16>
    %c0_259 = arith.constant 0 : index
    %c0_260 = arith.constant 0 : index
    %238 = vector.load %arg13[%c0_259, %c0_260] : memref<288x128xf32, #tpu.memory_space<vmem>>, vector<24x128xf32>
    %c0_261 = arith.constant 0 : index
    %c0_262 = arith.constant 0 : index
    %c0_263 = arith.constant 0 : index
    %239 = vector.load %arg7[%c0_261, %c0_262, %c0_263] : memref<9x16x128xbf16, #tpu.memory_space<vmem>>, vector<1x16x128xbf16>
    %240 = vector.shape_cast %239 : vector<1x16x128xbf16> to vector<16x128xbf16>
    %cst_264 = arith.constant dense<0.000000e+00> : vector<24x128xf32>
    %241 = tpu.matmul %237, %240, %cst_264 {dimension_numbers = #tpu.dot_dimension_numbers<[1], [0], [0], [1], [0, 0, 1, 1], [], []>} : vector<24x16xbf16>, vector<16x128xbf16>, vector<24x128xf32> -> vector<24x128xf32>
    %242 = arith.addf %238, %241 : vector<24x128xf32>
    %c0_265 = arith.constant 0 : index
    %c0_266 = arith.constant 0 : index
    %243 = vector.load %arg13[%c0_265, %c0_266] : memref<288x128xf32, #tpu.memory_space<vmem>>, vector<24x128xf32>
    tpu.vector_store %arg13[%c0_265, %c0_266], %242 {strides = array<i32>} : memref<288x128xf32, #tpu.memory_space<vmem>>, vector<24x128xf32>,
    %c1_267 = arith.constant 1 : index
    %c0_268 = arith.constant 0 : index
    %244 = vector.load %arg16[%c1_267, %c0_268] : memref<108x16xf32, #tpu.memory_space<vmem>>, vector<24x16xf32>
    %245 = arith.truncf %244 : vector<24x16xf32> to vector<24x16xbf16>
    %c0_269 = arith.constant 0 : index
    %c0_270 = arith.constant 0 : index
    %246 = vector.load %arg13[%c0_269, %c0_270] : memref<288x128xf32, #tpu.memory_space<vmem>>, vector<24x128xf32>
    %c1_271 = arith.constant 1 : index
    %c0_272 = arith.constant 0 : index
    %c0_273 = arith.constant 0 : index
    %247 = vector.load %arg7[%c1_271, %c0_272, %c0_273] : memref<9x16x128xbf16, #tpu.memory_space<vmem>>, vector<1x16x128xbf16>
    %248 = vector.shape_cast %247 : vector<1x16x128xbf16> to vector<16x128xbf16>
    %cst_274 = arith.constant dense<0.000000e+00> : vector<24x128xf32>
    %249 = tpu.matmul %245, %248, %cst_274 {dimension_numbers = #tpu.dot_dimension_numbers<[1], [0], [0], [1], [0, 0, 1, 1], [], []>} : vector<24x16xbf16>, vector<16x128xbf16>, vector<24x128xf32> -> vector<24x128xf32>
    %250 = arith.addf %246, %249 : vector<24x128xf32>
    %c0_275 = arith.constant 0 : index
    %c0_276 = arith.constant 0 : index
    %251 = vector.load %arg13[%c0_275, %c0_276] : memref<288x128xf32, #tpu.memory_space<vmem>>, vector<24x128xf32>
    tpu.vector_store %arg13[%c0_275, %c0_276], %250 {strides = array<i32>} : memref<288x128xf32, #tpu.memory_space<vmem>>, vector<24x128xf32>,
    %c2_277 = arith.constant 2 : index
    %c0_278 = arith.constant 0 : index
    %252 = vector.load %arg16[%c2_277, %c0_278] : memref<108x16xf32, #tpu.memory_space<vmem>>, vector<24x16xf32>
    %253 = arith.truncf %252 : vector<24x16xf32> to vector<24x16xbf16>
    %c0_279 = arith.constant 0 : index
    %c0_280 = arith.constant 0 : index
    %254 = vector.load %arg13[%c0_279, %c0_280] : memref<288x128xf32, #tpu.memory_space<vmem>>, vector<24x128xf32>
    %c2_281 = arith.constant 2 : index
    %c0_282 = arith.constant 0 : index
    %c0_283 = arith.constant 0 : index
    %255 = vector.load %arg7[%c2_281, %c0_282, %c0_283] : memref<9x16x128xbf16, #tpu.memory_space<vmem>>, vector<1x16x128xbf16>
    %256 = vector.shape_cast %255 : vector<1x16x128xbf16> to vector<16x128xbf16>
    %cst_284 = arith.constant dense<0.000000e+00> : vector<24x128xf32>
    %257 = tpu.matmul %253, %256, %cst_284 {dimension_numbers = #tpu.dot_dimension_numbers<[1], [0], [0], [1], [0, 0, 1, 1], [], []>} : vector<24x16xbf16>, vector<16x128xbf16>, vector<24x128xf32> -> vector<24x128xf32>
    %258 = arith.addf %254, %257 : vector<24x128xf32>
    %c0_285 = arith.constant 0 : index
    %c0_286 = arith.constant 0 : index
    %259 = vector.load %arg13[%c0_285, %c0_286] : memref<288x128xf32, #tpu.memory_space<vmem>>, vector<24x128xf32>
    tpu.vector_store %arg13[%c0_285, %c0_286], %258 {strides = array<i32>} : memref<288x128xf32, #tpu.memory_space<vmem>>, vector<24x128xf32>,
    %c6_287 = arith.constant 6 : index
    %c0_288 = arith.constant 0 : index
    %260 = vector.load %arg16[%c6_287, %c0_288] : memref<108x16xf32, #tpu.memory_space<vmem>>, vector<24x16xf32>
    %261 = arith.truncf %260 : vector<24x16xf32> to vector<24x16xbf16>
    %c0_289 = arith.constant 0 : index
    %c0_290 = arith.constant 0 : index
    %262 = vector.load %arg13[%c0_289, %c0_290] : memref<288x128xf32, #tpu.memory_space<vmem>>, vector<24x128xf32>
    %c3_291 = arith.constant 3 : index
    %c0_292 = arith.constant 0 : index
    %c0_293 = arith.constant 0 : index
    %263 = vector.load %arg7[%c3_291, %c0_292, %c0_293] : memref<9x16x128xbf16, #tpu.memory_space<vmem>>, vector<1x16x128xbf16>
    %264 = vector.shape_cast %263 : vector<1x16x128xbf16> to vector<16x128xbf16>
    %cst_294 = arith.constant dense<0.000000e+00> : vector<24x128xf32>
    %265 = tpu.matmul %261, %264, %cst_294 {dimension_numbers = #tpu.dot_dimension_numbers<[1], [0], [0], [1], [0, 0, 1, 1], [], []>} : vector<24x16xbf16>, vector<16x128xbf16>, vector<24x128xf32> -> vector<24x128xf32>
    %266 = arith.addf %262, %265 : vector<24x128xf32>
    %c0_295 = arith.constant 0 : index
    %c0_296 = arith.constant 0 : index
    %267 = vector.load %arg13[%c0_295, %c0_296] : memref<288x128xf32, #tpu.memory_space<vmem>>, vector<24x128xf32>
    tpu.vector_store %arg13[%c0_295, %c0_296], %266 {strides = array<i32>} : memref<288x128xf32, #tpu.memory_space<vmem>>, vector<24x128xf32>,
    %c7_297 = arith.constant 7 : index
    %c0_298 = arith.constant 0 : index
    %268 = vector.load %arg16[%c7_297, %c0_298] : memref<108x16xf32, #tpu.memory_space<vmem>>, vector<24x16xf32>
    %269 = arith.truncf %268 : vector<24x16xf32> to vector<24x16xbf16>
    %c0_299 = arith.constant 0 : index
    %c0_300 = arith.constant 0 : index
    %270 = vector.load %arg13[%c0_299, %c0_300] : memref<288x128xf32, #tpu.memory_space<vmem>>, vector<24x128xf32>
    %c4_301 = arith.constant 4 : index
    %c0_302 = arith.constant 0 : index
    %c0_303 = arith.constant 0 : index
    %271 = vector.load %arg7[%c4_301, %c0_302, %c0_303] : memref<9x16x128xbf16, #tpu.memory_space<vmem>>, vector<1x16x128xbf16>
    %272 = vector.shape_cast %271 : vector<1x16x128xbf16> to vector<16x128xbf16>
    %cst_304 = arith.constant dense<0.000000e+00> : vector<24x128xf32>
    %273 = tpu.matmul %269, %272, %cst_304 {dimension_numbers = #tpu.dot_dimension_numbers<[1], [0], [0], [1], [0, 0, 1, 1], [], []>} : vector<24x16xbf16>, vector<16x128xbf16>, vector<24x128xf32> -> vector<24x128xf32>
    %274 = arith.addf %270, %273 : vector<24x128xf32>
    %c0_305 = arith.constant 0 : index
    %c0_306 = arith.constant 0 : index
    %275 = vector.load %arg13[%c0_305, %c0_306] : memref<288x128xf32, #tpu.memory_space<vmem>>, vector<24x128xf32>
    tpu.vector_store %arg13[%c0_305, %c0_306], %274 {strides = array<i32>} : memref<288x128xf32, #tpu.memory_space<vmem>>, vector<24x128xf32>,
    %c8_307 = arith.constant 8 : index
    %c0_308 = arith.constant 0 : index
    %276 = vector.load %arg16[%c8_307, %c0_308] : memref<108x16xf32, #tpu.memory_space<vmem>>, vector<24x16xf32>
    %277 = arith.truncf %276 : vector<24x16xf32> to vector<24x16xbf16>
    %c0_309 = arith.constant 0 : index
    %c0_310 = arith.constant 0 : index
    %278 = vector.load %arg13[%c0_309, %c0_310] : memref<288x128xf32, #tpu.memory_space<vmem>>, vector<24x128xf32>
    %c5_311 = arith.constant 5 : index
    %c0_312 = arith.constant 0 : index
    %c0_313 = arith.constant 0 : index
    %279 = vector.load %arg7[%c5_311, %c0_312, %c0_313] : memref<9x16x128xbf16, #tpu.memory_space<vmem>>, vector<1x16x128xbf16>
    %280 = vector.shape_cast %279 : vector<1x16x128xbf16> to vector<16x128xbf16>
    %cst_314 = arith.constant dense<0.000000e+00> : vector<24x128xf32>
    %281 = tpu.matmul %277, %280, %cst_314 {dimension_numbers = #tpu.dot_dimension_numbers<[1], [0], [0], [1], [0, 0, 1, 1], [], []>} : vector<24x16xbf16>, vector<16x128xbf16>, vector<24x128xf32> -> vector<24x128xf32>
    %282 = arith.addf %278, %281 : vector<24x128xf32>
    %c0_315 = arith.constant 0 : index
    %c0_316 = arith.constant 0 : index
    %283 = vector.load %arg13[%c0_315, %c0_316] : memref<288x128xf32, #tpu.memory_space<vmem>>, vector<24x128xf32>
    tpu.vector_store %arg13[%c0_315, %c0_316], %282 {strides = array<i32>} : memref<288x128xf32, #tpu.memory_space<vmem>>, vector<24x128xf32>,
    %c12_317 = arith.constant 12 : index
    %c0_318 = arith.constant 0 : index
    %284 = vector.load %arg16[%c12_317, %c0_318] : memref<108x16xf32, #tpu.memory_space<vmem>>, vector<24x16xf32>
    %285 = arith.truncf %284 : vector<24x16xf32> to vector<24x16xbf16>
    %c0_319 = arith.constant 0 : index
    %c0_320 = arith.constant 0 : index
    %286 = vector.load %arg13[%c0_319, %c0_320] : memref<288x128xf32, #tpu.memory_space<vmem>>, vector<24x128xf32>
    %c6_321 = arith.constant 6 : index
    %c0_322 = arith.constant 0 : index
    %c0_323 = arith.constant 0 : index
    %287 = vector.load %arg7[%c6_321, %c0_322, %c0_323] : memref<9x16x128xbf16, #tpu.memory_space<vmem>>, vector<1x16x128xbf16>
    %288 = vector.shape_cast %287 : vector<1x16x128xbf16> to vector<16x128xbf16>
    %cst_324 = arith.constant dense<0.000000e+00> : vector<24x128xf32>
    %289 = tpu.matmul %285, %288, %cst_324 {dimension_numbers = #tpu.dot_dimension_numbers<[1], [0], [0], [1], [0, 0, 1, 1], [], []>} : vector<24x16xbf16>, vector<16x128xbf16>, vector<24x128xf32> -> vector<24x128xf32>
    %290 = arith.addf %286, %289 : vector<24x128xf32>
    %c0_325 = arith.constant 0 : index
    %c0_326 = arith.constant 0 : index
    %291 = vector.load %arg13[%c0_325, %c0_326] : memref<288x128xf32, #tpu.memory_space<vmem>>, vector<24x128xf32>
    tpu.vector_store %arg13[%c0_325, %c0_326], %290 {strides = array<i32>} : memref<288x128xf32, #tpu.memory_space<vmem>>, vector<24x128xf32>,
    %c13_327 = arith.constant 13 : index
    %c0_328 = arith.constant 0 : index
    %292 = vector.load %arg16[%c13_327, %c0_328] : memref<108x16xf32, #tpu.memory_space<vmem>>, vector<24x16xf32>
    %293 = arith.truncf %292 : vector<24x16xf32> to vector<24x16xbf16>
    %c0_329 = arith.constant 0 : index
    %c0_330 = arith.constant 0 : index
    %294 = vector.load %arg13[%c0_329, %c0_330] : memref<288x128xf32, #tpu.memory_space<vmem>>, vector<24x128xf32>
    %c7_331 = arith.constant 7 : index
    %c0_332 = arith.constant 0 : index
    %c0_333 = arith.constant 0 : index
    %295 = vector.load %arg7[%c7_331, %c0_332, %c0_333] : memref<9x16x128xbf16, #tpu.memory_space<vmem>>, vector<1x16x128xbf16>
    %296 = vector.shape_cast %295 : vector<1x16x128xbf16> to vector<16x128xbf16>
    %cst_334 = arith.constant dense<0.000000e+00> : vector<24x128xf32>
    %297 = tpu.matmul %293, %296, %cst_334 {dimension_numbers = #tpu.dot_dimension_numbers<[1], [0], [0], [1], [0, 0, 1, 1], [], []>} : vector<24x16xbf16>, vector<16x128xbf16>, vector<24x128xf32> -> vector<24x128xf32>
    %298 = arith.addf %294, %297 : vector<24x128xf32>
    %c0_335 = arith.constant 0 : index
    %c0_336 = arith.constant 0 : index
    %299 = vector.load %arg13[%c0_335, %c0_336] : memref<288x128xf32, #tpu.memory_space<vmem>>, vector<24x128xf32>
    tpu.vector_store %arg13[%c0_335, %c0_336], %298 {strides = array<i32>} : memref<288x128xf32, #tpu.memory_space<vmem>>, vector<24x128xf32>,
    %c14 = arith.constant 14 : index
    %c0_337 = arith.constant 0 : index
    %300 = vector.load %arg16[%c14, %c0_337] : memref<108x16xf32, #tpu.memory_space<vmem>>, vector<24x16xf32>
    %301 = arith.truncf %300 : vector<24x16xf32> to vector<24x16xbf16>
    %c0_338 = arith.constant 0 : index
    %c0_339 = arith.constant 0 : index
    %302 = vector.load %arg13[%c0_338, %c0_339] : memref<288x128xf32, #tpu.memory_space<vmem>>, vector<24x128xf32>
    %c8_340 = arith.constant 8 : index
    %c0_341 = arith.constant 0 : index
    %c0_342 = arith.constant 0 : index
    %303 = vector.load %arg7[%c8_340, %c0_341, %c0_342] : memref<9x16x128xbf16, #tpu.memory_space<vmem>>, vector<1x16x128xbf16>
    %304 = vector.shape_cast %303 : vector<1x16x128xbf16> to vector<16x128xbf16>
    %cst_343 = arith.constant dense<0.000000e+00> : vector<24x128xf32>
    %305 = tpu.matmul %301, %304, %cst_343 {dimension_numbers = #tpu.dot_dimension_numbers<[1], [0], [0], [1], [0, 0, 1, 1], [], []>} : vector<24x16xbf16>, vector<16x128xbf16>, vector<24x128xf32> -> vector<24x128xf32>
    %306 = arith.addf %302, %305 : vector<24x128xf32>
    %c0_344 = arith.constant 0 : index
    %c0_345 = arith.constant 0 : index
    %307 = vector.load %arg13[%c0_344, %c0_345] : memref<288x128xf32, #tpu.memory_space<vmem>>, vector<24x128xf32>
    tpu.vector_store %arg13[%c0_344, %c0_345], %306 {strides = array<i32>} : memref<288x128xf32, #tpu.memory_space<vmem>>, vector<24x128xf32>,
    %c0_346 = arith.constant 0 : index
    %c0_347 = arith.constant 0 : index
    %308 = vector.load %arg13[%c0_346, %c0_347] : memref<288x128xf32, #tpu.memory_space<vmem>>, vector<24x128xf32>
    %cst_348 = arith.constant 0.000000e+00 : f32
    %309 = vector.broadcast %cst_348 : f32 to vector<24x128xf32>
    %310 = arith.maximumf %308, %309 : vector<24x128xf32>
    %c0_349 = arith.constant 0 : index
    %c0_350 = arith.constant 0 : index
    %311 = vector.load %arg13[%c0_349, %c0_350] : memref<288x128xf32, #tpu.memory_space<vmem>>, vector<24x128xf32>
    tpu.vector_store %arg13[%c0_349, %c0_350], %310 {strides = array<i32>} : memref<288x128xf32, #tpu.memory_space<vmem>>, vector<24x128xf32>,
    %c0_351 = arith.constant 0 : index
    %c0_352 = arith.constant 0 : index
    %312 = tpu.strided_load %arg13[%c0_351, %c0_352] {strides = array<i32: 2, 1>} : memref<288x128xf32, #tpu.memory_space<vmem>>, vector<12x128xf32>
    %c1_353 = arith.constant 1 : index
    %c0_354 = arith.constant 0 : index
    %313 = tpu.strided_load %arg13[%c1_353, %c0_354] {strides = array<i32: 2, 1>} : memref<288x128xf32, #tpu.memory_space<vmem>>, vector<12x128xf32>
    %314 = arith.maximumf %312, %313 : vector<12x128xf32>
    %c0_355 = arith.constant 0 : index
    %c0_356 = arith.constant 0 : index
    %315 = vector.load %arg14[%c0_355, %c0_356] : memref<144x128xf32, #tpu.memory_space<vmem>>, vector<12x128xf32>
    tpu.vector_store %arg14[%c0_355, %c0_356], %314 {strides = array<i32>} : memref<144x128xf32, #tpu.memory_space<vmem>>, vector<12x128xf32>,
    %cst_357 = arith.constant 0.000000e+00 : f32
    %316 = vector.broadcast %cst_357 : f32 to vector<108x16xf32>
    %c0_358 = arith.constant 0 : index
    %c0_359 = arith.constant 0 : index
    %317 = vector.load %arg15[%c0_358, %c0_359] : memref<108x16xf32, #tpu.memory_space<vmem>>, vector<108x16xf32>
    tpu.vector_store %arg15[%c0_358, %c0_359], %316 {strides = array<i32>} : memref<108x16xf32, #tpu.memory_space<vmem>>, vector<108x16xf32>,
    %c0_360 = arith.constant 0 : index
    %c0_361 = arith.constant 0 : index
    %318 = vector.load %arg14[%c0_360, %c0_361] : memref<144x128xf32, #tpu.memory_space<vmem>>, vector<2x128xf32>
    %c3_362 = arith.constant 3 : index
    %c0_363 = arith.constant 0 : index
    %319 = vector.load %arg14[%c3_362, %c0_363] : memref<144x128xf32, #tpu.memory_space<vmem>>, vector<2x128xf32>
    %320 = arith.maximumf %318, %319 : vector<2x128xf32>
    %321 = vector.extract_strided_slice %320 {offsets = [0, 0], sizes = [2, 16], strides = [1, 1]} : vector<2x128xf32> to vector<2x16xf32>
    %c5_364 = arith.constant 5 : index
    %c0_365 = arith.constant 0 : index
    %322 = vector.load %arg15[%c5_364, %c0_365] : memref<108x16xf32, #tpu.memory_space<vmem>>, vector<2x16xf32>
    tpu.vector_store %arg15[%c5_364, %c0_365], %321 {strides = array<i32>} : memref<108x16xf32, #tpu.memory_space<vmem>>, vector<2x16xf32>,
    %c6_366 = arith.constant 6 : index
    %c0_367 = arith.constant 0 : index
    %323 = vector.load %arg14[%c6_366, %c0_367] : memref<144x128xf32, #tpu.memory_space<vmem>>, vector<2x128xf32>
    %c9_368 = arith.constant 9 : index
    %c0_369 = arith.constant 0 : index
    %324 = vector.load %arg14[%c9_368, %c0_369] : memref<144x128xf32, #tpu.memory_space<vmem>>, vector<2x128xf32>
    %325 = arith.maximumf %323, %324 : vector<2x128xf32>
    %326 = vector.extract_strided_slice %325 {offsets = [0, 0], sizes = [2, 16], strides = [1, 1]} : vector<2x128xf32> to vector<2x16xf32>
    %c9_370 = arith.constant 9 : index
    %c0_371 = arith.constant 0 : index
    %327 = vector.load %arg15[%c9_370, %c0_371] : memref<108x16xf32, #tpu.memory_space<vmem>>, vector<2x16xf32>
    tpu.vector_store %arg15[%c9_370, %c0_371], %326 {strides = array<i32>} : memref<108x16xf32, #tpu.memory_space<vmem>>, vector<2x16xf32>,
    %c0_372 = arith.constant 0 : index
    %c0_373 = arith.constant 0 : index
    %328 = vector.load %arg10[%c0_372, %c0_373] : memref<1x128xf32, #tpu.memory_space<vmem>>, vector<1x128xf32>
    %329 = vector.shape_cast %328 : vector<1x128xf32> to vector<1x128xf32>
    %330 = vector.broadcast %329 : vector<1x128xf32> to vector<8x128xf32>
    %c0_374 = arith.constant 0 : index
    %c0_375 = arith.constant 0 : index
    %331 = vector.load %arg13[%c0_374, %c0_375] : memref<288x128xf32, #tpu.memory_space<vmem>>, vector<8x128xf32>
    tpu.vector_store %arg13[%c0_374, %c0_375], %330 {strides = array<i32>} : memref<288x128xf32, #tpu.memory_space<vmem>>, vector<8x128xf32>,
    %c0_376 = arith.constant 0 : index
    %c0_377 = arith.constant 0 : index
    %332 = vector.load %arg15[%c0_376, %c0_377] : memref<108x16xf32, #tpu.memory_space<vmem>>, vector<8x16xf32>
    %333 = arith.truncf %332 : vector<8x16xf32> to vector<8x16xbf16>
    %c0_378 = arith.constant 0 : index
    %c0_379 = arith.constant 0 : index
    %334 = vector.load %arg13[%c0_378, %c0_379] : memref<288x128xf32, #tpu.memory_space<vmem>>, vector<8x128xf32>
    %c0_380 = arith.constant 0 : index
    %c0_381 = arith.constant 0 : index
    %c0_382 = arith.constant 0 : index
    %335 = vector.load %arg9[%c0_380, %c0_381, %c0_382] : memref<9x16x128xbf16, #tpu.memory_space<vmem>>, vector<1x16x128xbf16>
    %336 = vector.shape_cast %335 : vector<1x16x128xbf16> to vector<16x128xbf16>
    %cst_383 = arith.constant dense<0.000000e+00> : vector<8x128xf32>
    %337 = tpu.matmul %333, %336, %cst_383 {dimension_numbers = #tpu.dot_dimension_numbers<[1], [0], [0], [1], [0, 0, 1, 1], [], []>} : vector<8x16xbf16>, vector<16x128xbf16>, vector<8x128xf32> -> vector<8x128xf32>
    %338 = arith.addf %334, %337 : vector<8x128xf32>
    %c0_384 = arith.constant 0 : index
    %c0_385 = arith.constant 0 : index
    %339 = vector.load %arg13[%c0_384, %c0_385] : memref<288x128xf32, #tpu.memory_space<vmem>>, vector<8x128xf32>
    tpu.vector_store %arg13[%c0_384, %c0_385], %338 {strides = array<i32>} : memref<288x128xf32, #tpu.memory_space<vmem>>, vector<8x128xf32>,
    %c1_386 = arith.constant 1 : index
    %c0_387 = arith.constant 0 : index
    %340 = vector.load %arg15[%c1_386, %c0_387] : memref<108x16xf32, #tpu.memory_space<vmem>>, vector<8x16xf32>
    %341 = arith.truncf %340 : vector<8x16xf32> to vector<8x16xbf16>
    %c0_388 = arith.constant 0 : index
    %c0_389 = arith.constant 0 : index
    %342 = vector.load %arg13[%c0_388, %c0_389] : memref<288x128xf32, #tpu.memory_space<vmem>>, vector<8x128xf32>
    %c1_390 = arith.constant 1 : index
    %c0_391 = arith.constant 0 : index
    %c0_392 = arith.constant 0 : index
    %343 = vector.load %arg9[%c1_390, %c0_391, %c0_392] : memref<9x16x128xbf16, #tpu.memory_space<vmem>>, vector<1x16x128xbf16>
    %344 = vector.shape_cast %343 : vector<1x16x128xbf16> to vector<16x128xbf16>
    %cst_393 = arith.constant dense<0.000000e+00> : vector<8x128xf32>
    %345 = tpu.matmul %341, %344, %cst_393 {dimension_numbers = #tpu.dot_dimension_numbers<[1], [0], [0], [1], [0, 0, 1, 1], [], []>} : vector<8x16xbf16>, vector<16x128xbf16>, vector<8x128xf32> -> vector<8x128xf32>
    %346 = arith.addf %342, %345 : vector<8x128xf32>
    %c0_394 = arith.constant 0 : index
    %c0_395 = arith.constant 0 : index
    %347 = vector.load %arg13[%c0_394, %c0_395] : memref<288x128xf32, #tpu.memory_space<vmem>>, vector<8x128xf32>
    tpu.vector_store %arg13[%c0_394, %c0_395], %346 {strides = array<i32>} : memref<288x128xf32, #tpu.memory_space<vmem>>, vector<8x128xf32>,
    %c2_396 = arith.constant 2 : index
    %c0_397 = arith.constant 0 : index
    %348 = vector.load %arg15[%c2_396, %c0_397] : memref<108x16xf32, #tpu.memory_space<vmem>>, vector<8x16xf32>
    %349 = arith.truncf %348 : vector<8x16xf32> to vector<8x16xbf16>
    %c0_398 = arith.constant 0 : index
    %c0_399 = arith.constant 0 : index
    %350 = vector.load %arg13[%c0_398, %c0_399] : memref<288x128xf32, #tpu.memory_space<vmem>>, vector<8x128xf32>
    %c2_400 = arith.constant 2 : index
    %c0_401 = arith.constant 0 : index
    %c0_402 = arith.constant 0 : index
    %351 = vector.load %arg9[%c2_400, %c0_401, %c0_402] : memref<9x16x128xbf16, #tpu.memory_space<vmem>>, vector<1x16x128xbf16>
    %352 = vector.shape_cast %351 : vector<1x16x128xbf16> to vector<16x128xbf16>
    %cst_403 = arith.constant dense<0.000000e+00> : vector<8x128xf32>
    %353 = tpu.matmul %349, %352, %cst_403 {dimension_numbers = #tpu.dot_dimension_numbers<[1], [0], [0], [1], [0, 0, 1, 1], [], []>} : vector<8x16xbf16>, vector<16x128xbf16>, vector<8x128xf32> -> vector<8x128xf32>
    %354 = arith.addf %350, %353 : vector<8x128xf32>
    %c0_404 = arith.constant 0 : index
    %c0_405 = arith.constant 0 : index
    %355 = vector.load %arg13[%c0_404, %c0_405] : memref<288x128xf32, #tpu.memory_space<vmem>>, vector<8x128xf32>
    tpu.vector_store %arg13[%c0_404, %c0_405], %354 {strides = array<i32>} : memref<288x128xf32, #tpu.memory_space<vmem>>, vector<8x128xf32>,
    %c4_406 = arith.constant 4 : index
    %c0_407 = arith.constant 0 : index
    %356 = vector.load %arg15[%c4_406, %c0_407] : memref<108x16xf32, #tpu.memory_space<vmem>>, vector<8x16xf32>
    %357 = arith.truncf %356 : vector<8x16xf32> to vector<8x16xbf16>
    %c0_408 = arith.constant 0 : index
    %c0_409 = arith.constant 0 : index
    %358 = vector.load %arg13[%c0_408, %c0_409] : memref<288x128xf32, #tpu.memory_space<vmem>>, vector<8x128xf32>
    %c3_410 = arith.constant 3 : index
    %c0_411 = arith.constant 0 : index
    %c0_412 = arith.constant 0 : index
    %359 = vector.load %arg9[%c3_410, %c0_411, %c0_412] : memref<9x16x128xbf16, #tpu.memory_space<vmem>>, vector<1x16x128xbf16>
    %360 = vector.shape_cast %359 : vector<1x16x128xbf16> to vector<16x128xbf16>
    %cst_413 = arith.constant dense<0.000000e+00> : vector<8x128xf32>
    %361 = tpu.matmul %357, %360, %cst_413 {dimension_numbers = #tpu.dot_dimension_numbers<[1], [0], [0], [1], [0, 0, 1, 1], [], []>} : vector<8x16xbf16>, vector<16x128xbf16>, vector<8x128xf32> -> vector<8x128xf32>
    %362 = arith.addf %358, %361 : vector<8x128xf32>
    %c0_414 = arith.constant 0 : index
    %c0_415 = arith.constant 0 : index
    %363 = vector.load %arg13[%c0_414, %c0_415] : memref<288x128xf32, #tpu.memory_space<vmem>>, vector<8x128xf32>
    tpu.vector_store %arg13[%c0_414, %c0_415], %362 {strides = array<i32>} : memref<288x128xf32, #tpu.memory_space<vmem>>, vector<8x128xf32>,
    %c5_416 = arith.constant 5 : index
    %c0_417 = arith.constant 0 : index
    %364 = vector.load %arg15[%c5_416, %c0_417] : memref<108x16xf32, #tpu.memory_space<vmem>>, vector<8x16xf32>
    %365 = arith.truncf %364 : vector<8x16xf32> to vector<8x16xbf16>
    %c0_418 = arith.constant 0 : index
    %c0_419 = arith.constant 0 : index
    %366 = vector.load %arg13[%c0_418, %c0_419] : memref<288x128xf32, #tpu.memory_space<vmem>>, vector<8x128xf32>
    %c4_420 = arith.constant 4 : index
    %c0_421 = arith.constant 0 : index
    %c0_422 = arith.constant 0 : index
    %367 = vector.load %arg9[%c4_420, %c0_421, %c0_422] : memref<9x16x128xbf16, #tpu.memory_space<vmem>>, vector<1x16x128xbf16>
    %368 = vector.shape_cast %367 : vector<1x16x128xbf16> to vector<16x128xbf16>
    %cst_423 = arith.constant dense<0.000000e+00> : vector<8x128xf32>
    %369 = tpu.matmul %365, %368, %cst_423 {dimension_numbers = #tpu.dot_dimension_numbers<[1], [0], [0], [1], [0, 0, 1, 1], [], []>} : vector<8x16xbf16>, vector<16x128xbf16>, vector<8x128xf32> -> vector<8x128xf32>
    %370 = arith.addf %366, %369 : vector<8x128xf32>
    %c0_424 = arith.constant 0 : index
    %c0_425 = arith.constant 0 : index
    %371 = vector.load %arg13[%c0_424, %c0_425] : memref<288x128xf32, #tpu.memory_space<vmem>>, vector<8x128xf32>
    tpu.vector_store %arg13[%c0_424, %c0_425], %370 {strides = array<i32>} : memref<288x128xf32, #tpu.memory_space<vmem>>, vector<8x128xf32>,
    %c6_426 = arith.constant 6 : index
    %c0_427 = arith.constant 0 : index
    %372 = vector.load %arg15[%c6_426, %c0_427] : memref<108x16xf32, #tpu.memory_space<vmem>>, vector<8x16xf32>
    %373 = arith.truncf %372 : vector<8x16xf32> to vector<8x16xbf16>
    %c0_428 = arith.constant 0 : index
    %c0_429 = arith.constant 0 : index
    %374 = vector.load %arg13[%c0_428, %c0_429] : memref<288x128xf32, #tpu.memory_space<vmem>>, vector<8x128xf32>
    %c5_430 = arith.constant 5 : index
    %c0_431 = arith.constant 0 : index
    %c0_432 = arith.constant 0 : index
    %375 = vector.load %arg9[%c5_430, %c0_431, %c0_432] : memref<9x16x128xbf16, #tpu.memory_space<vmem>>, vector<1x16x128xbf16>
    %376 = vector.shape_cast %375 : vector<1x16x128xbf16> to vector<16x128xbf16>
    %cst_433 = arith.constant dense<0.000000e+00> : vector<8x128xf32>
    %377 = tpu.matmul %373, %376, %cst_433 {dimension_numbers = #tpu.dot_dimension_numbers<[1], [0], [0], [1], [0, 0, 1, 1], [], []>} : vector<8x16xbf16>, vector<16x128xbf16>, vector<8x128xf32> -> vector<8x128xf32>
    %378 = arith.addf %374, %377 : vector<8x128xf32>
    %c0_434 = arith.constant 0 : index
    %c0_435 = arith.constant 0 : index
    %379 = vector.load %arg13[%c0_434, %c0_435] : memref<288x128xf32, #tpu.memory_space<vmem>>, vector<8x128xf32>
    tpu.vector_store %arg13[%c0_434, %c0_435], %378 {strides = array<i32>} : memref<288x128xf32, #tpu.memory_space<vmem>>, vector<8x128xf32>,
    %c8_436 = arith.constant 8 : index
    %c0_437 = arith.constant 0 : index
    %380 = vector.load %arg15[%c8_436, %c0_437] : memref<108x16xf32, #tpu.memory_space<vmem>>, vector<8x16xf32>
    %381 = arith.truncf %380 : vector<8x16xf32> to vector<8x16xbf16>
    %c0_438 = arith.constant 0 : index
    %c0_439 = arith.constant 0 : index
    %382 = vector.load %arg13[%c0_438, %c0_439] : memref<288x128xf32, #tpu.memory_space<vmem>>, vector<8x128xf32>
    %c6_440 = arith.constant 6 : index
    %c0_441 = arith.constant 0 : index
    %c0_442 = arith.constant 0 : index
    %383 = vector.load %arg9[%c6_440, %c0_441, %c0_442] : memref<9x16x128xbf16, #tpu.memory_space<vmem>>, vector<1x16x128xbf16>
    %384 = vector.shape_cast %383 : vector<1x16x128xbf16> to vector<16x128xbf16>
    %cst_443 = arith.constant dense<0.000000e+00> : vector<8x128xf32>
    %385 = tpu.matmul %381, %384, %cst_443 {dimension_numbers = #tpu.dot_dimension_numbers<[1], [0], [0], [1], [0, 0, 1, 1], [], []>} : vector<8x16xbf16>, vector<16x128xbf16>, vector<8x128xf32> -> vector<8x128xf32>
    %386 = arith.addf %382, %385 : vector<8x128xf32>
    %c0_444 = arith.constant 0 : index
    %c0_445 = arith.constant 0 : index
    %387 = vector.load %arg13[%c0_444, %c0_445] : memref<288x128xf32, #tpu.memory_space<vmem>>, vector<8x128xf32>
    tpu.vector_store %arg13[%c0_444, %c0_445], %386 {strides = array<i32>} : memref<288x128xf32, #tpu.memory_space<vmem>>, vector<8x128xf32>,
    %c9_446 = arith.constant 9 : index
    %c0_447 = arith.constant 0 : index
    %388 = vector.load %arg15[%c9_446, %c0_447] : memref<108x16xf32, #tpu.memory_space<vmem>>, vector<8x16xf32>
    %389 = arith.truncf %388 : vector<8x16xf32> to vector<8x16xbf16>
    %c0_448 = arith.constant 0 : index
    %c0_449 = arith.constant 0 : index
    %390 = vector.load %arg13[%c0_448, %c0_449] : memref<288x128xf32, #tpu.memory_space<vmem>>, vector<8x128xf32>
    %c7_450 = arith.constant 7 : index
    %c0_451 = arith.constant 0 : index
    %c0_452 = arith.constant 0 : index
    %391 = vector.load %arg9[%c7_450, %c0_451, %c0_452] : memref<9x16x128xbf16, #tpu.memory_space<vmem>>, vector<1x16x128xbf16>
    %392 = vector.shape_cast %391 : vector<1x16x128xbf16> to vector<16x128xbf16>
    %cst_453 = arith.constant dense<0.000000e+00> : vector<8x128xf32>
    %393 = tpu.matmul %389, %392, %cst_453 {dimension_numbers = #tpu.dot_dimension_numbers<[1], [0], [0], [1], [0, 0, 1, 1], [], []>} : vector<8x16xbf16>, vector<16x128xbf16>, vector<8x128xf32> -> vector<8x128xf32>
    %394 = arith.addf %390, %393 : vector<8x128xf32>
    %c0_454 = arith.constant 0 : index
    %c0_455 = arith.constant 0 : index
    %395 = vector.load %arg13[%c0_454, %c0_455] : memref<288x128xf32, #tpu.memory_space<vmem>>, vector<8x128xf32>
    tpu.vector_store %arg13[%c0_454, %c0_455], %394 {strides = array<i32>} : memref<288x128xf32, #tpu.memory_space<vmem>>, vector<8x128xf32>,
    %c10_456 = arith.constant 10 : index
    %c0_457 = arith.constant 0 : index
    %396 = vector.load %arg15[%c10_456, %c0_457] : memref<108x16xf32, #tpu.memory_space<vmem>>, vector<8x16xf32>
    %397 = arith.truncf %396 : vector<8x16xf32> to vector<8x16xbf16>
    %c0_458 = arith.constant 0 : index
    %c0_459 = arith.constant 0 : index
    %398 = vector.load %arg13[%c0_458, %c0_459] : memref<288x128xf32, #tpu.memory_space<vmem>>, vector<8x128xf32>
    %c8_460 = arith.constant 8 : index
    %c0_461 = arith.constant 0 : index
    %c0_462 = arith.constant 0 : index
    %399 = vector.load %arg9[%c8_460, %c0_461, %c0_462] : memref<9x16x128xbf16, #tpu.memory_space<vmem>>, vector<1x16x128xbf16>
    %400 = vector.shape_cast %399 : vector<1x16x128xbf16> to vector<16x128xbf16>
    %cst_463 = arith.constant dense<0.000000e+00> : vector<8x128xf32>
    %401 = tpu.matmul %397, %400, %cst_463 {dimension_numbers = #tpu.dot_dimension_numbers<[1], [0], [0], [1], [0, 0, 1, 1], [], []>} : vector<8x16xbf16>, vector<16x128xbf16>, vector<8x128xf32> -> vector<8x128xf32>
    %402 = arith.addf %398, %401 : vector<8x128xf32>
    %c0_464 = arith.constant 0 : index
    %c0_465 = arith.constant 0 : index
    %403 = vector.load %arg13[%c0_464, %c0_465] : memref<288x128xf32, #tpu.memory_space<vmem>>, vector<8x128xf32>
    tpu.vector_store %arg13[%c0_464, %c0_465], %402 {strides = array<i32>} : memref<288x128xf32, #tpu.memory_space<vmem>>, vector<8x128xf32>,
    %c0_466 = arith.constant 0 : index
    %c0_467 = arith.constant 0 : index
    %404 = vector.load %arg13[%c0_466, %c0_467] : memref<288x128xf32, #tpu.memory_space<vmem>>, vector<8x128xf32>
    %cst_468 = arith.constant 0.000000e+00 : f32
    %405 = vector.broadcast %cst_468 : f32 to vector<8x128xf32>
    %406 = arith.maximumf %404, %405 : vector<8x128xf32>
    %c0_469 = arith.constant 0 : index
    %c0_470 = arith.constant 0 : index
    %407 = vector.load %arg13[%c0_469, %c0_470] : memref<288x128xf32, #tpu.memory_space<vmem>>, vector<8x128xf32>
    tpu.vector_store %arg13[%c0_469, %c0_470], %406 {strides = array<i32>} : memref<288x128xf32, #tpu.memory_space<vmem>>, vector<8x128xf32>,
    %c0_471 = arith.constant 0 : index
    %c0_472 = arith.constant 0 : index
    %408 = tpu.strided_load %arg13[%c0_471, %c0_472] {strides = array<i32: 2, 1>} : memref<288x128xf32, #tpu.memory_space<vmem>>, vector<4x128xf32>
    %c1_473 = arith.constant 1 : index
    %c0_474 = arith.constant 0 : index
    %409 = tpu.strided_load %arg13[%c1_473, %c0_474] {strides = array<i32: 2, 1>} : memref<288x128xf32, #tpu.memory_space<vmem>>, vector<4x128xf32>
    %410 = arith.maximumf %408, %409 : vector<4x128xf32>
    %c0_475 = arith.constant 0 : index
    %c0_476 = arith.constant 0 : index
    %411 = vector.load %arg14[%c0_475, %c0_476] : memref<144x128xf32, #tpu.memory_space<vmem>>, vector<4x128xf32>
    tpu.vector_store %arg14[%c0_475, %c0_476], %410 {strides = array<i32>} : memref<144x128xf32, #tpu.memory_space<vmem>>, vector<4x128xf32>,
    %c0_477 = arith.constant 0 : index
    %c0_478 = arith.constant 0 : index
    %412 = vector.load %arg14[%c0_477, %c0_478] : memref<144x128xf32, #tpu.memory_space<vmem>>, vector<1x128xf32>
    %c2_479 = arith.constant 2 : index
    %c0_480 = arith.constant 0 : index
    %413 = vector.load %arg14[%c2_479, %c0_480] : memref<144x128xf32, #tpu.memory_space<vmem>>, vector<1x128xf32>
    %414 = arith.maximumf %412, %413 : vector<1x128xf32>
    %415 = arith.truncf %414 : vector<1x128xf32> to vector<1x128xbf16>
    %416 = arith.extf %415 : vector<1x128xbf16> to vector<1x128xf32>
    %417 = arith.mulf %416, %416 : vector<1x128xf32>
    %cst_481 = arith.constant dense<0.000000e+00> : vector<1xf32>
    %418 = vector.multi_reduction <add>, %417, %cst_481 [1] : vector<1x128xf32> to vector<1xf32>
    %419 = vector.shape_cast %418 : vector<1xf32> to vector<1x1xf32>
    %cst_482 = arith.constant 9.99999996E-13 : f32
    %420 = vector.broadcast %cst_482 : f32 to vector<1x1xf32>
    %421 = arith.addf %419, %420 : vector<1x1xf32>
    %422 = math.rsqrt %421 : vector<1x1xf32>
    %423 = vector.broadcast %422 : vector<1x1xf32> to vector<1x128xf32>
    %424 = arith.mulf %416, %423 : vector<1x128xf32>
    %c0_483 = arith.constant 0 : index
    %c0_484 = arith.constant 0 : index
    %425 = vector.load %arg11[%c0_483, %c0_484] : memref<16x128xf32, #tpu.memory_space<vmem>>, vector<16x128xf32>
    %426 = arith.mulf %425, %425 : vector<16x128xf32>
    %cst_485 = arith.constant dense<0.000000e+00> : vector<128xf32>
    %427 = vector.multi_reduction <add>, %426, %cst_485 [0] : vector<16x128xf32> to vector<128xf32>
    %428 = vector.shape_cast %427 : vector<128xf32> to vector<1x128xf32>
    %cst_486 = arith.constant 9.99999996E-13 : f32
    %429 = vector.broadcast %cst_486 : f32 to vector<1x128xf32>
    %430 = arith.addf %428, %429 : vector<1x128xf32>
    %431 = math.rsqrt %430 : vector<1x128xf32>
    %432 = vector.broadcast %431 : vector<1x128xf32> to vector<16x128xf32>
    %433 = arith.mulf %425, %432 : vector<16x128xf32>
    %434 = vector.extract_strided_slice %424 {offsets = [0, 0], sizes = [1, 16], strides = [1, 1]} : vector<1x128xf32> to vector<1x16xf32>
    %435 = arith.truncf %434 : vector<1x16xf32> to vector<1x16xbf16>
    %436 = arith.truncf %433 : vector<16x128xf32> to vector<16x128xbf16>
    %cst_487 = arith.constant dense<0.000000e+00> : vector<1x128xf32>
    %437 = tpu.matmul %435, %436, %cst_487 {dimension_numbers = #tpu.dot_dimension_numbers<[1], [0], [0], [1], [0, 0, 1, 1], [], []>} : vector<1x16xbf16>, vector<16x128xbf16>, vector<1x128xf32> -> vector<1x128xf32>
    %438 = arith.index_cast %arg0 : i32 to index
    %439 = memref.load %arg1[%438] : memref<2xi32, #tpu.memory_space<smem>>
    %440 = tpu.iota {dimensions = array<i32: 1>} : vector<1x128xi32>
    %441 = vector.broadcast %439 : i32 to vector<1x128xi32>
    %442 = arith.cmpi eq, %440, %441 : vector<1x128xi32>
    %443 = arith.extui %442 : vector<1x128xi1> to vector<1x128xi32>
    %444 = arith.sitofp %443 : vector<1x128xi32> to vector<1x128xf32>
    %cst_488 = arith.constant 1.000000e+01 : f32
    %445 = vector.broadcast %cst_488 : f32 to vector<1x128xf32>
    %446 = arith.mulf %445, %437 : vector<1x128xf32>
    %cst_489 = arith.constant 2.000000e+00 : f32
    %447 = vector.broadcast %cst_489 : f32 to vector<1x128xf32>
    %448 = arith.mulf %447, %444 : vector<1x128xf32>
    %449 = arith.subf %446, %448 : vector<1x128xf32>
    %c0_490 = arith.constant 0 : index
    %c0_491 = arith.constant 0 : index
    %c0_492 = arith.constant 0 : index
    %450 = vector.load %arg12[%c0_490, %c0_491, %c0_492] : memref<1x1x128xf32, #tpu.memory_space<vmem>>, vector<1x1x128xf32>
    %451 = vector.shape_cast %450 : vector<1x1x128xf32> to vector<1x128xf32>
    %452 = vector.shape_cast %449 : vector<1x128xf32> to vector<1x1x128xf32>
    tpu.vector_store %arg12[%c0_490, %c0_491, %c0_492], %452 {strides = array<i32>} : memref<1x1x128xf32, #tpu.memory_space<vmem>>, vector<1x1x128xf32>,
    return
  }
  func.func @transform_0(%arg0: i32, %arg1: memref<2xi32, #tpu.memory_space<smem>>) -> (i32, i32, i32) {
    %c0_i32 = arith.constant 0 : i32
    %c0_i32_0 = arith.constant 0 : i32
    %c0_i32_1 = arith.constant 0 : i32
    return %arg0, %c0_i32, %c0_i32_0 : i32, i32, i32
  }
  func.func @transform_1(%arg0: i32, %arg1: memref<2xi32, #tpu.memory_space<smem>>) -> (i32, i32, i32) {
    %c0_i32 = arith.constant 0 : i32
    %c0_i32_0 = arith.constant 0 : i32
    %c0_i32_1 = arith.constant 0 : i32
    %c0_i32_2 = arith.constant 0 : i32
    return %c0_i32, %c0_i32_0, %c0_i32_1 : i32, i32, i32
  }
  func.func @transform_2(%arg0: i32, %arg1: memref<2xi32, #tpu.memory_space<smem>>) -> (i32, i32) {
    %c0_i32 = arith.constant 0 : i32
    %c0_i32_0 = arith.constant 0 : i32
    %c0_i32_1 = arith.constant 0 : i32
    return %c0_i32, %c0_i32_0 : i32, i32
  }
  func.func @transform_3(%arg0: i32, %arg1: memref<2xi32, #tpu.memory_space<smem>>) -> (i32, i32, i32) {
    %c0_i32 = arith.constant 0 : i32
    %c0_i32_0 = arith.constant 0 : i32
    %c0_i32_1 = arith.constant 0 : i32
    %c0_i32_2 = arith.constant 0 : i32
    return %c0_i32, %c0_i32_0, %c0_i32_1 : i32, i32, i32
  }
  func.func @transform_4(%arg0: i32, %arg1: memref<2xi32, #tpu.memory_space<smem>>) -> (i32, i32) {
    %c0_i32 = arith.constant 0 : i32
    %c0_i32_0 = arith.constant 0 : i32
    %c0_i32_1 = arith.constant 0 : i32
    return %c0_i32, %c0_i32_0 : i32, i32
  }
  func.func @transform_5(%arg0: i32, %arg1: memref<2xi32, #tpu.memory_space<smem>>) -> (i32, i32, i32) {
    %c0_i32 = arith.constant 0 : i32
    %c0_i32_0 = arith.constant 0 : i32
    %c0_i32_1 = arith.constant 0 : i32
    %c0_i32_2 = arith.constant 0 : i32
    return %c0_i32, %c0_i32_0, %c0_i32_1 : i32, i32, i32
  }
  func.func @transform_6(%arg0: i32, %arg1: memref<2xi32, #tpu.memory_space<smem>>) -> (i32, i32) {
    %c0_i32 = arith.constant 0 : i32
    %c0_i32_0 = arith.constant 0 : i32
    %c0_i32_1 = arith.constant 0 : i32
    return %c0_i32, %c0_i32_0 : i32, i32
  }
  func.func @transform_7(%arg0: i32, %arg1: memref<2xi32, #tpu.memory_space<smem>>) -> (i32, i32, i32) {
    %c0_i32 = arith.constant 0 : i32
    %c0_i32_0 = arith.constant 0 : i32
    %c0_i32_1 = arith.constant 0 : i32
    %c0_i32_2 = arith.constant 0 : i32
    return %c0_i32, %c0_i32_0, %c0_i32_1 : i32, i32, i32
  }
  func.func @transform_8(%arg0: i32, %arg1: memref<2xi32, #tpu.memory_space<smem>>) -> (i32, i32) {
    %c0_i32 = arith.constant 0 : i32
    %c0_i32_0 = arith.constant 0 : i32
    %c0_i32_1 = arith.constant 0 : i32
    return %c0_i32, %c0_i32_0 : i32, i32
  }
  func.func @transform_9(%arg0: i32, %arg1: memref<2xi32, #tpu.memory_space<smem>>) -> (i32, i32) {
    %c0_i32 = arith.constant 0 : i32
    %c0_i32_0 = arith.constant 0 : i32
    %c0_i32_1 = arith.constant 0 : i32
    return %c0_i32, %c0_i32_0 : i32, i32
  }
  func.func @transform_10(%arg0: i32, %arg1: memref<2xi32, #tpu.memory_space<smem>>) -> (i32, i32, i32) {
    %c0_i32 = arith.constant 0 : i32
    %c0_i32_0 = arith.constant 0 : i32
    %c0_i32_1 = arith.constant 0 : i32
    return %arg0, %c0_i32, %c0_i32_0 : i32, i32, i32
  }
}

</mosaic_0001>

<bundles_post_ra>
// kernel: baseline_train_forward.1
= control target key start
LH: loop header
LB: loop body
LE: loop exit
PB: predicated region body
PF: predicated region fallthrough
CT: control target
= control target key end

     0   :  { %s12378_s0 = inlined_call_operand.vmem [shape: s32[2], index: 0, kind: input, shape index: {}]   ;;  %s12379_s1 = inlined_call_operand.vmem [shape: bf16[2,332,3], index: 1, kind: input, shape index: {}]   ;;  %s12380_s2 = inlined_call_operand.vmem [shape: bf16[9,3,128], index: 2, kind: input, shape index: {}]   ;;  %s12381_s3 = inlined_call_operand.vmem [shape: f32[1,128], index: 3, kind: input, shape index: {}]   ;;  %s12382_s4 = inlined_call_operand.vmem [shape: bf16[9,16,128], index: 4, kind: input, shape index: {}]   ;;  %s12383_s5 = inlined_call_operand.vmem [shape: f32[1,128], index: 5, kind: input, shape index: {}]   ;;  %s12384_s6 = inlined_call_operand.vmem [shape: bf16[9,16,128], index: 6, kind: input, shape index: {}]   ;;  %s12385_s7 = inlined_call_operand.vmem [shape: f32[1,128], index: 7, kind: input, shape index: {}]   ;;  %s12386_s8 = inlined_call_operand.vmem [shape: bf16[9,16,128], index: 8, kind: input, shape index: {}]   ;;  %s12387_s9 = inlined_call_operand.vmem [shape: f32[1,128], index: 9, kind: input, shape index: {}]   ;;  %s12388_s10 = inlined_call_operand.vmem [shape: f32[16,128], index: 10, kind: input, shape index: {}]   ;;  %s12389_s11 = inlined_call_operand.hbm [shape: f32[2,1,128], index: 11, kind: output, shape index: {}]  }
   0x1   :  { %s16_s19 = sshll.u32 %s12378_s0, 4  ;;  %s17_s19 = int_to_ptr.vmem [resolvable:$true] %s16_s19 }
   0x2   :  { %s10748_s20 = scalar_lea.vmem %s17_s19, 16  ;;  %p10753_p1 = scmp.lt.s32.totalorder %s17_s19, %s17_s19 }
   0x3   :  { %p10749_p0 = scmp.ne.s32.totalorder %s17_s19, %s10748_s20  ;;  %p10754_p2 = scmp.lt.s32.totalorder %s10748_s20, %s10748_s20 }
   0x5   :  { %p10755_p3 = por %p10754_p2, %p10753_p1 }
   0x7   :  { %p10756_p4 = pnand %p10755_p3, %p10749_p0 }
   0x9   :  { %10759 = shalt.err (!%p10756_p4)  }
   0xa   :  { %s10826_s21 = smov [#allocation7]  }
   0xb   :  { %19 = dma.vmem_to_smem %s17_s19, 16, %s10826_s21, [#allocation6] }
   0xc   :  { %10804 = dma.done.wait [#allocation6], 16 }
   0xd   :  { %10805 = vsyncadd [#allocation6], 4294967280 }
   0xe   :  { %21 = sfence }
   0xf   :  { %22 = vsyncpa [#allocation9], 0 }
  0x10   :  { %24 = vsyncpa [#allocation9 + $0x1], 0  ;;  %s10894_s22 = smov 0   ;;  %s10896_s23 = smov 0  }
  0x11   :  { %s10898_s0 = smov 0   ;;  %s10900_s24 = smov 0  }
  0x12 LB: > { %s10915_s25 = sadd.s32 4294967295, %s10824_s24   ;;  %s8414_s26 = sadd.s32 4294967294, %s10824_s24   ;;  %s10824_s24 = sphi %s10900_s24, %s12429_s24   ;;  %s10820_s0 = sphi %s10898_s0, %s12428_s0   ;;  %s10816_s23 = sphi %s10896_s23, %s12427_s23   ;;  %s10812_s22 = sphi %s10894_s22, %s12426_s22  }
  0x13   : > { %s10919_s27 = sadd.s32 1, %s10824_s24   ;;  %s252_s28 = sadd.s32 1, %s10820_s0 }
  0x14   : > { %s249_s29 = ssub.s32 %s10824_s24, %s10919_s27  ;;  %p262_p5 = scmp.ne.s32.totalorder %s10820_s0, %s10816_s23 }
  0x15   : > { %p250_p6 = scmp.eq.s32.totalorder %s249_s29, 0  ;;  %p263_p7 = scmp.eq.s32.totalorder %s10915_s25, 1 }
  0x16   : > { %p268_p8 = scmp.ne.s32.totalorder %s10816_s23, %s10812_s22  ;;  %p269_p9 = scmp.eq.s32.totalorder %s8414_s26, 1 }
  0x17   : > { %s10930_s30 = scalar_select %p250_p6, %s10820_s0, %s252_s28  }
  0x18   : > { %p10932_p10 = por %p263_p7, %p262_p5  ;;  %p10936_p11 = por %p269_p9, %p268_p8 }
  0x19   : > { %p8417_p12 = scmp.ge.s32.totalorder %s10824_s24, 1  ;;  %p322_p13 = scmp.lt.s32.totalorder %s10824_s24, 3 }
  0x1b   : > { %p323_p0 = pnand %p8417_p12, %p322_p13 }
  0x1d   : > { %326 = sbr.rel (%p323_p0) target bundleno = 2500 (0x9c4), region = 60 }
  0x24   : > { %vm626_vm0 = vcmask 1040384   ;;  %vm627_vm1 = vcmask 1041408   ;;  %v8456_v0 = vld [vmem:[%s12380_s2 + $0x2] sm:$0x3]  ;;  %p359_p1 = scmp.lt.s32.totalorder %s10915_s25, 1  ;;  %v10827_v1 = vmov 65535  }
  0x25   : > { %v628_v2 = vsel %vm626_vm0, 4294967295, %v10827_v1  ;;  %v8494_v3 = vld [vmem:[%s12380_s2 + $0x4] sm:$0x3]  ;;  %vm571_vm2 = vcmask 23552   ;;  %v8532_v14 = vld [vmem:[%s12380_s2 + $0x6] sm:$0x3] }
  0x26   : > { %v10950_v4 = vsel %vm627_vm1, %v628_v2, 0  ;;  %s360_s18 = scalar_select %p359_p1, %s10915_s25, 1  ;;  %vm1050_vm3 = vsmask.f32 7424  ;;  %vm1673_vm4 = vcmask 1046528   ;;  %vm3341_vm6 = vcmask 1045504  }
  0x27   : > { %v1254_v5 = vand.u32 %v8456_v0, %v10950_v4  ;;  %v1766_v6 = vand.u32 %v8494_v3, %v10950_v4  ;;  %v10970_v30 = vand.u32 %v8532_v14, %v10950_v4  ;;  %vm2696_vm5 = vsmask.f32 6400  ;;  %s8335_s16 = sld [smem:[#allocation7 + %s10915_s25]]  ;;  %s357_s17 = sand.u32 1, %s10816_s23  }
  0x28   : > { %s10503_s19 = smul.u32 168, %s360_s18  ;;  %vm4364_vm7 = vsmask.f32 5376  ;;  %vm5009_vm8 = vcmask 1044480   ;;  %vm5568_vm9 = vcmask 130048   ;;  %vm10829_vm10 = vmmov 0  }
  0x29   : > { %9225 = vmatprep.subr.bf16.mxu0 %v1254_v5  ;;  %vm5582_vm11 = vcmask 125952   ;;  %vm7730_vm12 = vcmask 123904   ;;  %s358_s18 = scalar_lea.vmem [#allocation8], %s357_s17  ;;  %s8347_s29 = scalar_lea.sflag [#allocation9], %s357_s17 }
  0x2a   : > { %9226 = vmatpush3.bf16.msra.mxu0 %v1254_v5  ;;  %s10958_s26 = scalar_lea.vmem %s12379_s1, %s10503_s19  ;;  %s8359_s19 = sshll.u32 %s358_s18, 4  ;;  %s12338_s19 = int_to_ptr.vmem [resolvable:$true] %s8359_s19 }
  0x2b   : > { %9263 = vmatprep.subr.bf16.mxu0 %v1766_v6  ;;  %v10547_v7 = vld [vmem:[%s10958_s26] sm:$0xff]   ;;  %v10548_v8 = vld [vmem:[%s10958_s26 + $0x8] sm:$0xff]   ;;  %v10549_v9 = vld [vmem:[%s10958_s26 + $0x10] sm:$0xff]   ;;  %s10830_s14 = smov [#allocation8]  }
  0x2c   : > { %v1052_v10 = vshrl.u32 %v10547_v7, 16  ;;  %v1054_v11 = vshll.u32 %v10547_v7, 16  ;;  %v1059_v12 = vshll.u32 %v10548_v8, 16  ;;  %v1063_v13 = vshrl.u32 %v10548_v8, 16  ;;  %v10550_v16 = vld [vmem:[%s10958_s26 + $0x18] sm:$0xff]   ;;  %v10551_v18 = vld [vmem:[%s10958_s26 + $0x20] sm:$0xff]  }
  0x2d   : > { %v1067_v15 = vshll.u32 %v10549_v9, 16  ;;  %v1071_v17 = vshrl.u32 %v10549_v9, 16  ;;  %v1075_v22 = vshll.u32 %v10550_v16, 16  ;;  %v1083_v25 = vshll.u32 %v10551_v18, 16  ;;  %v10552_v26 = vld [vmem:[%s10958_s26 + $0x28] sm:$0xff]   ;;  %v10553_v37 = vld [vmem:[%s10958_s26 + $0x30] sm:$0xff]  }
  0x2e   : > { %v1056_v19 = vrot.slane %v1054_v11, 1  ;;  %v1061_v20 = vrot.slane %v1059_v12, 1  ;;  %v1079_v29 = vshrl.u32 %v10550_v16, 16  ;;  %v1087_v33 = vshrl.u32 %v10551_v18, 16  ;;  %v10554_v41 = vld [vmem:[%s10958_s26 + $0x38] sm:$0xff]   ;;  %v10555_v49 = vld [vmem:[%s10958_s26 + $0x40] sm:$0xff]  }
  0x2f   : > { %v1069_v21 = vrot.slane %v1067_v15, 1  ;;  %v1077_v28 = vrot.slane %v1075_v22, 1  ;;  %v1091_v34 = vshll.u32 %v10552_v26, 16  ;;  %v1085_v36 = vrot.slane %v1083_v25, 1  ;;  %v10556_v53 = vld [vmem:[%s10958_s26 + $0x48] sm:$0xff]   ;;  %v10557_v61 = vld [vmem:[%s10958_s26 + $0x50] sm:$0xff]  }
  0x30   : > { %v1057_v23 = vor.u32 %v1056_v19, %v1052_v10  ;;  %v1065_v24 = vor.u32 %v1063_v13, %v1061_v20  ;;  %v1099_v42 = vshll.u32 %v10553_v37, 16  ;;  %v1095_v44 = vshrl.u32 %v10552_v26, 16  ;;  %v10558_v1 = vld [vmem:[%s10958_s26 + $0x58] sm:$0xff]   ;;  %v10559_v10 = vld [vmem:[%s10958_s26 + $0x60] sm:$0xff]   ;;  %v10560_v14 = vld [vmem:[%s10958_s26 + $0x68] sm:$0xff]   ;;  %s10764_s15 = sshll.u32 %s10830_s14, 4  ;;  %s10765_s15 = int_to_ptr.vmem [resolvable:$false] %s10764_s15 }
  0x31   : > { %v1073_v27 = vor.u32 %v1071_v17, %v1069_v21  ;;  %v1081_v38 = vor.u32 %v1079_v29, %v1077_v28  ;;  %v1089_v39 = vor.u32 %v1087_v33, %v1085_v36  ;;  %v1093_v40 = vrot.slane %v1091_v34, 1  ;;  %v10561_v22 = vld [vmem:[%s10958_s26 + $0x70] sm:$0xff]   ;;  %v10562_v26 = vld [vmem:[%s10958_s26 + $0x78] sm:$0xff]   ;;  %p10767_p5 = scmp.lt.s32.totalorder %s12338_s19, %s10765_s15 }
  0x32   : > { %v1062_v31 = vsel %vm1050_vm3, %v1057_v23, %v1061_v20  ;;  %v1070_v32 = vsel %vm1050_vm3, %v1065_v24, %v1069_v21  ;;  %v1103_v46 = vshrl.u32 %v10553_v37, 16  ;;  %v1107_v47 = vshll.u32 %v10554_v41, 16 }
  0x33   : > { %9227 = vmatprep.mubr.msk.bf16.mxu0 %vm571_vm2, %v1062_v31  ;;  %v1078_v35 = vsel %vm1050_vm3, %v1073_v27, %v1077_v28  ;;  %v1086_v43 = vsel %vm1050_vm3, %v1081_v38, %v1085_v36  ;;  %v1094_v45 = vsel %vm1050_vm3, %v1089_v39, %v1093_v40  ;;  %v1101_v48 = vrot.slane %v1099_v42, 1  ;;  %v10564_v39 = vld [vmem:[%s10958_s26 + $0x88] sm:$0xff]  }
  0x34   : > { %9228 = vmatmul.mubr.msk.bf16.vlgmr.msra.gmra.mrb[0].mxu0 %vm571_vm2, %v1070_v32  ;;  %v1097_v50 = vor.u32 %v1095_v44, %v1093_v40  ;;  %v1109_v52 = vrot.slane %v1107_v47, 1  ;;  %v1115_v54 = vshll.u32 %v10555_v49, 16  ;;  %v1111_v56 = vshrl.u32 %v10554_v41, 16 }
  0x35   : > { %9264 = vmatpush3.bf16.msra.mxu0 %v1766_v6  ;;  %9231 = vmatprep.mubr.msk.bf16.mxu0 %vm571_vm2, %v1078_v35  ;;  %v1105_v51 = vor.u32 %v1103_v46, %v1101_v48  ;;  %v1119_v58 = vshrl.u32 %v10555_v49, 16  ;;  %v1123_v59 = vshll.u32 %v10556_v53, 16  ;;  %v1131_v2 = vshll.u32 %v10557_v61, 16  ;;  %v10563_v35 = vld [vmem:[%s10958_s26 + $0x80] sm:$0xff]  }
  0x36   : > { %9301 = vmatprep.subr.bf16.mxu0 %v10970_v30  ;;  %v1102_v55 = vsel %vm1050_vm3, %v1097_v50, %v1101_v48  ;;  %v1117_v60 = vrot.slane %v1115_v54, 1  ;;  %v1113_v62 = vor.u32 %v1111_v56, %v1109_v52  ;;  %v1127_v5 = vshrl.u32 %v10556_v53, 16  ;;  %v10566_v53 = vld [vmem:[%s10958_s26] sm:$0xfe]   ;;  %v10567_v54 = vld [vmem:[%s10958_s26 + $0x8] sm:$0xff]  }
  0x37   : > { %v1110_v57 = vsel %vm1050_vm3, %v1105_v51, %v1109_v52  ;;  %v1125_v0 = vrot.slane %v1123_v59, 1  ;;  %v1135_v7 = vshrl.u32 %v10557_v61, 16  ;;  %v1139_v8 = vshll.u32 %v10558_v1, 16  ;;  %v10568_v61 = vld [vmem:[%s10958_s26 + $0x10] sm:$0xff]  }
  0x38   : > { %v1121_v63 = vor.u32 %v1119_v58, %v1117_v60  ;;  %v1118_v3 = vsel %vm1050_vm3, %v1113_v62, %v1117_v60  ;;  %v1133_v9 = vrot.slane %v1131_v2, 1  ;;  %v1147_v15 = vshll.u32 %v10559_v10, 16  ;;  %v10569_v62 = vld [vmem:[%s10958_s26 + $0x18] sm:$0xff]  }
  0x39   : > { %v1129_v11 = vor.u32 %v1127_v5, %v1125_v0  ;;  %v1141_v13 = vrot.slane %v1139_v8, 1  ;;  %v1143_v17 = vshrl.u32 %v10558_v1, 16  ;;  %v1151_v19 = vshrl.u32 %v10559_v10, 16  ;;  %v8570_v5 = vld [vmem:[%s12380_s2 + $0x8] sm:$0x3] }
  0x3a   : > { %v1126_v6 = vsel %vm1050_vm3, %v1121_v63, %v1125_v0  ;;  %v1137_v12 = vor.u32 %v1135_v7, %v1133_v9  ;;  %v1155_v20 = vshll.u32 %v10560_v14, 16  ;;  %v1149_v21 = vrot.slane %v1147_v15, 1  ;;  %v10573_v15 = vld [vmem:[%s10958_s26 + $0x38] sm:$0xff]  }
  0x3b   : > { %v1134_v16 = vsel %vm1050_vm3, %v1129_v11, %v1133_v9  ;;  %v1145_v23 = vor.u32 %v1143_v17, %v1141_v13  ;;  %v1163_v27 = vshll.u32 %v10561_v22, 16  ;;  %v1159_v29 = vshrl.u32 %v10560_v14, 16  ;;  %v10574_v17 = vld [vmem:[%s10958_s26 + $0x40] sm:$0xff]  }
  0x3c   : > { %9232 = vmatmul.mubr.msk.bf16.gmra.mrb[4].mxu0 %vm571_vm2, %v1086_v43  ;;  %v1142_v18 = vsel %vm1050_vm3, %v1137_v12, %v1141_v13  ;;  %v1153_v24 = vor.u32 %v1151_v19, %v1149_v21  ;;  %v1157_v25 = vrot.slane %v1155_v20, 1  ;;  %v1167_v32 = vshrl.u32 %v10561_v22, 16  ;;  %v10565_v43 = vld [vmem:[%s10958_s26 + $0x90] ss:$0 sps:$4 sm:$0x11]   ;;  %v10575_v20 = vld [vmem:[%s10958_s26 + $0x48] sm:$0xff]  }
  0x3d   : > { %9235 = vmatprep.mubr.msk.bf16.mxu0 %vm571_vm2, %v1094_v45  ;;  %v1150_v28 = vsel %vm1050_vm3, %v1145_v23, %v1149_v21  ;;  %v1171_v33 = vshll.u32 %v10562_v26, 16  ;;  %v1165_v34 = vrot.slane %v1163_v27, 1  ;;  %v1179_v40 = vshll.u32 %v10563_v35, 16  ;;  %v10572_v12 = vld [vmem:[%s10958_s26 + $0x30] sm:$0xff]  }
  0x3e   : > { %v1158_v31 = vsel %vm1050_vm3, %v1153_v24, %v1157_v25  ;;  %v1161_v36 = vor.u32 %v1159_v29, %v1157_v25  ;;  %v1175_v42 = vshrl.u32 %v10562_v26, 16  ;;  %v1183_v45 = vshrl.u32 %v10563_v35, 16  ;;  %v10576_v23 = vld [vmem:[%s10958_s26 + $0x50] sm:$0xff]   ;;  %v10577_v26 = vld [vmem:[%s10958_s26 + $0x58] sm:$0xff]   ;;  %v10578_v29 = vld [vmem:[%s10958_s26 + $0x60] sm:$0xff]  }
  0x3f   : > { %v1169_v37 = vor.u32 %v1167_v32, %v1165_v34  ;;  %v1173_v38 = vrot.slane %v1171_v33, 1  ;;  %v1187_v46 = vshll.u32 %v10564_v39, 16  ;;  %v1181_v47 = vrot.slane %v1179_v40, 1  ;;  %v10579_v33 = vld [vmem:[%s10958_s26 + $0x68] sm:$0xff]  }
  0x40   : > { %v1166_v41 = vsel %vm1050_vm3, %v1161_v36, %v1165_v34  ;;  %v1191_v51 = vshrl.u32 %v10564_v39, 16  ;;  %v1195_v52 = vshll.u32 %v10565_v43, 16  ;;  %v1674_v59 = vrot.slane %v10566_v53, 1  ;;  %v10580_v36 = vld [vmem:[%s10958_s26 + $0x70] sm:$0xff]   ;;  %v10581_v39 = vld [vmem:[%s10958_s26 + $0x78] sm:$0xff]  }
  0x41   : > { %v1174_v44 = vsel %vm1050_vm3, %v1169_v37, %v1173_v38  ;;  %v1177_v48 = vor.u32 %v1175_v42, %v1173_v38  ;;  %v1185_v49 = vor.u32 %v1183_v45, %v1181_v47  ;;  %v1189_v50 = vrot.slane %v1187_v46, 1  ;;  %v10582_v42 = vld [vmem:[%s10958_s26 + $0x80] sm:$0xff]   ;;  %v10583_v45 = vld [vmem:[%s10958_s26 + $0x88] sm:$0xff]  }
  0x42   : > { %v1197_v58 = vrot.slane %v1195_v52, 1  ;;  %v1675_v60 = vrot.slane %v10567_v54, 1  ;;  %v1677_v1 = vrot.slane %v10568_v61, 1  ;;  %v1679_v2 = vrot.slane %v10569_v62, 1  ;;  %v10585_v52 = vld [vmem:[%s10958_s26 + $0x8] sm:$0xfe]  }
  0x43   : > { %v1190_v56 = vsel %vm1050_vm3, %v1185_v49, %v1189_v50  ;;  %v11036_v9 = vand.u32 %v8570_v5, %v10950_v4  ;;  %v1689_v21 = vrot.slane %v10574_v17, 1  ;;  %v1691_v22 = vrot.slane %v10575_v20, 1  ;;  %v10586_v49 = vld [vmem:[%s10958_s26 + $0x10] sm:$0xff]   ;;  %v10589_v62 = vld [vmem:[%s10958_s26 + $0x28] sm:$0xff]  }
  0x44   : > { %9236 = vmatmul.mubr.msk.bf16.gmra.mrb[8].mxu0 %vm571_vm2, %v1102_v55  ;;  %v1182_v55 = vsel %vm1050_vm3, %v1177_v48, %v1181_v47  ;;  %v1676_v0 = vsel %vm1673_vm4, %v1674_v59, %v1675_v60  ;;  %v1678_v7 = vsel %vm1673_vm4, %v1675_v60, %v1677_v1  ;;  %v1680_v8 = vsel %vm1673_vm4, %v1677_v1, %v1679_v2  ;;  %v10584_v48 = vld [vmem:[%s10958_s26 + $0x90] ss:$0 sps:$4 sm:$0x11]   ;;  %v10588_v59 = vld [vmem:[%s10958_s26 + $0x20] sm:$0xff]  }
  0x45   : > { %9239 = vmatprep.mubr.msk.bf16.mxu0 %vm571_vm2, %v1110_v57  ;;  %v1193_v57 = vor.u32 %v1191_v51, %v1189_v50  ;;  %v1692_v25 = vsel %vm1673_vm4, %v1689_v21, %v1691_v22  ;;  %v1693_v27 = vrot.slane %v10576_v23, 1  ;;  %v1697_v34 = vrot.slane %v10578_v29, 1 }
  0x46   : > { %v1699_v35 = vrot.slane %v10579_v33, 1  ;;  %v1701_v40 = vrot.slane %v10580_v36, 1  ;;  %v1705_v46 = vrot.slane %v10582_v42, 1  ;;  %v1707_v47 = vrot.slane %v10583_v45, 1  ;;  %v10605_v42 = vld [vmem:[%s10958_s26 + $0x10] sm:$0xff]  }
  0x47   : > { %v1198_v63 = vsel %vm1050_vm3, %v1193_v57, %v1197_v58  ;;  %v1709_v53 = vrot.slane %v10584_v48, 1  ;;  %v2185_v54 = vrot.slane %v10585_v52, 1  ;;  %v2190_v61 = vrot.slane %v10588_v59, 1  ;;  %v10606_v52 = vld [vmem:[%s10958_s26 + $0x18] sm:$0xff]  }
  0x48   : > { %v1700_v38 = vsel %vm1673_vm4, %v1697_v34, %v1699_v35  ;;  %v1702_v43 = vsel %vm1673_vm4, %v1699_v35, %v1701_v40  ;;  %v1708_v51 = vsel %vm1673_vm4, %v1705_v46, %v1707_v47  ;;  %v2192_v5 = vrot.slane %v10589_v62, 1 }
  0x49   : > { %v1710_v57 = vsel %vm1673_vm4, %v1707_v47, %v1709_v53  ;;  %v2706_v47 = vshrl.u32 %v10605_v42, 16  ;;  %v2709_v48 = vshll.u32 %v10605_v42, 16  ;;  %v2715_v59 = vshrl.u32 %v10606_v52, 16 }
  0x4c   : > { %9240 = vmatmul.mubr.msk.bf16.gmra.mrb[12].mxu0 %vm571_vm2, %v1118_v3  ;;  %v10570_v3 = vld [vmem:[%s10958_s26 + $0x20] sm:$0xff]  }
  0x4d   : > { %9243 = vmatprep.mubr.msk.bf16.mxu0 %vm571_vm2, %v1126_v6  ;;  %v10571_v6 = vld [vmem:[%s10958_s26 + $0x28] sm:$0xff]   ;;  %v1681_v10 = vrot.slane %v10570_v3, 1 }
  0x4e   : > { %v1683_v11 = vrot.slane %v10571_v6, 1 }
  0x4f   : > { %v1682_v13 = vsel %vm1673_vm4, %v1679_v2, %v1681_v10  ;;  %v10590_v2 = vld [vmem:[%s10958_s26 + $0x30] sm:$0xff]  }
  0x50   : > { %v1684_v14 = vsel %vm1673_vm4, %v1681_v10, %v1683_v11  ;;  %v2194_v6 = vrot.slane %v10590_v2, 1  ;;  %v2193_v10 = vsel %vm1673_vm4, %v2190_v61, %v2192_v5  ;;  %v2717_v2 = vrot.slane %v2715_v59, 1 }
  0x54   : > { %9244 = vmatmul.mubr.msk.bf16.gmra.mrb[16].mxu0 %vm571_vm2, %v1134_v16  ;;  %v1687_v16 = vrot.slane %v10573_v15, 1 }
  0x55   : > { %9247 = vmatprep.mubr.msk.bf16.mxu0 %vm571_vm2, %v1142_v18 }
  0x56   : > { %v1690_v24 = vsel %vm1673_vm4, %v1687_v16, %v1689_v21 }
  0x5c   : > { %9248 = vmatmul.mubr.msk.bf16.gmra.mrb[20].mxu0 %vm571_vm2, %v1150_v28  ;;  %v1695_v28 = vrot.slane %v10577_v26, 1 }
  0x5d   : > { %9251 = vmatprep.mubr.msk.bf16.mxu0 %vm571_vm2, %v1158_v31  ;;  %v1694_v31 = vsel %vm1673_vm4, %v1691_v22, %v1693_v27 }
  0x5e   : > { %v1696_v32 = vsel %vm1673_vm4, %v1693_v27, %v1695_v28  ;;  %v1698_v37 = vsel %vm1673_vm4, %v1695_v28, %v1697_v34  ;;  %v10598_v27 = vld [vmem:[%s10958_s26 + $0x70] sm:$0xff]   ;;  %v10600_v34 = vld [vmem:[%s10958_s26 + $0x80] sm:$0xff]  }
  0x5f   : > { %v2210_v29 = vrot.slane %v10598_v27, 1  ;;  %v2214_v36 = vrot.slane %v10600_v34, 1 }
  0x64   : > { %9252 = vmatmul.mubr.msk.bf16.gmra.mrb[24].mxu0 %vm571_vm2, %v1166_v41  ;;  %v1703_v41 = vrot.slane %v10581_v39, 1  ;;  %v10602_v39 = vld [vmem:[%s10958_s26 + $0x90] sm:$0xff]  }
  0x65   : > { %9255 = vmatprep.mubr.msk.bf16.mxu0 %vm571_vm2, %v1174_v44 }
  0x66   : > { %v1704_v44 = vsel %vm1673_vm4, %v1701_v40, %v1703_v41  ;;  %v1706_v50 = vsel %vm1673_vm4, %v1703_v41, %v1705_v46  ;;  %v10604_v41 = vld [vmem:[%s10958_s26 + $0x8] sm:$0xfe]  }
  0x67   : > { %v2698_v45 = vshrl.u32 %v10604_v41, 16  ;;  %v2701_v46 = vshll.u32 %v10604_v41, 16 }
  0x69   : > { %v2700_v53 = vrot.slane %v2698_v45, 1 }
  0x6c   : > { %9256 = vmatmul.mubr.msk.bf16.gmra.mrb[28].mxu0 %vm571_vm2, %v1182_v55  ;;  %v2186_v55 = vrot.slane %v10586_v49, 1 }
  0x6d   : > { %9259 = vmatprep.mubr.msk.bf16.mxu0 %vm571_vm2, %v1190_v56  ;;  %v10587_v56 = vld [vmem:[%s10958_s26 + $0x18] sm:$0xff]  }
  0x6e   : > { %v2187_v58 = vsel %vm1673_vm4, %v2185_v54, %v2186_v55  ;;  %v2188_v60 = vrot.slane %v10587_v56, 1  ;;  %v2703_v54 = vrot.slane %v2701_v46, 2  ;;  %v2711_v56 = vrot.slane %v2709_v48, 2 }
  0x70   : > { %v2191_v1 = vsel %vm1673_vm4, %v2188_v60, %v2190_v61  ;;  %v2704_v61 = vor.u32 %v2703_v54, %v2700_v53  ;;  %v10615_v53 = vld [vmem:[%s10958_s26 + $0x60] sm:$0xff]  }
  0x71   : > { %v2799_v59 = vshll.u32 %v10615_v53, 16 }
  0x74   : > { %9260 = vmatmul.mubr.msk.bf16.gmra.mrb[32].mxu0 %vm571_vm2, %v1198_v63  ;;  %v8608_v63 = vld [vmem:[%s12380_s2 + $0xa] sm:$0x3] }
  0x75   : > { %9265 = vmatprep.mubr.msk.bf16.mxu0 %vm571_vm2, %v1676_v0  ;;  %v2189_v0 = vsel %vm1673_vm4, %v2186_v55, %v2188_v60  ;;  %v11099_v3 = vand.u32 %v8608_v63, %v10950_v4  ;;  %v2708_v55 = vrot.slane %v2706_v47, 1  ;;  %v2718_v60 = vshll.u32 %v10606_v52, 16 }
  0x77   : > { %v2712_v62 = vor.u32 %v2711_v56, %v2708_v55 }
  0x7c   : > { %9266 = vmatmul.mubr.msk.bf16.vlgmr.msra.gmra.mrb[0].mxu0 %vm571_vm2, %v1678_v7  ;;  %v10591_v7 = vld [vmem:[%s10958_s26 + $0x38] sm:$0xff]  }
  0x7d   : > { %9302 = vmatpush3.bf16.msra.mxu0 %v10970_v30  ;;  %9269 = vmatprep.mubr.msk.bf16.mxu0 %vm571_vm2, %v1680_v8  ;;  %v1685_v30 = vrot.slane %v10572_v12, 1  ;;  %v10592_v8 = vld [vmem:[%s10958_s26 + $0x40] sm:$0xff]   ;;  %v2196_v12 = vrot.slane %v10591_v7, 1  ;;  %v2713_v7 = vsel %vm2696_vm5, %v2704_v61, %v2712_v62 }
  0x7e   : > { %9339 = vmatprep.subr.bf16.mxu0 %v11036_v9 }
  0x7f   : > { %v1686_v18 = vsel %vm1673_vm4, %v1683_v11, %v1685_v30  ;;  %v1688_v19 = vsel %vm1673_vm4, %v1685_v30, %v1687_v16  ;;  %v2195_v11 = vsel %vm1673_vm4, %v2192_v5, %v2194_v6  ;;  %v2197_v15 = vsel %vm1673_vm4, %v2194_v6, %v2196_v12  ;;  %v10608_v6 = vld [vmem:[%s10958_s26 + $0x28] sm:$0xff]  }
  0x80   : > { %v2720_v5 = vrot.slane %v2718_v60, 2 }
  0x84   : > { %9270 = vmatmul.mubr.msk.bf16.gmra.mrb[4].mxu0 %vm571_vm2, %v1682_v13  ;;  %v10593_v13 = vld [vmem:[%s10958_s26 + $0x48] sm:$0xff]  }
  0x85   : > { %9273 = vmatprep.mubr.msk.bf16.mxu0 %vm571_vm2, %v1684_v14  ;;  %v10594_v14 = vld [vmem:[%s10958_s26 + $0x50] sm:$0xff]   ;;  %v2200_v16 = vrot.slane %v10593_v13, 1  ;;  %v2736_v13 = vshll.u32 %v10608_v6, 16 }
  0x86   : > { %v2202_v17 = vrot.slane %v10594_v14, 1 }
  0x88   : > { %v2203_v21 = vsel %vm1673_vm4, %v2200_v16, %v2202_v17 }
  0x8c   : > { %9274 = vmatmul.mubr.msk.bf16.gmra.mrb[8].mxu0 %vm571_vm2, %v1686_v18  ;;  %v10595_v18 = vld [vmem:[%s10958_s26 + $0x58] sm:$0xff]  }
  0x8d   : > { %9277 = vmatprep.mubr.msk.bf16.mxu0 %vm571_vm2, %v1688_v19  ;;  %v10596_v19 = vld [vmem:[%s10958_s26 + $0x60] sm:$0xff]   ;;  %v2204_v22 = vrot.slane %v10595_v18, 1 }
  0x8e   : > { %v2206_v23 = vrot.slane %v10596_v19, 1  ;;  %v2738_v19 = vrot.slane %v2736_v13, 2 }
  0x90   : > { %v2207_v26 = vsel %vm1673_vm4, %v2204_v22, %v2206_v23 }
  0x94   : > { %9278 = vmatmul.mubr.msk.bf16.gmra.mrb[12].mxu0 %vm571_vm2, %v1690_v24  ;;  %v2205_v24 = vsel %vm1673_vm4, %v2202_v17, %v2204_v22 }
  0x95   : > { %9281 = vmatprep.mubr.msk.bf16.mxu0 %vm571_vm2, %v1692_v25  ;;  %v10597_v25 = vld [vmem:[%s10958_s26 + $0x68] sm:$0xff]  }
  0x96   : > { %v2208_v28 = vrot.slane %v10597_v25, 1 }
  0x98   : > { %v2211_v33 = vsel %vm1673_vm4, %v2208_v28, %v2210_v29 }
  0x9c   : > { %9282 = vmatmul.mubr.msk.bf16.gmra.mrb[16].mxu0 %vm571_vm2, %v1694_v31  ;;  %v2209_v31 = vsel %vm1673_vm4, %v2206_v23, %v2208_v28 }
  0x9d   : > { %9285 = vmatprep.mubr.msk.bf16.mxu0 %vm571_vm2, %v1696_v32  ;;  %v10599_v32 = vld [vmem:[%s10958_s26 + $0x78] sm:$0xff]  }
  0x9e   : > { %v2212_v35 = vrot.slane %v10599_v32, 1 }
  0xa0   : > { %v2215_v40 = vsel %vm1673_vm4, %v2212_v35, %v2214_v36 }
  0xa4   : > { %9286 = vmatmul.mubr.msk.bf16.gmra.mrb[20].mxu0 %vm571_vm2, %v1698_v37  ;;  %v2213_v37 = vsel %vm1673_vm4, %v2210_v29, %v2212_v35 }
  0xa5   : > { %9289 = vmatprep.mubr.msk.bf16.mxu0 %vm571_vm2, %v1700_v38  ;;  %v10601_v38 = vld [vmem:[%s10958_s26 + $0x88] sm:$0xff]  }
  0xac   : > { %9290 = vmatmul.mubr.msk.bf16.gmra.mrb[24].mxu0 %vm571_vm2, %v1702_v43  ;;  %v2216_v43 = vrot.slane %v10601_v38, 1 }
  0xad   : > { %9293 = vmatprep.mubr.msk.bf16.mxu0 %vm571_vm2, %v1704_v44  ;;  %v2218_v44 = vrot.slane %v10602_v39, 1  ;;  %v10613_v39 = vld [vmem:[%s10958_s26 + $0x50] sm:$0xff]  }
  0xae   : > { %v2217_v49 = vsel %vm1673_vm4, %v2214_v36, %v2216_v43  ;;  %v10612_v36 = vld [vmem:[%s10958_s26 + $0x48] sm:$0xff]   ;;  %v2781_v45 = vshll.u32 %v10613_v39, 16 }
  0xaf   : > { %v2769_v41 = vshrl.u32 %v10612_v36, 16  ;;  %v2772_v42 = vshll.u32 %v10612_v36, 16 }
  0xb0   : > { %v2783_v52 = vrot.slane %v2781_v45, 2 }
  0xb1   : > { %v2771_v47 = vrot.slane %v2769_v41, 1  ;;  %v2774_v48 = vrot.slane %v2772_v42, 2 }
  0xb3   : > { %v2775_v54 = vor.u32 %v2774_v48, %v2771_v47 }
  0xb4   : > { %9294 = vmatmul.mubr.msk.bf16.gmra.mrb[28].mxu0 %vm571_vm2, %v1706_v50  ;;  %v2219_v50 = vsel %vm1673_vm4, %v2216_v43, %v2218_v44 }
  0xb5   : > { %9297 = vmatprep.mubr.msk.bf16.mxu0 %vm571_vm2, %v1708_v51  ;;  %v10603_v51 = vld [vmem:[%s10958_s26 + $0x98] ss:$0 sps:$4 sm:$0x11]  }
  0xbc   : > { %9298 = vmatmul.mubr.msk.bf16.gmra.mrb[32].mxu0 %vm571_vm2, %v1710_v57  ;;  %v10607_v57 = vld [vmem:[%s10958_s26 + $0x20] sm:$0xff]  }
  0xbd   : > { %9303 = vmatprep.mubr.msk.bf16.mxu0 %vm571_vm2, %v2187_v58  ;;  %v2220_v58 = vrot.slane %v10603_v51, 1  ;;  %v2724_v63 = vshrl.u32 %v10607_v57, 16 }
  0xc4   : > { %9304 = vmatmul.mubr.msk.bf16.vlgmr.msra.gmra.mrb[0].mxu0 %vm571_vm2, %v2189_v0  ;;  %v2727_v0 = vshll.u32 %v10607_v57, 16 }
  0xc5   : > { %9340 = vmatpush3.bf16.msra.mxu0 %v11036_v9  ;;  %9307 = vmatprep.mubr.msk.bf16.mxu0 %vm571_vm2, %v2191_v1  ;;  %v2198_v9 = vrot.slane %v10592_v8, 1  ;;  %v2221_v1 = vsel %vm1673_vm4, %v2218_v44, %v2220_v58  ;;  %v2726_v8 = vrot.slane %v2724_v63, 1  ;;  %v2778_v44 = vshrl.u32 %v10613_v39, 16  ;;  %v10616_v63 = vld [vmem:[%s10958_s26 + $0x68] sm:$0xff]  }
  0xc6   : > { %9377 = vmatprep.subr.bf16.mxu0 %v11099_v3  ;;  %v2796_v58 = vshrl.u32 %v10615_v53, 16 }
  0xc7   : > { %v2199_v30 = vsel %vm1673_vm4, %v2196_v12, %v2198_v9  ;;  %v2201_v20 = vsel %vm1673_vm4, %v2198_v9, %v2200_v16  ;;  %v2721_v12 = vor.u32 %v2720_v5, %v2717_v2  ;;  %v2733_v9 = vshrl.u32 %v10608_v6, 16  ;;  %v8646_v16 = vld [vmem:[%s12380_s2 + $0xc] sm:$0x3]  ;;  %v10617_v5 = vld [vmem:[%s10958_s26 + $0x70] sm:$0xff]  }
  0xc8   : > { %v11164_v25 = vand.u32 %v8646_v16, %v10950_v4  ;;  %v2780_v51 = vrot.slane %v2778_v44, 1  ;;  %v2801_v2 = vrot.slane %v2799_v59, 2 }
  0xc9   : > { %v2722_v17 = vsel %vm2696_vm5, %v2712_v62, %v2721_v12  ;;  %v2735_v18 = vrot.slane %v2733_v9, 1 }
  0xca   : > { %v2784_v57 = vor.u32 %v2783_v52, %v2780_v51 }
  0xcc   : > { %9308 = vmatmul.mubr.msk.bf16.gmra.mrb[4].mxu0 %vm571_vm2, %v2193_v10  ;;  %v2729_v10 = vrot.slane %v2727_v0, 2  ;;  %v2785_v0 = vsel %vm2696_vm5, %v2775_v54, %v2784_v57 }
  0xcd   : > { %9311 = vmatprep.mubr.msk.bf16.mxu0 %vm571_vm2, %v2195_v11  ;;  %v10609_v11 = vld [vmem:[%s10958_s26 + $0x30] sm:$0xff]  }
  0xce   : > { %v2730_v14 = vor.u32 %v2729_v10, %v2726_v8  ;;  %v2808_v8 = vshll.u32 %v10616_v63, 16 }
  0xd4   : > { %9312 = vmatmul.mubr.msk.bf16.gmra.mrb[8].mxu0 %vm571_vm2, %v2197_v15  ;;  %v2742_v15 = vshrl.u32 %v10609_v11, 16 }
  0xd5   : > { %9315 = vmatprep.mubr.msk.bf16.mxu0 %vm571_vm2, %v2199_v30  ;;  %v2745_v30 = vshll.u32 %v10609_v11, 16  ;;  %v2814_v11 = vshrl.u32 %v10617_v5, 16 }
  0xd6   : > { %v2744_v22 = vrot.slane %v2742_v15, 1  ;;  %v10618_v15 = vld [vmem:[%s10958_s26 + $0x78] sm:$0xff]  }
  0xd7   : > { %v2747_v23 = vrot.slane %v2745_v30, 2  ;;  %v2816_v16 = vrot.slane %v2814_v11, 1 }
  0xd9   : > { %v2748_v29 = vor.u32 %v2747_v23, %v2744_v22 }
  0xdc   : > { %9316 = vmatmul.mubr.msk.bf16.gmra.mrb[12].mxu0 %vm571_vm2, %v2201_v20  ;;  %v10610_v20 = vld [vmem:[%s10958_s26 + $0x38] sm:$0xff]  }
  0xdd   : > { %9319 = vmatprep.mubr.msk.bf16.mxu0 %vm571_vm2, %v2203_v21  ;;  %v2731_v21 = vsel %vm2696_vm5, %v2721_v12, %v2730_v14  ;;  %v2751_v27 = vshrl.u32 %v10610_v20, 16  ;;  %v2754_v28 = vshll.u32 %v10610_v20, 16  ;;  %v2817_v12 = vshll.u32 %v10617_v5, 16 }
  0xde   : > { %v2823_v20 = vshrl.u32 %v10618_v15, 16 }
  0xdf   : > { %v2753_v34 = vrot.slane %v2751_v27, 1  ;;  %v2756_v35 = vrot.slane %v2754_v28, 2 }
  0xe0   : > { %v2825_v27 = vrot.slane %v2823_v20, 1 }
  0xe4   : > { %9320 = vmatmul.mubr.msk.bf16.gmra.mrb[16].mxu0 %vm571_vm2, %v2205_v24  ;;  %v10611_v24 = vld [vmem:[%s10958_s26 + $0x40] sm:$0xff]  }
  0xe5   : > { %9323 = vmatprep.mubr.msk.bf16.mxu0 %vm571_vm2, %v2207_v26  ;;  %v2739_v26 = vor.u32 %v2738_v19, %v2735_v18  ;;  %v2763_v32 = vshll.u32 %v10611_v24, 16  ;;  %v10619_v18 = vld [vmem:[%s10958_s26 + $0x80] sm:$0xff]  }
  0xe6   : > { %v2832_v23 = vshrl.u32 %v10619_v18, 16 }
  0xe7   : > { %v2765_v38 = vrot.slane %v2763_v32, 2 }
  0xe8   : > { %v2834_v32 = vrot.slane %v2832_v23, 1  ;;  %v10633_v23 = vld [vmem:[%s10958_s26 + $0x58] sm:$0xff]  }
  0xec   : > { %9324 = vmatmul.mubr.msk.bf16.gmra.mrb[20].mxu0 %vm571_vm2, %v2209_v31  ;;  %v2760_v31 = vshrl.u32 %v10611_v24, 16  ;;  %v2835_v24 = vshll.u32 %v10619_v18, 16 }
  0xed   : > { %9327 = vmatprep.mubr.msk.bf16.mxu0 %vm571_vm2, %v2211_v33  ;;  %v2740_v33 = vsel %vm2696_vm5, %v2730_v14, %v2739_v26  ;;  %v2810_v14 = vrot.slane %v2808_v8, 2  ;;  %v10628_v8 = vld [vmem:[%s10958_s26 + $0x30] sm:$0xff]  }
  0xf4   : > { %9328 = vmatmul.mubr.msk.bf16.gmra.mrb[24].mxu0 %vm571_vm2, %v2213_v37  ;;  %v2749_v37 = vsel %vm2696_vm5, %v2739_v26, %v2748_v29 }
  0xf5   : > { %9331 = vmatprep.mubr.msk.bf16.mxu0 %vm571_vm2, %v2215_v40  ;;  %v2757_v40 = vor.u32 %v2756_v35, %v2753_v34  ;;  %v10621_v34 = vld [vmem:[%s10958_s26 + $0x90] sm:$0xff]  }
  0xf6   : > { %v2853_v39 = vshll.u32 %v10621_v34, 16 }
  0xf7   : > { %v2758_v46 = vsel %vm2696_vm5, %v2748_v29, %v2757_v40  ;;  %v10620_v29 = vld [vmem:[%s10958_s26 + $0x88] sm:$0xff]  }
  0xf8   : > { %v2841_v36 = vshrl.u32 %v10620_v29, 16 }
  0xfa   : > { %v2843_v41 = vrot.slane %v2841_v36, 1 }
  0xfc   : > { %9332 = vmatmul.mubr.msk.bf16.gmra.mrb[28].mxu0 %vm571_vm2, %v2217_v49  ;;  %v10614_v49 = vld [vmem:[%s10958_s26 + $0x58] sm:$0xff]  }
  0xfd   : > { %9335 = vmatprep.mubr.msk.bf16.mxu0 %vm571_vm2, %v2219_v50  ;;  %v2787_v55 = vshrl.u32 %v10614_v49, 16  ;;  %v2790_v56 = vshll.u32 %v10614_v49, 16 }
  0xff   : > { %v2789_v61 = vrot.slane %v2787_v55, 1  ;;  %v2792_v62 = vrot.slane %v2790_v56, 2  ;;  %v10623_v55 = vld [vmem:[%s10958_s26 + $0x8] sm:$0xfc]   ;;  %v10624_v56 = vld [vmem:[%s10958_s26 + $0x10] sm:$0xff]  }
 0x100   : > { %v3343_v59 = vrot.slane %v10624_v56, 2  ;;  %v10644_v56 = vld [vmem:[%s10958_s26 + $0x20] sm:$0xff]  }
 0x101   : > { %v2793_v6 = vor.u32 %v2792_v62, %v2789_v61  ;;  %v10625_v61 = vld [vmem:[%s10958_s26 + $0x18] sm:$0xff]  }
 0x103   : > { %v2794_v9 = vsel %vm2696_vm5, %v2784_v57, %v2793_v6 }
 0x104   : > { %9336 = vmatmul.mubr.msk.bf16.gmra.mrb[32].mxu0 %vm571_vm2, %v2221_v1  ;;  %v2798_v1 = vrot.slane %v2796_v58, 1  ;;  %v3342_v58 = vrot.slane %v10623_v55, 2 }
 0x105   : > { %9341 = vmatprep.mubr.msk.bf16.mxu0 %vm571_vm2, %v2713_v7  ;;  %v2805_v7 = vshrl.u32 %v10616_v63, 16  ;;  %v10626_v63 = vld [vmem:[%s10958_s26 + $0x20] sm:$0xff]  }
 0x106   : > { %v2802_v10 = vor.u32 %v2801_v2, %v2798_v1  ;;  %v3344_v62 = vsel %vm3341_vm6, %v3342_v58, %v3343_v59  ;;  %v3347_v1 = vrot.slane %v10626_v63, 2  ;;  %v8684_v2 = vld [vmem:[%s12380_s2 + $0xe] sm:$0x3]  ;;  %v8722_v63 = vld [vmem:[%s12380_s2 + $0x10] sm:$0x3] }
 0x107   : > { %v2807_v13 = vrot.slane %v2805_v7, 1  ;;  %v10645_v58 = vld [vmem:[%s10958_s26 + $0x28] sm:$0xff]  }
 0x108   : > { %v2803_v30 = vsel %vm2696_vm5, %v2793_v6, %v2802_v10  ;;  %v10627_v6 = vld [vmem:[%s10958_s26 + $0x28] sm:$0xff]  }
 0x109   : > { %v2811_v19 = vor.u32 %v2810_v14, %v2807_v13  ;;  %v3349_v11 = vrot.slane %v10627_v6, 2  ;;  %v10629_v13 = vld [vmem:[%s10958_s26 + $0x38] sm:$0xff]   ;;  %v11292_v6 = vand.u32 %v8722_v63, %v10950_v4 }
 0x10b   : > { %v2812_v26 = vsel %vm2696_vm5, %v2802_v10, %v2811_v19  ;;  %v11225_v10 = vand.u32 %v8684_v2, %v10950_v4 }
 0x10c   : > { %9342 = vmatmul.mubr.msk.bf16.vlgmr.msra.gmra.mrb[0].mxu0 %vm571_vm2, %v2722_v17  ;;  %v2819_v17 = vrot.slane %v2817_v12, 2  ;;  %v3351_v12 = vrot.slane %v10628_v8, 2  ;;  %v10679_v8 = vld [vmem:[%s10958_s26 + $0x8] sm:$0xff]  }
 0x10d   : > { %9378 = vmatpush3.bf16.msra.mxu0 %v11099_v3  ;;  %9345 = vmatprep.mubr.msk.bf16.mxu0 %vm571_vm2, %v2731_v21  ;;  %v2762_v3 = vrot.slane %v2760_v31, 1  ;;  %v2826_v21 = vshll.u32 %v10618_v15, 16  ;;  %v10630_v15 = vld [vmem:[%s10958_s26 + $0x40] sm:$0xff]  }
 0x10e   : > { %9415 = vmatprep.subr.bf16.mxu0 %v11164_v25  ;;  %v2820_v22 = vor.u32 %v2819_v17, %v2816_v16  ;;  %v3352_v14 = vsel %vm3341_vm6, %v3349_v11, %v3351_v12  ;;  %v10631_v17 = vld [vmem:[%s10958_s26 + $0x48] sm:$0xff]  }
 0x10f   : > { %v2766_v43 = vor.u32 %v2765_v38, %v2762_v3  ;;  %v2828_v28 = vrot.slane %v2826_v21, 2  ;;  %v2850_v38 = vshrl.u32 %v10621_v34, 16  ;;  %v3357_v20 = vrot.slane %v10631_v17, 2  ;;  %v10650_v17 = vld [vmem:[%s10958_s26 + $0x50] sm:$0xff]  }
 0x110   : > { %v2821_v31 = vsel %vm2696_vm5, %v2811_v19, %v2820_v22  ;;  %v10632_v19 = vld [vmem:[%s10958_s26 + $0x50] sm:$0xff]  }
 0x111   : > { %v2767_v50 = vsel %vm2696_vm5, %v2757_v40, %v2766_v43  ;;  %v2776_v60 = vsel %vm2696_vm5, %v2766_v43, %v2775_v54  ;;  %v2829_v35 = vor.u32 %v2828_v28, %v2825_v27  ;;  %v10622_v43 = vld [vmem:[%s10958_s26 + $0x98] ss:$0 sps:$4 sm:$0x33]   ;;  %v2852_v45 = vrot.slane %v2850_v38, 1  ;;  %v10638_v38 = vld [vmem:[%s10958_s26 + $0x80] sm:$0xff]  }
 0x112   : > { %v2859_v48 = vshrl.u32 %v10622_v43, 16  ;;  %v2862_v49 = vshll.u32 %v10622_v43, 16  ;;  %v3359_v21 = vrot.slane %v10632_v19, 2  ;;  %v3361_v27 = vrot.slane %v10633_v23, 2  ;;  %v10651_v19 = vld [vmem:[%s10958_s26 + $0x58] sm:$0xff]  }
 0x113   : > { %v2830_v40 = vsel %vm2696_vm5, %v2820_v22, %v2829_v35  ;;  %v3870_v23 = vrot.slane %v10651_v19, 2 }
 0x114   : > { %9346 = vmatmul.mubr.msk.bf16.gmra.mrb[4].mxu0 %vm571_vm2, %v2740_v33  ;;  %v2837_v33 = vrot.slane %v2835_v24, 2  ;;  %v2861_v52 = vrot.slane %v2859_v48, 1  ;;  %v2864_v53 = vrot.slane %v2862_v49, 2  ;;  %v3360_v24 = vsel %vm3341_vm6, %v3357_v20, %v3359_v21  ;;  %v10641_v48 = vld [vmem:[%s10958_s26 + $0x98] ss:$0 sps:$4 sm:$0x33]  }
 0x115   : > { %9349 = vmatprep.mubr.msk.bf16.mxu0 %vm571_vm2, %v2749_v37  ;;  %v2844_v37 = vshll.u32 %v10620_v29, 16  ;;  %v3362_v29 = vsel %vm3341_vm6, %v3359_v21, %v3361_v27  ;;  %v10688_v21 = vld [vmem:[%s10958_s26 + $0x28] sm:$0xff]  }
 0x116   : > { %v2838_v3 = vor.u32 %v2837_v33, %v2834_v32  ;;  %v2865_v57 = vor.u32 %v2864_v53, %v2861_v52  ;;  %v10636_v33 = vld [vmem:[%s10958_s26 + $0x70] sm:$0xff]   ;;  %v3377_v52 = vrot.slane %v10641_v48, 2 }
 0x117   : > { %v2846_v42 = vrot.slane %v2844_v37, 2  ;;  %v10637_v37 = vld [vmem:[%s10958_s26 + $0x78] sm:$0xff]  }
 0x118   : > { %v2839_v44 = vsel %vm2696_vm5, %v2829_v35, %v2838_v3  ;;  %v3367_v35 = vrot.slane %v10636_v33, 2 }
 0x119   : > { %v2847_v47 = vor.u32 %v2846_v42, %v2843_v41  ;;  %v10639_v42 = vld [vmem:[%s10958_s26 + $0x88] sm:$0xff]  }
 0x11b   : > { %v2848_v51 = vsel %vm2696_vm5, %v2838_v3, %v2847_v47 }
 0x11c   : > { %9350 = vmatmul.mubr.msk.bf16.gmra.mrb[8].mxu0 %vm571_vm2, %v2758_v46  ;;  %v2855_v46 = vrot.slane %v2853_v39, 2  ;;  %v3369_v39 = vrot.slane %v10637_v37, 2  ;;  %v10655_v37 = vld [vmem:[%s10958_s26 + $0x78] sm:$0xff]  }
 0x11d   : > { %9353 = vmatprep.mubr.msk.bf16.mxu0 %vm571_vm2, %v2767_v50 }
 0x11e   : > { %v2856_v50 = vor.u32 %v2855_v46, %v2852_v45  ;;  %v3370_v41 = vsel %vm3341_vm6, %v3367_v35, %v3369_v39  ;;  %v3373_v45 = vrot.slane %v10639_v42, 2  ;;  %v10656_v42 = vld [vmem:[%s10958_s26 + $0x80] sm:$0xff]  }
 0x120   : > { %v2857_v54 = vsel %vm2696_vm5, %v2847_v47, %v2856_v50 }
 0x124   : > { %9354 = vmatmul.mubr.msk.bf16.gmra.mrb[12].mxu0 %vm571_vm2, %v2776_v60  ;;  %v2866_v60 = vsel %vm2696_vm5, %v2856_v50, %v2865_v57  ;;  %v10642_v50 = vld [vmem:[%s10958_s26 + $0x10] sm:$0xfc]  }
 0x125   : > { %9357 = vmatprep.mubr.msk.bf16.mxu0 %vm571_vm2, %v2785_v0  ;;  %v3345_v0 = vrot.slane %v10625_v61, 2  ;;  %v3853_v53 = vrot.slane %v10642_v50, 2  ;;  %v10658_v50 = vld [vmem:[%s10958_s26 + $0x90] sm:$0xff]  }
 0x127   : > { %v3346_v5 = vsel %vm3341_vm6, %v3343_v59, %v3345_v0  ;;  %v3348_v7 = vsel %vm3341_vm6, %v3345_v0, %v3347_v1  ;;  %v480_v59 = vld [vmem:[%s12380_s2] sm:$0x3] }
 0x128   : > { %v631_v61 = vand.u32 %v10950_v4, %v480_v59 }
 0x12a   : > { %9187 = vmatprep.subr.bf16.mxu1 %v631_v61 }
 0x12b   : > { %9188 = vmatpush3.bf16.msra.mxu1 %v631_v61 }
 0x12c   : > { %9358 = vmatmul.mubr.msk.bf16.gmra.mrb[16].mxu0 %vm571_vm2, %v2794_v9  ;;  %v3350_v9 = vsel %vm3341_vm6, %v3347_v1, %v3349_v11  ;;  %v10646_v1 = vld [vmem:[%s10958_s26 + $0x30] sm:$0xff]  }
 0x12d   : > { %9361 = vmatprep.mubr.msk.bf16.mxu0 %vm571_vm2, %v2803_v30  ;;  %v3355_v30 = vrot.slane %v10630_v15, 2  ;;  %v3860_v11 = vrot.slane %v10646_v1, 2  ;;  %v10683_v15 = vld [vmem:[%s10958_s26 + $0x18] sm:$0xff]   ;;  %v10660_v1 = vld [vmem:[%s10958_s26 + $0xa0] ss:$0 sps:$4 sm:$0x33]  }
 0x12f   : > { %v3358_v22 = vsel %vm3341_vm6, %v3355_v30, %v3357_v20  ;;  %v10687_v20 = vld [vmem:[%s10958_s26 + $0x20] sm:$0xff]  }
 0x134   : > { %9362 = vmatmul.mubr.msk.bf16.gmra.mrb[20].mxu0 %vm571_vm2, %v2812_v26  ;;  %v10634_v26 = vld [vmem:[%s10958_s26 + $0x60] sm:$0xff]  }
 0x135   : > { %9365 = vmatprep.mubr.msk.bf16.mxu0 %vm571_vm2, %v2821_v31  ;;  %v3363_v28 = vrot.slane %v10634_v26, 2  ;;  %v10635_v31 = vld [vmem:[%s10958_s26 + $0x68] sm:$0xff]   ;;  %v10652_v26 = vld [vmem:[%s10958_s26 + $0x60] sm:$0xff]  }
 0x136   : > { %v3365_v34 = vrot.slane %v10635_v31, 2  ;;  %v10692_v31 = vld [vmem:[%s10958_s26 + $0x38] sm:$0xff]  }
 0x137   : > { %v3364_v32 = vsel %vm3341_vm6, %v3361_v27, %v3363_v28 }
 0x138   : > { %v3366_v36 = vsel %vm3341_vm6, %v3363_v28, %v3365_v34  ;;  %v3368_v3 = vsel %vm3341_vm6, %v3365_v34, %v3367_v35  ;;  %v10653_v28 = vld [vmem:[%s10958_s26 + $0x68] sm:$0xff]   ;;  %v10654_v35 = vld [vmem:[%s10958_s26 + $0x70] sm:$0xff]  }
 0x139   : > { %v3874_v33 = vrot.slane %v10653_v28, 2 }
 0x13c   : > { %9366 = vmatmul.mubr.msk.bf16.gmra.mrb[24].mxu0 %vm571_vm2, %v2830_v40  ;;  %v3371_v40 = vrot.slane %v10638_v38, 2  ;;  %v10696_v38 = vld [vmem:[%s10958_s26 + $0x48] sm:$0xff]  }
 0x13d   : > { %9369 = vmatprep.mubr.msk.bf16.mxu0 %vm571_vm2, %v2839_v44  ;;  %v10640_v44 = vld [vmem:[%s10958_s26 + $0x90] sm:$0xff]  }
 0x13e   : > { %v3372_v43 = vsel %vm3341_vm6, %v3369_v39, %v3371_v40  ;;  %v3375_v46 = vrot.slane %v10640_v44, 2  ;;  %v3374_v47 = vsel %vm3341_vm6, %v3371_v40, %v3373_v45  ;;  %v3876_v39 = vrot.slane %v10654_v35, 2  ;;  %v10657_v44 = vld [vmem:[%s10958_s26 + $0x88] sm:$0xff]  }
 0x13f   : > { %v3878_v40 = vrot.slane %v10655_v37, 2  ;;  %v3882_v48 = vrot.slane %v10657_v44, 2 }
 0x140   : > { %v3376_v49 = vsel %vm3341_vm6, %v3373_v45, %v3375_v46  ;;  %v3378_v55 = vsel %vm3341_vm6, %v3375_v46, %v3377_v52  ;;  %v10699_v45 = vld [vmem:[%s10958_s26 + $0x50] sm:$0xff]   ;;  %v10700_v46 = vld [vmem:[%s10958_s26 + $0x58] sm:$0xff]  }
 0x144   : > { %9370 = vmatmul.mubr.msk.bf16.gmra.mrb[28].mxu0 %vm571_vm2, %v2848_v51  ;;  %v10643_v51 = vld [vmem:[%s10958_s26 + $0x18] sm:$0xff]  }
 0x145   : > { %9373 = vmatprep.mubr.msk.bf16.mxu0 %vm571_vm2, %v2857_v54  ;;  %v3854_v54 = vrot.slane %v10643_v51, 2  ;;  %v10659_v51 = vld [vmem:[%s10958_s26 + $0x98] sm:$0xff]  }
 0x147   : > { %v3855_v57 = vsel %vm3341_vm6, %v3853_v53, %v3854_v54  ;;  %v10661_v53 = vld [vmem:[%s10958_s26 + $0x10] sm:$0xfc]  }
 0x148   : > { %v4366_v59 = vshrl.u32 %v10661_v53, 16 }
 0x14c   : > { %9374 = vmatmul.mubr.msk.bf16.gmra.mrb[32].mxu0 %vm571_vm2, %v2866_v60  ;;  %v3856_v60 = vrot.slane %v10644_v56, 2  ;;  %v10704_v56 = vld [vmem:[%s10958_s26 + $0x68] sm:$0xff]  }
 0x14d   : > { %9379 = vmatprep.mubr.msk.bf16.mxu0 %vm571_vm2, %v3344_v62  ;;  %v3858_v62 = vrot.slane %v10645_v58, 2  ;;  %v3886_v58 = vrot.slane %v10659_v51, 2  ;;  %v10669_v51 = vld [vmem:[%s10958_s26 + $0x50] sm:$0xff]  }
 0x14e   : > { %v3857_v0 = vsel %vm3341_vm6, %v3854_v54, %v3856_v60  ;;  %v10662_v54 = vld [vmem:[%s10958_s26 + $0x18] sm:$0xff]  }
 0x14f   : > { %v3859_v2 = vsel %vm3341_vm6, %v3856_v60, %v3858_v62  ;;  %v3861_v4 = vsel %vm3341_vm6, %v3858_v62, %v3860_v11  ;;  %v4369_v60 = vshll.u32 %v10661_v53, 16  ;;  %v4374_v61 = vshrl.u32 %v10662_v54, 16 }
 0x150   : > { %v4377_v62 = vshll.u32 %v10662_v54, 16 }
 0x154   : > { %9380 = vmatmul.mubr.msk.bf16.vlgmr.msra.gmra.mrb[0].mxu0 %vm571_vm2, %v3346_v5  ;;  %v10647_v5 = vld [vmem:[%s10958_s26 + $0x38] sm:$0xff]  }
 0x155   : > { %9416 = vmatpush3.bf16.msra.mxu0 %v11164_v25  ;;  %9383 = vmatprep.mubr.msk.bf16.mxu0 %vm571_vm2, %v3348_v7  ;;  %v3353_v25 = vrot.slane %v10629_v13, 2  ;;  %v10678_v7 = vld [vmem:[%s10958_s26] sm:$0xff]  }
 0x156   : > { %9453 = vmatprep.subr.bf16.mxu0 %v11225_v10  ;;  %9189 = vmatprep.mubr.msk.bf16.mxu1 %vm571_vm2, %v10678_v7  ;;  %v4371_v7 = vrot.slane %v4369_v60, 3 }
 0x157   : > { %v3354_v16 = vsel %vm3341_vm6, %v3351_v12, %v3353_v25  ;;  %v3356_v18 = vsel %vm3341_vm6, %v3353_v25, %v3355_v30  ;;  %v3862_v12 = vrot.slane %v10647_v5, 2  ;;  %9190 = vmatmul.mubr.msk.bf16.vlgmr.msra.gmra.mrb[0].mxu1 %vm571_vm2, %v10679_v8  ;;  %v4368_v5 = vrot.slane %v4366_v59, 2 }
 0x158   : > { %v4376_v8 = vrot.slane %v4374_v61, 2 }
 0x159   : > { %v3863_v13 = vsel %vm3341_vm6, %v3860_v11, %v3862_v12  ;;  %v4379_v11 = vrot.slane %v4377_v62, 3 }
 0x15c   : > { %9384 = vmatmul.mubr.msk.bf16.gmra.mrb[4].mxu0 %vm571_vm2, %v3350_v9  ;;  %v10648_v9 = vld [vmem:[%s10958_s26 + $0x40] sm:$0xff]  }
 0x15d   : > { %9387 = vmatprep.mubr.msk.bf16.mxu0 %vm571_vm2, %v3352_v14  ;;  %v10682_v14 = vld [vmem:[%s10958_s26 + $0x10] sm:$0xff]   ;;  %v3864_v25 = vrot.slane %v10648_v9, 2  ;;  %v10708_v9 = vld [vmem:[%s10958_s26 + $0x78] sm:$0xff]  }
 0x15e   : > { %9193 = vmatprep.mubr.msk.bf16.mxu1 %vm571_vm2, %v10682_v14 }
 0x15f   : > { %9194 = vmatmul.mubr.msk.bf16.gmra.mrb[4].mxu1 %vm571_vm2, %v10683_v15  ;;  %v4372_v15 = vor.u32 %v4371_v7, %v4368_v5  ;;  %v10672_v7 = vld [vmem:[%s10958_s26 + $0x68] sm:$0xff]  }
 0x160   : > { %9197 = vmatprep.mubr.msk.bf16.mxu1 %vm571_vm2, %v10687_v20  ;;  %v10665_v20 = vld [vmem:[%s10958_s26 + $0x30] sm:$0xff]  }
 0x164   : > { %9388 = vmatmul.mubr.msk.bf16.gmra.mrb[8].mxu0 %vm571_vm2, %v3354_v16  ;;  %v3865_v16 = vsel %vm3341_vm6, %v3862_v12, %v3864_v25  ;;  %v10664_v12 = vld [vmem:[%s10958_s26 + $0x28] sm:$0xff]  }
 0x165   : > { %9391 = vmatprep.mubr.msk.bf16.mxu0 %vm571_vm2, %v3356_v18 }
 0x167   : > { %9198 = vmatmul.mubr.msk.bf16.gmra.mrb[8].mxu1 %vm571_vm2, %v10688_v21 }
 0x16c   : > { %9392 = vmatmul.mubr.msk.bf16.gmra.mrb[12].mxu0 %vm571_vm2, %v3358_v22  ;;  %v3868_v22 = vrot.slane %v10650_v17, 2 }
 0x16d   : > { %9395 = vmatprep.mubr.msk.bf16.mxu0 %vm571_vm2, %v3360_v24 }
 0x16e   : > { %v3871_v27 = vsel %vm3341_vm6, %v3868_v22, %v3870_v23 }
 0x174   : > { %9396 = vmatmul.mubr.msk.bf16.gmra.mrb[16].mxu0 %vm571_vm2, %v3362_v29  ;;  %v10691_v29 = vld [vmem:[%s10958_s26 + $0x30] sm:$0xff]  }
 0x175   : > { %9399 = vmatprep.mubr.msk.bf16.mxu0 %vm571_vm2, %v3364_v32  ;;  %v3872_v32 = vrot.slane %v10652_v26, 2  ;;  %9201 = vmatprep.mubr.msk.bf16.mxu1 %vm571_vm2, %v10691_v29  ;;  %v10711_v26 = vld [vmem:[%s10958_s26 + $0x80] sm:$0xff]   ;;  %v4401_v29 = vshrl.u32 %v10665_v20, 16 }
 0x176   : > { %9202 = vmatmul.mubr.msk.bf16.gmra.mrb[12].mxu1 %vm571_vm2, %v10692_v31  ;;  %v4404_v31 = vshll.u32 %v10665_v20, 16 }
 0x177   : > { %v3873_v34 = vsel %vm3341_vm6, %v3870_v23, %v3872_v32 }
 0x178   : > { %v4406_v37 = vrot.slane %v4404_v31, 3 }
 0x17c   : > { %9400 = vmatmul.mubr.msk.bf16.gmra.mrb[20].mxu0 %vm571_vm2, %v3366_v36  ;;  %v3875_v36 = vsel %vm3341_vm6, %v3872_v32, %v3874_v33 }
 0x17d   : > { %9403 = vmatprep.mubr.msk.bf16.mxu0 %vm571_vm2, %v3368_v3  ;;  %v10695_v3 = vld [vmem:[%s10958_s26 + $0x40] sm:$0xff]  }
 0x17e   : > { %9205 = vmatprep.mubr.msk.bf16.mxu1 %vm571_vm2, %v10695_v3  ;;  %v10667_v3 = vld [vmem:[%s10958_s26 + $0x40] sm:$0xff]  }
 0x17f   : > { %9206 = vmatmul.mubr.msk.bf16.gmra.mrb[16].mxu1 %vm571_vm2, %v10696_v38  ;;  %v4422_v44 = vshll.u32 %v10667_v3, 16 }
 0x180   : > { %9209 = vmatprep.mubr.msk.bf16.mxu1 %vm571_vm2, %v10699_v45 }
 0x184   : > { %9404 = vmatmul.mubr.msk.bf16.gmra.mrb[24].mxu0 %vm571_vm2, %v3370_v41  ;;  %v3877_v41 = vsel %vm3341_vm6, %v3874_v33, %v3876_v39 }
 0x185   : > { %9407 = vmatprep.mubr.msk.bf16.mxu0 %vm571_vm2, %v3372_v43  ;;  %v3879_v43 = vsel %vm3341_vm6, %v3876_v39, %v3878_v40 }
 0x187   : > { %9210 = vmatmul.mubr.msk.bf16.gmra.mrb[20].mxu1 %vm571_vm2, %v10700_v46 }
 0x18c   : > { %9408 = vmatmul.mubr.msk.bf16.gmra.mrb[28].mxu0 %vm571_vm2, %v3374_v47  ;;  %v3880_v47 = vrot.slane %v10656_v42, 2 }
 0x18d   : > { %9411 = vmatprep.mubr.msk.bf16.mxu0 %vm571_vm2, %v3376_v49 }
 0x18e   : > { %v3881_v49 = vsel %vm3341_vm6, %v3878_v40, %v3880_v47  ;;  %v3883_v52 = vsel %vm3341_vm6, %v3880_v47, %v3882_v48 }
 0x194   : > { %9412 = vmatmul.mubr.msk.bf16.gmra.mrb[32].mxu0 %vm571_vm2, %v3378_v55  ;;  %v10703_v55 = vld [vmem:[%s10958_s26 + $0x60] sm:$0xff]  }
 0x195   : > { %9417 = vmatprep.mubr.msk.bf16.mxu0 %vm571_vm2, %v3855_v57  ;;  %v3884_v57 = vrot.slane %v10658_v50, 2  ;;  %9213 = vmatprep.mubr.msk.bf16.mxu1 %vm571_vm2, %v10703_v55  ;;  %v4424_v50 = vrot.slane %v4422_v44, 3  ;;  %v10670_v55 = vld [vmem:[%s10958_s26 + $0x58] sm:$0xff]  }
 0x196   : > { %9214 = vmatmul.mubr.msk.bf16.gmra.mrb[24].mxu1 %vm571_vm2, %v10704_v56  ;;  %v4437_v56 = vshrl.u32 %v10669_v51, 16  ;;  %v4446_v59 = vshrl.u32 %v10670_v55, 16  ;;  %v4449_v60 = vshll.u32 %v10670_v55, 16 }
 0x197   : > { %v3885_v63 = vsel %vm3341_vm6, %v3882_v48, %v3884_v57 }
 0x198   : > { %v4439_v62 = vrot.slane %v4437_v56, 2  ;;  %v4451_v5 = vrot.slane %v4449_v60, 3 }
 0x19c   : > { %9418 = vmatmul.mubr.msk.bf16.vlgmr.msra.gmra.mrb[0].mxu0 %vm571_vm2, %v3857_v0  ;;  %v3887_v0 = vsel %vm3341_vm6, %v3884_v57, %v3886_v58  ;;  %v4440_v57 = vshll.u32 %v10669_v51, 16 }
 0x19d   : > { %9454 = vmatpush3.bf16.msra.mxu0 %v11225_v10  ;;  %9421 = vmatprep.mubr.msk.bf16.mxu0 %vm571_vm2, %v3859_v2  ;;  %v10649_v10 = vld [vmem:[%s10958_s26 + $0x48] sm:$0xff]   ;;  %v10663_v2 = vld [vmem:[%s10958_s26 + $0x20] sm:$0xff]  }
 0x19e   : > { %9491 = vmatprep.subr.bf16.mxu0 %v11292_v6  ;;  %v3866_v30 = vrot.slane %v10649_v10, 2  ;;  %v4383_v10 = vshrl.u32 %v10663_v2, 16  ;;  %v4386_v14 = vshll.u32 %v10663_v2, 16  ;;  %v4448_v2 = vrot.slane %v4446_v59, 2 }
 0x1a0   : > { %v3867_v18 = vsel %vm3341_vm6, %v3864_v25, %v3866_v30  ;;  %v3869_v24 = vsel %vm3341_vm6, %v3866_v30, %v3868_v22  ;;  %v4380_v25 = vor.u32 %v4379_v11, %v4376_v8  ;;  %v4392_v30 = vshrl.u32 %v10664_v12, 16 }
 0x1a1   : > { %v4388_v19 = vrot.slane %v4386_v14, 3 }
 0x1a2   : > { %v4381_v21 = vsel %vm4364_vm7, %v4372_v15, %v4380_v25  ;;  %v4394_v22 = vrot.slane %v4392_v30, 2 }
 0x1a4   : > { %9422 = vmatmul.mubr.msk.bf16.gmra.mrb[4].mxu0 %vm571_vm2, %v3861_v4  ;;  %v10707_v4 = vld [vmem:[%s10958_s26 + $0x70] sm:$0xff]  }
 0x1a5   : > { %9425 = vmatprep.mubr.msk.bf16.mxu0 %vm571_vm2, %v3863_v13  ;;  %v3888_v13 = vrot.slane %v10660_v1, 2  ;;  %9217 = vmatprep.mubr.msk.bf16.mxu1 %vm571_vm2, %v10707_v4  ;;  %v4452_v4 = vor.u32 %v4451_v5, %v4448_v2 }
 0x1a6   : > { %9218 = vmatmul.mubr.msk.bf16.gmra.mrb[28].mxu1 %vm571_vm2, %v10708_v9  ;;  %v4464_v9 = vshrl.u32 %v10672_v7, 16 }
 0x1a7   : > { %v3889_v17 = vsel %vm3341_vm6, %v3886_v58, %v3888_v13  ;;  %9221 = vmatprep.mubr.msk.bf16.mxu1 %vm571_vm2, %v10711_v26  ;;  %v4467_v13 = vshll.u32 %v10672_v7, 16  ;;  %v12390_v26 = vmov 0.0  }
 0x1a8   : > { %9529 = vmatprep.subr.bf16.mxu1 %v12390_v26  ;;  %5569 = vst.msk [vmem:[#allocation4] sm:$0xff] %vm5568_vm9, %v12390_v26  ;;  %5570 = vst.msk [vmem:[#allocation4 + $0x8] sm:$0xff] %vm5568_vm9, %v12390_v26 }
 0x1a9   : > { %5571 = vst.msk [vmem:[#allocation4 + $0x10] sm:$0xff] %vm5568_vm9, %v12390_v26  ;;  %5572 = vst.msk [vmem:[#allocation4 + $0x18] sm:$0xff] %vm5568_vm9, %v12390_v26 }
 0x1aa   : > { %5573 = vst.msk [vmem:[#allocation4 + $0x20] sm:$0xff] %vm5568_vm9, %v12390_v26  ;;  %5574 = vst.msk [vmem:[#allocation4 + $0x28] sm:$0xff] %vm5568_vm9, %v12390_v26 }
 0x1ab   : > { %5575 = vst.msk [vmem:[#allocation4 + $0x30] sm:$0xff] %vm5568_vm9, %v12390_v26  ;;  %5576 = vst.msk [vmem:[#allocation4 + $0x38] sm:$0xff] %vm5568_vm9, %v12390_v26 }
 0x1ac   : > { %9426 = vmatmul.mubr.msk.bf16.gmra.mrb[8].mxu0 %vm571_vm2, %v3865_v16  ;;  %v4395_v16 = vshll.u32 %v10664_v12, 16  ;;  %5577 = vst.msk [vmem:[#allocation4 + $0x40] sm:$0xff] %vm5568_vm9, %v12390_v26  ;;  %5578 = vst.msk [vmem:[#allocation4 + $0x48] sm:$0xff] %vm5568_vm9, %v12390_v26 }
 0x1ad   : > { %9429 = vmatprep.mubr.msk.bf16.mxu0 %vm571_vm2, %v3867_v18  ;;  %v4385_v18 = vrot.slane %v4383_v10, 2  ;;  %5579 = vst.msk [vmem:[#allocation4 + $0x50] sm:$0xff] %vm5568_vm9, %v12390_v26  ;;  %5580 = vst.msk [vmem:[#allocation4 + $0x58] sm:$0xff] %vm5568_vm9, %v12390_v26 }
 0x1ae   : > { %v4397_v23 = vrot.slane %v4395_v16, 3  ;;  %v4466_v16 = vrot.slane %v4464_v9, 2  ;;  %5581 = vst.msk [vmem:[#allocation4 + $0x60] sm:$0xff] %vm5568_vm9, %v12390_v26  ;;  %6964 = vst.msk [vmem:[#allocation5] sm:$0xff] %vm5568_vm9, %v12390_v26 }
 0x1af   : > { %v4389_v28 = vor.u32 %v4388_v19, %v4385_v18  ;;  %v10674_v18 = vld [vmem:[%s10958_s26 + $0x78] sm:$0xff]   ;;  %6965 = vst.msk [vmem:[#allocation5 + $0x8] sm:$0xff] %vm5568_vm9, %v12390_v26  ;;  %6966 = vst.msk [vmem:[#allocation5 + $0x10] sm:$0xff] %vm5568_vm9, %v12390_v26 }
 0x1b0   : > { %v4398_v32 = vor.u32 %v4397_v23, %v4394_v22  ;;  %v4482_v23 = vshrl.u32 %v10674_v18, 16  ;;  %6967 = vst.msk [vmem:[#allocation5 + $0x18] sm:$0xff] %vm5568_vm9, %v12390_v26  ;;  %6968 = vst.msk [vmem:[#allocation5 + $0x20] sm:$0xff] %vm5568_vm9, %v12390_v26 }
 0x1b1   : > { %v4390_v35 = vsel %vm4364_vm7, %v4380_v25, %v4389_v28  ;;  %v10673_v25 = vld [vmem:[%s10958_s26 + $0x70] sm:$0xff]  }
 0x1b2   : > { %v4399_v38 = vsel %vm4364_vm7, %v4389_v28, %v4398_v32  ;;  %v4473_v20 = vshrl.u32 %v10673_v25, 16 }
 0x1b4   : > { %9430 = vmatmul.mubr.msk.bf16.gmra.mrb[12].mxu0 %vm571_vm2, %v3869_v24  ;;  %v10666_v24 = vld [vmem:[%s10958_s26 + $0x38] sm:$0xff]  }
 0x1b5   : > { %9433 = vmatprep.mubr.msk.bf16.mxu0 %vm571_vm2, %v3871_v27  ;;  %v10712_v27 = vld [vmem:[%s10958_s26 + $0x88] sm:$0xff]   ;;  %v4410_v33 = vshrl.u32 %v10666_v24, 16 }
 0x1b6   : > { %9222 = vmatmul.mubr.msk.bf16.gmra.mrb[32].mxu1 %vm571_vm2, %v10712_v27  ;;  %v10717_v27 = vld [vmem:[%s12382_s4] sm:$0xff]  }
 0x1b7   : > { %v4412_v39 = vrot.slane %v4410_v33, 2  ;;  %9530 = vmatpush3.bf16.msra.mxu1 %v10717_v27  ;;  %9531 = vmatprep.mubr.msk.bf16.mxu1 %vm10829_vm10, %v12390_v26 }
 0x1b8   : > { %9551 = vmatprep.subr.bf16.mxu1 %v12390_v26 }
 0x1bc   : > { %9434 = vmatmul.mubr.msk.bf16.gmra.mrb[16].mxu0 %vm571_vm2, %v3873_v34  ;;  %v4413_v34 = vshll.u32 %v10666_v24, 16  ;;  %v4485_v24 = vshll.u32 %v10674_v18, 16  ;;  %v10690_v18 = vld [vmem:[%s10958_s26 + $0x30] sm:$0xff]  }
 0x1bd   : > { %9437 = vmatprep.mubr.msk.bf16.mxu0 %vm571_vm2, %v3875_v36  ;;  %v4403_v36 = vrot.slane %v4401_v29, 2  ;;  %v4475_v29 = vrot.slane %v4473_v20, 2  ;;  %v10693_v20 = vld [vmem:[%s10958_s26 + $0x38] sm:$0xff]  }
 0x1be   : > { %v4415_v40 = vrot.slane %v4413_v34, 3  ;;  %v4484_v34 = vrot.slane %v4482_v23, 2 }
 0x1bf   : > { %v4407_v42 = vor.u32 %v4406_v37, %v4403_v36  ;;  %v10676_v36 = vld [vmem:[%s10958_s26 + $0x88] sm:$0xff]  }
 0x1c0   : > { %v4416_v45 = vor.u32 %v4415_v40, %v4412_v39  ;;  %v4500_v40 = vshrl.u32 %v10676_v36, 16 }
 0x1c1   : > { %v4408_v48 = vsel %vm4364_vm7, %v4398_v32, %v4407_v42  ;;  %v10675_v32 = vld [vmem:[%s10958_s26 + $0x80] sm:$0xff]  }
 0x1c4   : > { %9438 = vmatmul.mubr.msk.bf16.gmra.mrb[20].mxu0 %vm571_vm2, %v3877_v41  ;;  %v10668_v41 = vld [vmem:[%s10958_s26 + $0x48] sm:$0xff]  }
 0x1c5   : > { %9441 = vmatprep.mubr.msk.bf16.mxu0 %vm571_vm2, %v3879_v43  ;;  %v4419_v43 = vshrl.u32 %v10667_v3, 16  ;;  %v4428_v46 = vshrl.u32 %v10668_v41, 16  ;;  %v4431_v47 = vshll.u32 %v10668_v41, 16  ;;  %v4491_v3 = vshrl.u32 %v10675_v32, 16 }
 0x1c6   : > { %v4503_v41 = vshll.u32 %v10676_v36, 16 }
 0x1c7   : > { %v4430_v53 = vrot.slane %v4428_v46, 2  ;;  %v4433_v54 = vrot.slane %v4431_v47, 3  ;;  %v4502_v47 = vrot.slane %v4500_v40, 2  ;;  %v10705_v40 = vld [vmem:[%s10958_s26 + $0x68] sm:$0xff]  }
 0x1c9   : > { %v4434_v58 = vor.u32 %v4433_v54, %v4430_v53 }
 0x1cc   : > { %9442 = vmatmul.mubr.msk.bf16.gmra.mrb[24].mxu0 %vm571_vm2, %v3881_v49  ;;  %v4421_v49 = vrot.slane %v4419_v43, 2  ;;  %v4493_v43 = vrot.slane %v4491_v3, 2 }
 0x1cd   : > { %9445 = vmatprep.mubr.msk.bf16.mxu0 %vm571_vm2, %v3883_v52  ;;  %v4417_v52 = vsel %vm4364_vm7, %v4407_v42, %v4416_v45 }
 0x1d4   : > { %9446 = vmatmul.mubr.msk.bf16.gmra.mrb[28].mxu0 %vm571_vm2, %v3885_v63  ;;  %v4442_v63 = vrot.slane %v4440_v57, 3 }
 0x1d5   : > { %9449 = vmatprep.mubr.msk.bf16.mxu0 %vm571_vm2, %v3887_v0  ;;  %v10671_v0 = vld [vmem:[%s10958_s26 + $0x60] sm:$0xff]  }
 0x1d6   : > { %v4443_v8 = vor.u32 %v4442_v63, %v4439_v62  ;;  %v4455_v11 = vshrl.u32 %v10671_v0, 16  ;;  %v4458_v12 = vshll.u32 %v10671_v0, 16 }
 0x1d8   : > { %v4444_v10 = vsel %vm4364_vm7, %v4434_v58, %v4443_v8  ;;  %v4457_v14 = vrot.slane %v4455_v11, 2  ;;  %v4460_v15 = vrot.slane %v4458_v12, 3  ;;  %v4453_v30 = vsel %vm4364_vm7, %v4443_v8, %v4452_v4  ;;  %v10684_v11 = vld [vmem:[%s10958_s26 + $0x10] sm:$0xf8]   ;;  %v10685_v12 = vld [vmem:[%s10958_s26 + $0x18] sm:$0xff]  }
 0x1d9   : > { %v5010_v9 = vrot.slane %v10684_v11, 3 }
 0x1da   : > { %v4461_v19 = vor.u32 %v4460_v15, %v4457_v14  ;;  %v10686_v14 = vld [vmem:[%s10958_s26 + $0x20] sm:$0xff]  }
 0x1dc   : > { %9450 = vmatmul.mubr.msk.bf16.gmra.mrb[32].mxu0 %vm571_vm2, %v3889_v17  ;;  %v4469_v17 = vrot.slane %v4467_v13, 3  ;;  %v4462_v28 = vsel %vm4364_vm7, %v4452_v4, %v4461_v19  ;;  %v5011_v13 = vrot.slane %v10685_v12, 3 }
 0x1dd   : > { %9455 = vmatprep.mubr.msk.bf16.mxu0 %vm571_vm2, %v4381_v21  ;;  %v4476_v21 = vshll.u32 %v10673_v25, 16  ;;  %v10689_v25 = vld [vmem:[%s10958_s26 + $0x28] sm:$0xff]  }
 0x1de   : > { %v4470_v22 = vor.u32 %v4469_v17, %v4466_v16  ;;  %v5012_v15 = vsel %vm5009_vm8, %v5010_v9, %v5011_v13  ;;  %v5015_v16 = vrot.slane %v10689_v25, 3 }
 0x1df   : > { %v4478_v31 = vrot.slane %v4476_v21, 3  ;;  %v5017_v21 = vrot.slane %v10690_v18, 3 }
 0x1e0   : > { %v4471_v33 = vsel %vm4364_vm7, %v4461_v19, %v4470_v22 }
 0x1e1   : > { %v4479_v37 = vor.u32 %v4478_v31, %v4475_v29  ;;  %v5018_v23 = vsel %vm5009_vm8, %v5015_v16, %v5017_v21 }
 0x1e3   : > { %v4480_v42 = vsel %vm4364_vm7, %v4470_v22, %v4479_v37  ;;  %v5019_v22 = vrot.slane %v10693_v20, 3 }
 0x1e4   : > { %9456 = vmatmul.mubr.msk.bf16.vlgmr.msra.gmra.mrb[0].mxu0 %vm571_vm2, %v4390_v35  ;;  %v4487_v35 = vrot.slane %v4485_v24, 3  ;;  %v10694_v24 = vld [vmem:[%s10958_s26 + $0x40] sm:$0xff]  }
 0x1e5   : > { %9492 = vmatpush3.bf16.msra.mxu0 %v11292_v6  ;;  %9459 = vmatprep.mubr.msk.bf16.mxu0 %vm571_vm2, %v4399_v38  ;;  %v4425_v6 = vor.u32 %v4424_v50, %v4421_v49  ;;  %v4494_v38 = vshll.u32 %v10675_v32, 16  ;;  %v10680_v49 = vld [vmem:[%s10958_s26 + $0x98] sm:$0xff]   ;;  %v5020_v27 = vsel %vm5009_vm8, %v5017_v21, %v5019_v22  ;;  %v5021_v29 = vrot.slane %v10694_v24, 3 }
 0x1e6   : > { %v4488_v39 = vor.u32 %v4487_v35, %v4484_v34  ;;  %v4518_v54 = vshrl.u32 %v10680_v49, 16  ;;  %v4521_v55 = vshll.u32 %v10680_v49, 16  ;;  %v10701_v35 = vld [vmem:[%s10958_s26 + $0x58] sm:$0xff]  }
 0x1e7   : > { %v4426_v61 = vsel %vm4364_vm7, %v4416_v45, %v4425_v6  ;;  %v4435_v1 = vsel %vm4364_vm7, %v4425_v6, %v4434_v58  ;;  %v4496_v44 = vrot.slane %v4494_v38, 3  ;;  %v10677_v45 = vld [vmem:[%s10958_s26 + $0x90] sm:$0xff]   ;;  %v10681_v58 = vld [vmem:[%s10958_s26 + $0xa0] ss:$0 sps:$4 sm:$0x77]   ;;  %v5022_v32 = vsel %vm5009_vm8, %v5019_v22, %v5021_v29 }
 0x1e8   : > { %v4489_v46 = vsel %vm4364_vm7, %v4479_v37, %v4488_v39  ;;  %v4509_v51 = vshrl.u32 %v10677_v45, 16  ;;  %v4520_v60 = vrot.slane %v4518_v54, 2  ;;  %v4527_v63 = vshrl.u32 %v10681_v58, 16  ;;  %v10702_v38 = vld [vmem:[%s10958_s26 + $0x60] sm:$0xff]  }
 0x1e9   : > { %v4497_v50 = vor.u32 %v4496_v44, %v4493_v43  ;;  %v4530_v0 = vshll.u32 %v10681_v58, 16  ;;  %v5027_v37 = vrot.slane %v10701_v35, 3  ;;  %v10706_v44 = vld [vmem:[%s10958_s26 + $0x70] sm:$0xff]  }
 0x1ea   : > { %v4511_v56 = vrot.slane %v4509_v51, 2  ;;  %v4529_v5 = vrot.slane %v4527_v63, 2 }
 0x1eb   : > { %v4498_v6 = vsel %vm4364_vm7, %v4488_v39, %v4497_v50  ;;  %v4532_v7 = vrot.slane %v4530_v0, 3 }
 0x1ec   : > { %9460 = vmatmul.mubr.msk.bf16.gmra.mrb[4].mxu0 %vm571_vm2, %v4408_v48  ;;  %v4505_v48 = vrot.slane %v4503_v41, 3  ;;  %v5029_v41 = vrot.slane %v10702_v38, 3 }
 0x1ed   : > { %9463 = vmatprep.mubr.msk.bf16.mxu0 %vm571_vm2, %v4417_v52  ;;  %v4512_v52 = vshll.u32 %v10677_v45, 16  ;;  %v4533_v4 = vor.u32 %v4532_v7, %v4529_v5 }
 0x1ee   : > { %v4506_v53 = vor.u32 %v4505_v48, %v4502_v47  ;;  %v5030_v43 = vsel %vm5009_vm8, %v5027_v37, %v5029_v41  ;;  %v5033_v47 = vrot.slane %v10706_v44, 3  ;;  %v11615_v44 = vld [vmem:[#allocation4 + $0x5e] sm:$0xff] }
 0x1ef   : > { %v4514_v57 = vrot.slane %v4512_v52, 3  ;;  %v10713_v52 = vld [vmem:[%s10958_s26 + $0x88] sm:$0xff]   ;;  %12395 = vst [vmem:[#allocation12_spill] sm:$0xff] %v11615_v44 }
 0x1f0   : > { %v4507_v59 = vsel %vm4364_vm7, %v4497_v50, %v4506_v53  ;;  %v10710_v50 = vld [vmem:[%s10958_s26 + $0x80] sm:$0xff]   ;;  %v5039_v54 = vrot.slane %v10713_v52, 3 }
 0x1f1   : > { %v4515_v62 = vor.u32 %v4514_v57, %v4511_v56  ;;  %v10715_v57 = vld [vmem:[%s10958_s26 + $0x98] sm:$0xff]  }
 0x1f3   : > { %v4516_v2 = vsel %vm4364_vm7, %v4506_v53, %v4515_v62  ;;  %v5037_v53 = vrot.slane %v10710_v50, 3 }
 0x1f4   : > { %9464 = vmatmul.mubr.msk.bf16.gmra.mrb[8].mxu0 %vm571_vm2, %v4426_v61  ;;  %v4523_v61 = vrot.slane %v4521_v55, 3 }
 0x1f5   : > { %9467 = vmatprep.mubr.msk.bf16.mxu0 %vm571_vm2, %v4435_v1  ;;  %v5040_v56 = vsel %vm5009_vm8, %v5037_v53, %v5039_v54 }
 0x1f6   : > { %v4524_v1 = vor.u32 %v4523_v61, %v4520_v60  ;;  %v10716_v61 = vld [vmem:[%s10958_s26 + $0xa0] ss:$0 sps:$4 sm:$0x77]  }
 0x1f7   : > { %v5045_v63 = vrot.slane %v10716_v61, 3 }
 0x1f8   : > { %v4525_v8 = vsel %vm4364_vm7, %v4515_v62, %v4524_v1 }
 0x1fc   : > { %9468 = vmatmul.mubr.msk.bf16.gmra.mrb[12].mxu0 %vm571_vm2, %v4444_v10  ;;  %v4534_v10 = vsel %vm4364_vm7, %v4524_v1, %v4533_v4 }
 0x1fd   : > { %9471 = vmatprep.mubr.msk.bf16.mxu0 %vm571_vm2, %v4453_v30  ;;  %v5013_v30 = vrot.slane %v10686_v14, 3 }
 0x1ff   : > { %v5014_v17 = vsel %vm5009_vm8, %v5011_v13, %v5013_v30  ;;  %v5016_v19 = vsel %vm5009_vm8, %v5013_v30, %v5015_v16 }
 0x204   : > { %9472 = vmatmul.mubr.msk.bf16.gmra.mrb[16].mxu0 %vm571_vm2, %v4462_v28  ;;  %v10697_v28 = vld [vmem:[%s10958_s26 + $0x48] sm:$0xff]  }
 0x205   : > { %9475 = vmatprep.mubr.msk.bf16.mxu0 %vm571_vm2, %v4471_v33  ;;  %v5023_v31 = vrot.slane %v10697_v28, 3  ;;  %v10698_v33 = vld [vmem:[%s10958_s26 + $0x50] sm:$0xff]  }
 0x206   : > { %v5025_v36 = vrot.slane %v10698_v33, 3 }
 0x207   : > { %v5024_v34 = vsel %vm5009_vm8, %v5021_v29, %v5023_v31  ;;  %v11581_v29 = vld [vmem:[#allocation4] sm:$0xff] }
 0x208   : > { %v5026_v3 = vsel %vm5009_vm8, %v5023_v31, %v5025_v36  ;;  %v5028_v39 = vsel %vm5009_vm8, %v5025_v36, %v5027_v37  ;;  %v11583_v31 = vld [vmem:[#allocation4 + $0x1] sm:$0xff] }
 0x20c   : > { %9476 = vmatmul.mubr.msk.bf16.gmra.mrb[20].mxu0 %vm571_vm2, %v4480_v42  ;;  %v5031_v42 = vrot.slane %v10705_v40, 3 }
 0x20d   : > { %9479 = vmatprep.mubr.msk.bf16.mxu0 %vm571_vm2, %v4489_v46  ;;  %v10709_v46 = vld [vmem:[%s10958_s26 + $0x78] sm:$0xff]  }
 0x20e   : > { %v5032_v45 = vsel %vm5009_vm8, %v5029_v41, %v5031_v42  ;;  %v5035_v48 = vrot.slane %v10709_v46, 3  ;;  %v5034_v49 = vsel %vm5009_vm8, %v5031_v42, %v5033_v47  ;;  %v11611_v42 = vld [vmem:[#allocation4 + $0x5c] sm:$0xff] }
 0x210   : > { %v5036_v51 = vsel %vm5009_vm8, %v5033_v47, %v5035_v48  ;;  %v5038_v55 = vsel %vm5009_vm8, %v5035_v48, %v5037_v53 }
 0x214   : > { %9480 = vmatmul.mubr.msk.bf16.gmra.mrb[24].mxu0 %vm571_vm2, %v4498_v6  ;;  %v10714_v6 = vld [vmem:[%s10958_s26 + $0x90] sm:$0xff]   ;;  %s8912_s26 = sshll.u32 %s10915_s25, 4  ;;  %s10760_s25 = scalar_lea.vmem %s12338_s19, 16 }
 0x215   : > { %9483 = vmatprep.mubr.msk.bf16.mxu0 %vm571_vm2, %v4507_v59  ;;  %v5041_v58 = vrot.slane %v10714_v6, 3  ;;  %v5043_v59 = vrot.slane %v10715_v57, 3  ;;  %s12336_s28 = scalar_lea.hbm %s12389_s11, %s8912_s26  ;;  %p10761_p2 = scmp.ne.s32.totalorder %s12338_s19, %s10760_s25 }
 0x217   : > { %v5042_v60 = vsel %vm5009_vm8, %v5039_v54, %v5041_v58  ;;  %v5044_v62 = vsel %vm5009_vm8, %v5041_v58, %v5043_v59  ;;  %v5046_v0 = vsel %vm5009_vm8, %v5043_v59, %v5045_v63  ;;  %p10762_p3 = pnand %p10761_p2, %p10932_p10 }
 0x219   : > { %p10763_p4 = pneg %p10762_p3 }
 0x21c   : > { %9484 = vmatmul.mubr.msk.bf16.gmra.mrb[28].mxu0 %vm571_vm2, %v4516_v2 }
 0x21d   : > { %9487 = vmatprep.mubr.msk.bf16.mxu0 %vm571_vm2, %v4525_v8 }
 0x224   : > { %9488 = vmatmul.mubr.msk.bf16.gmra.mrb[32].mxu0 %vm571_vm2, %v4534_v10 }
 0x225   : > { %9493 = vmatprep.mubr.msk.bf16.mxu0 %vm571_vm2, %v5012_v15 }
 0x22a   : > { %v11493_v1 = vpop.f32.mrb[0].mxu1 }
 0x22b   : > { %v11495_v2 = vpop.f32.mrb[1].mxu1 }
 0x22c   : > { %9494 = vmatmul.mubr.msk.bf16.vlgmr.msra.gmra.mrb[0].mxu0 %vm571_vm2, %v5014_v17  ;;  %v11497_v5 = vpop.f32.mrb[2].mxu1 }
 0x22d   : > { %9497 = vmatprep.mubr.msk.bf16.mxu0 %vm571_vm2, %v5016_v19  ;;  %v11499_v7 = vpop.f32.mrb[3].mxu1 }
 0x232   : > { %v11501_v8 = vpop.f32.mrb[4].mxu1 }
 0x233   : > { %v11503_v11 = vpop.f32.mrb[5].mxu1 }
 0x234   : > { %9498 = vmatmul.mubr.msk.bf16.gmra.mrb[4].mxu0 %vm571_vm2, %v5018_v23  ;;  %v11505_v12 = vpop.f32.mrb[6].mxu1 }
 0x235   : > { %9501 = vmatprep.mubr.msk.bf16.mxu0 %vm571_vm2, %v5020_v27  ;;  %v11507_v4 = vpop.f32.mrb[7].mxu1 }
 0x23a   : > { %v11509_v9 = vpop.f32.mrb[8].mxu1 }
 0x23b   : > { %v11511_v13 = vpop.f32.mrb[9].mxu1 }
 0x23c   : > { %9502 = vmatmul.mubr.msk.bf16.gmra.mrb[8].mxu0 %vm571_vm2, %v5022_v32  ;;  %v11513_v10 = vpop.f32.mrb[10].mxu1  ;;  %v11585_v32 = vld [vmem:[#allocation4 + $0x2] sm:$0xff] }
 0x23d   : > { %9505 = vmatprep.mubr.msk.bf16.mxu0 %vm571_vm2, %v5024_v34  ;;  %v11515_v14 = vpop.f32.mrb[11].mxu1  ;;  %7713 = vst.msk [vmem:[#allocation4] sm:$0xff] %vm5568_vm9, %v12390_v26 }
 0x244   : > { %9506 = vmatmul.mubr.msk.bf16.gmra.mrb[12].mxu0 %vm571_vm2, %v5026_v3 }
 0x245   : > { %9509 = vmatprep.mubr.msk.bf16.mxu0 %vm571_vm2, %v5028_v39 }
 0x249   : > { %v11517_v15 = vpop.f32.mrb[12].mxu1 }
 0x24a   : > { %v11519_v25 = vpop.f32.mrb[13].mxu1 }
 0x24b   : > { %v11521_v30 = vpop.f32.mrb[14].mxu1 }
 0x24c   : > { %9510 = vmatmul.mubr.msk.bf16.gmra.mrb[16].mxu0 %vm571_vm2, %v5030_v43  ;;  %v11523_v16 = vpop.f32.mrb[15].mxu1  ;;  %v11613_v43 = vld [vmem:[#allocation4 + $0x5d] sm:$0xff] }
 0x24d   : > { %9513 = vmatprep.mubr.msk.bf16.mxu0 %vm571_vm2, %v5032_v45  ;;  %7725 = vst.msk [vmem:[#allocation4 + $0x60] sm:$0xff] %vm5568_vm9, %v12390_v26  ;;  %v11622_v45 = vld [vmem:[%s12381_s3] ss:$0 sm:$0xff] }
 0x24e   : > { %v812_v46 = vadd.f32 %v11493_v1, %v11622_v45  ;;  %v810_v47 = vadd.f32 %v11622_v45, %v11495_v2  ;;  %v811_v52 = vadd.f32 %v11622_v45, %v11499_v7  ;;  %v816_v59 = vadd.f32 %v11501_v8, %v11622_v45 }
 0x24f   : > { %v814_v61 = vadd.f32 %v11622_v45, %v11503_v11 }
 0x252   : > { %v11525_v17 = vpop.f32.mrb[16].mxu1 }
 0x253   : > { %v11527_v18 = vpop.f32.mrb[17].mxu1 }
 0x254   : > { %9514 = vmatmul.mubr.msk.bf16.gmra.mrb[20].mxu0 %vm571_vm2, %v5034_v49  ;;  %v11529_v19 = vpop.f32.mrb[18].mxu1  ;;  %v813_v49 = vadd.f32 %v11497_v5, %v11622_v45  ;;  %v815_v5 = vadd.f32 %v11622_v45, %v11507_v4  ;;  %v818_v4 = vadd.f32 %v11622_v45, %v11511_v13  ;;  %v821_v13 = vadd.f32 %v11513_v10, %v11622_v45 }
 0x255   : > { %9517 = vmatprep.mubr.msk.bf16.mxu0 %vm571_vm2, %v5036_v51  ;;  %v11531_v20 = vpop.f32.mrb[19].mxu1  ;;  %v822_v10 = vadd.f32 %v11622_v45, %v11519_v25  ;;  %v825_v25 = vadd.f32 %v11521_v30, %v11622_v45 }
 0x25a   : > { %v11533_v21 = vpop.f32.mrb[20].mxu1 }
 0x25b   : > { %v11571_v22 = vpop.f32.mrb[21].mxu1 }
 0x25c   : > { %9518 = vmatmul.mubr.msk.bf16.gmra.mrb[24].mxu0 %vm571_vm2, %v5038_v55  ;;  %v11573_v23 = vpop.f32.mrb[22].mxu1 }
 0x25d   : > { %9521 = vmatprep.mubr.msk.bf16.mxu0 %vm571_vm2, %v5040_v56  ;;  %v11575_v24 = vpop.f32.mrb[23].mxu1 }
 0x264   : > { %9522 = vmatmul.mubr.msk.bf16.gmra.mrb[28].mxu0 %vm571_vm2, %v5042_v60 }
 0x265   : > { %9525 = vmatprep.mubr.msk.bf16.mxu0 %vm571_vm2, %v5044_v62 }
 0x269   : > { %v11577_v27 = vpop.f32.mrb[24].mxu1 }
 0x26a   : > { %v11579_v28 = vpop.f32.mrb[25].mxu1 }
 0x26b   : > { %v11587_v33 = vpop.f32.mrb[26].mxu1 }
 0x26c   : > { %9526 = vmatmul.mubr.msk.bf16.gmra.mrb[32].mxu0 %vm571_vm2, %v5046_v0  ;;  %v11593_v34 = vpop.f32.mrb[27].mxu1  ;;  %v817_v0 = vadd.f32 %v11505_v12, %v11622_v45  ;;  %v820_v12 = vadd.f32 %v11509_v9, %v11622_v45 }
 0x279   : > { %v11595_v35 = vpop.f32.mrb[28].mxu1 }
 0x27a   : > { %v11597_v36 = vpop.f32.mrb[29].mxu1 }
 0x27b   : > { %v11599_v37 = vpop.f32.mrb[30].mxu1 }
 0x27c   : > { %v11601_v3 = vpop.f32.mrb[31].mxu1 }
 0x289   : > { %v11603_v38 = vpop.f32.mrb[32].mxu1 }
 0x28a   : > { %v11605_v39 = vpop.f32.mrb[33].mxu1 }
 0x28b   : > { %v11607_v40 = vpop.f32.mrb[34].mxu1 }
 0x28c   : > { %v11609_v41 = vpop.f32.mrb[35].mxu1 }
 0x2ff   : > { %v9495_v48 = vpop.f32.mrb[0].mxu0 }
 0x300   : > { %v9844_v50 = vadd.f32 %v9495_v48, %v812_v46  ;;  %v5138_v51 = vpop.f32.mrb[1].mxu0 }
 0x301   : > { %v9848_v53 = vadd.f32 %v5138_v51, %v810_v47  ;;  %v9496_v54 = vpop.f32.mrb[2].mxu0 }
 0x302   : > { %v5391_v55 = vmax.f32 %v9844_v50, 0.0  ;;  %v9852_v6 = vadd.f32 %v9496_v54, %v813_v49  ;;  %v5141_v56 = vpop.f32.mrb[3].mxu0  ;;  %v11643_v50 = vld [vmem:[%s12383_s5] ss:$0 sm:$0xff] }
 0x303   : > { %v5389_v57 = vmax.f32 %v9848_v53, 0.0  ;;  %v9856_v58 = vadd.f32 %v5141_v56, %v811_v52 }
 0x304   : > { %5427 = vst [vmem:[#allocation2 + $0x10] sm:$0xff] %v5391_v55  ;;  %v5392_v60 = vmax.f32 %v9852_v6, 0.0 }
 0x305   : > { %5425 = vst [vmem:[#allocation2] sm:$0xff] %v5389_v57  ;;  %v5390_v62 = vmax.f32 %v9856_v58, 0.0 }
 0x306   : > { %5428 = vst [vmem:[#allocation2 + $0x18] sm:$0xff] %v5392_v60 }
 0x307   : > { %5426 = vst [vmem:[#allocation2 + $0x8] sm:$0xff] %v5390_v62  ;;  %v9499_v63 = vpop.f32.mrb[4].mxu0 }
 0x308   : > { %v9860_v1 = vadd.f32 %v9499_v63, %v816_v59  ;;  %v5154_v2 = vpop.f32.mrb[5].mxu0  ;;  %v819_v59 = vadd.f32 %v11622_v45, %v11515_v14 }
 0x309   : > { %v9864_v7 = vadd.f32 %v5154_v2, %v814_v61  ;;  %v9500_v8 = vpop.f32.mrb[6].mxu0 }
 0x30a   : > { %v5395_v46 = vmax.f32 %v9860_v1, 0.0  ;;  %v9868_v47 = vadd.f32 %v9500_v8, %v817_v0  ;;  %v5157_v48 = vpop.f32.mrb[7].mxu0 }
 0x30b   : > { %v5393_v49 = vmax.f32 %v9864_v7, 0.0  ;;  %v9872_v11 = vadd.f32 %v5157_v48, %v815_v5  ;;  %v824_v5 = vadd.f32 %v11517_v15, %v11622_v45 }
 0x30c   : > { %5431 = vst [vmem:[#allocation2 + $0x30] sm:$0xff] %v5395_v46  ;;  %v5396_v51 = vmax.f32 %v9868_v47, 0.0 }
 0x30d   : > { %v5463_v52 = vld [vmem:[#allocation2 + $0x10] ss:$2 sm:$0xff]  ;;  %v5499_v53 = vld [vmem:[#allocation2 + $0x11] ss:$2 sm:$0xff]  ;;  %5429 = vst [vmem:[#allocation2 + $0x20] sm:$0xff] %v5393_v49  ;;  %v5394_v54 = vmax.f32 %v9872_v11, 0.0 }
 0x30e   : > { %v5533_v55 = vmax.f32 %v5463_v52, %v5499_v53  ;;  %5626 = vst [vmem:[#allocation2 + $0x18] sm:$0xff] %v11643_v50  ;;  %5625 = vst [vmem:[#allocation2 + $0x10] sm:$0xff] %v11643_v50  ;;  %v11651_v6 = vld [vmem:[#allocation2] ss:$2 sm:$0xff]  ;;  %v11653_v56 = vld [vmem:[#allocation2 + $0x1] ss:$2 sm:$0xff]  ;;  %v823_v52 = vadd.f32 %v11622_v45, %v11523_v16 }
 0x30f   : > { %5432 = vst [vmem:[#allocation2 + $0x38] sm:$0xff] %v5396_v51  ;;  %5624 = vst [vmem:[#allocation2 + $0x8] sm:$0xff] %v11643_v50  ;;  %v9503_v9 = vpop.f32.mrb[8].mxu0 }
 0x310   : > { %5623 = vst [vmem:[#allocation2] sm:$0xff] %v11643_v50  ;;  %5430 = vst [vmem:[#allocation2 + $0x28] sm:$0xff] %v5394_v54  ;;  %v9876_v57 = vadd.f32 %v9503_v9, %v820_v12  ;;  %v5170_v58 = vpop.f32.mrb[9].mxu0 }
 0x311   : > { %5551 = vst [vmem:[#allocation3 + $0x8] sm:$0xff] %v5533_v55  ;;  %v9880_v60 = vadd.f32 %v5170_v58, %v818_v4  ;;  %v9504_v61 = vpop.f32.mrb[10].mxu0  ;;  %v828_v58 = vadd.f32 %v11525_v17, %v11622_v45 }
 0x312   : > { %v5399_v62 = vmax.f32 %v9876_v57, 0.0  ;;  %v9884_v63 = vadd.f32 %v9504_v61, %v821_v13  ;;  %v5173_v0 = vpop.f32.mrb[11].mxu0  ;;  %v826_v61 = vadd.f32 %v11622_v45, %v11527_v18  ;;  %v829_v18 = vadd.f32 %v11529_v19, %v11622_v45 }
 0x313   : > { %v5397_v1 = vmax.f32 %v9880_v60, 0.0  ;;  %v9888_v2 = vadd.f32 %v5173_v0, %v819_v59  ;;  %v832_v19 = vadd.f32 %v11533_v21, %v11622_v45  ;;  %v833_v21 = vadd.f32 %v11573_v23, %v11622_v45 }
 0x314   : > { %5435 = vst [vmem:[#allocation2 + $0x50] sm:$0xff] %v5399_v62  ;;  %v5400_v7 = vmax.f32 %v9884_v63, 0.0 }
 0x315   : > { %5433 = vst [vmem:[#allocation2 + $0x40] sm:$0xff] %v5397_v1  ;;  %v5398_v47 = vmax.f32 %v9888_v2, 0.0  ;;  %v5532_v2 = vmax.f32 %v11651_v6, %v11653_v56 }
 0x316   : > { %v5467_v8 = vld [vmem:[#allocation2 + $0x30] ss:$2 sm:$0xff]  ;;  %v5503_v46 = vld [vmem:[#allocation2 + $0x31] ss:$2 sm:$0xff]  ;;  %5436 = vst [vmem:[#allocation2 + $0x58] sm:$0xff] %v5400_v7 }
 0x317   : > { %v5535_v14 = vmax.f32 %v5467_v8, %v5503_v46  ;;  %5630 = vst [vmem:[#allocation2 + $0x38] sm:$0xff] %v11643_v50  ;;  %5629 = vst [vmem:[#allocation2 + $0x30] sm:$0xff] %v11643_v50  ;;  %v5465_v48 = vld [vmem:[#allocation2 + $0x20] ss:$2 sm:$0xff]  ;;  %v5501_v49 = vld [vmem:[#allocation2 + $0x21] ss:$2 sm:$0xff]  ;;  %v827_v46 = vadd.f32 %v11622_v45, %v11531_v20  ;;  %v830_v20 = vadd.f32 %v11622_v45, %v11571_v22 }
 0x318   : > { %v5534_v11 = vmax.f32 %v5465_v48, %v5501_v49  ;;  %5628 = vst [vmem:[#allocation2 + $0x28] sm:$0xff] %v11643_v50  ;;  %5627 = vst [vmem:[#allocation2 + $0x20] sm:$0xff] %v11643_v50  ;;  %v9507_v15 = vpop.f32.mrb[12].mxu0  ;;  %v831_v22 = vadd.f32 %v11622_v45, %v11575_v24 }
 0x319   : > { %5434 = vst [vmem:[#allocation2 + $0x48] sm:$0xff] %v5398_v47  ;;  %5553 = vst [vmem:[#allocation3 + $0x18] sm:$0xff] %v5535_v14  ;;  %v9892_v12 = vadd.f32 %v9507_v15, %v824_v5  ;;  %v5186_v51 = vpop.f32.mrb[13].mxu0 }
 0x31a   : > { %5552 = vst [vmem:[#allocation3 + $0x10] sm:$0xff] %v5534_v11  ;;  %v9896_v53 = vadd.f32 %v5186_v51, %v822_v10  ;;  %v9508_v4 = vpop.f32.mrb[14].mxu0 }
 0x31b   : > { %v5403_v54 = vmax.f32 %v9892_v12, 0.0  ;;  %v9900_v55 = vadd.f32 %v9508_v4, %v825_v25  ;;  %v5189_v9 = vpop.f32.mrb[15].mxu0 }
 0x31c   : > { %v5401_v13 = vmax.f32 %v9896_v53, 0.0  ;;  %v9904_v57 = vadd.f32 %v5189_v9, %v823_v52 }
 0x31d   : > { %5439 = vst [vmem:[#allocation2 + $0x70] sm:$0xff] %v5403_v54  ;;  %v5404_v59 = vmax.f32 %v9900_v55, 0.0  ;;  %v5471_v60 = vld [vmem:[#allocation2 + $0x50] ss:$2 sm:$0xff]  ;;  %v5507_v30 = vld [vmem:[#allocation2 + $0x51] ss:$2 sm:$0xff] }
 0x31e   : > { %5437 = vst [vmem:[#allocation2 + $0x60] sm:$0xff] %v5401_v13  ;;  %v5402_v62 = vmax.f32 %v9904_v57, 0.0  ;;  %v5537_v16 = vmax.f32 %v5471_v60, %v5507_v30 }
 0x31f   : > { %5440 = vst [vmem:[#allocation2 + $0x78] sm:$0xff] %v5404_v59  ;;  %v9511_v17 = vpop.f32.mrb[16].mxu0 }
 0x320   : > { %v5469_v63 = vld [vmem:[#allocation2 + $0x40] ss:$2 sm:$0xff]  ;;  %v5505_v0 = vld [vmem:[#allocation2 + $0x41] ss:$2 sm:$0xff]  ;;  %5438 = vst [vmem:[#allocation2 + $0x68] sm:$0xff] %v5402_v62  ;;  %5555 = vst [vmem:[#allocation3 + $0x28] sm:$0xff] %v5537_v16  ;;  %v9908_v5 = vadd.f32 %v9511_v17, %v828_v58 }
 0x321   : > { %v5536_v1 = vmax.f32 %v5469_v63, %v5505_v0  ;;  %5632 = vst [vmem:[#allocation2 + $0x48] sm:$0xff] %v11643_v50  ;;  %5631 = vst [vmem:[#allocation2 + $0x40] sm:$0xff] %v11643_v50  ;;  %v5202_v7 = vpop.f32.mrb[17].mxu0  ;;  %v5585_v8 = vld [vmem:[#allocation3 + $0x9] sm:$0xff]  ;;  %v5588_v13 = vld [vmem:[#allocation3 + $0x12] sm:$0xff] }
 0x322   : > { %v9912_v10 = vadd.f32 %v5202_v7, %v826_v61  ;;  %v9512_v47 = vpop.f32.mrb[18].mxu0  ;;  %v5586_v14 = vmax.f32 %v5532_v2, %v5585_v8  ;;  %v5407_v50 = vmax.f32 %v9908_v5, 0.0  ;;  %v10718_v63 = vld [vmem:[%s12382_s4 + $0x8] sm:$0xff]   ;;  %v836_v5 = vadd.f32 %v11577_v27, %v11622_v45 }
 0x323   : > { %5554 = vst [vmem:[#allocation3 + $0x20] sm:$0xff] %v5536_v1  ;;  %v9916_v48 = vadd.f32 %v9512_v47, %v829_v18  ;;  %v5205_v49 = vpop.f32.mrb[19].mxu0 }
 0x324   : > { %v5405_v11 = vmax.f32 %v9912_v10, 0.0  ;;  %v9920_v15 = vadd.f32 %v5205_v49, %v827_v46  ;;  %5587 = vst.msk [vmem:[#allocation4 + $0xb] sm:$0xff] %vm5568_vm9, %v5586_v14  ;;  %5443 = vst [vmem:[#allocation2 + $0x90] sm:$0xff] %v5407_v50 }
 0x325   : > { %v5408_v6 = vmax.f32 %v9916_v48, 0.0 }
 0x326   : > { %v5475_v56 = vld [vmem:[#allocation2 + $0x70] ss:$2 sm:$0xff]  ;;  %v5511_v25 = vld [vmem:[#allocation2 + $0x71] ss:$2 sm:$0xff]  ;;  %5441 = vst [vmem:[#allocation2 + $0x80] sm:$0xff] %v5405_v11  ;;  %v5406_v12 = vmax.f32 %v9920_v15, 0.0 }
 0x327   : > { %v5539_v51 = vmax.f32 %v5475_v56, %v5511_v25  ;;  %v5473_v52 = vld [vmem:[#allocation2 + $0x60] ss:$2 sm:$0xff]  ;;  %v5509_v53 = vld [vmem:[#allocation2 + $0x61] ss:$2 sm:$0xff]  ;;  %5444 = vst [vmem:[#allocation2 + $0x98] sm:$0xff] %v5408_v6  ;;  %v9515_v54 = vpop.f32.mrb[20].mxu0  ;;  %v835_v6 = vadd.f32 %v11622_v45, %v11593_v34  ;;  %v840_v34 = vadd.f32 %v11595_v35, %v11622_v45 }
 0x328   : > { %v5538_v4 = vmax.f32 %v5473_v52, %v5509_v53  ;;  %5442 = vst [vmem:[#allocation2 + $0x88] sm:$0xff] %v5406_v12  ;;  %v9924_v55 = vadd.f32 %v9515_v54, %v832_v19  ;;  %v5218_v9 = vpop.f32.mrb[21].mxu0 }
 0x329   : > { %5557 = vst [vmem:[#allocation3 + $0x38] sm:$0xff] %v5539_v51  ;;  %v9928_v58 = vadd.f32 %v5218_v9, %v830_v20  ;;  %v9516_v59 = vpop.f32.mrb[22].mxu0 }
 0x32a   : > { %v5589_v57 = vld [vmem:[#allocation3 + $0x1b] sm:$0xff]  ;;  %5556 = vst [vmem:[#allocation3 + $0x30] sm:$0xff] %v5538_v4  ;;  %v5411_v30 = vmax.f32 %v9924_v55, 0.0  ;;  %v9932_v61 = vadd.f32 %v9516_v59, %v833_v21  ;;  %v5221_v62 = vpop.f32.mrb[23].mxu0  ;;  %v5592_v15 = vld [vmem:[#allocation3 + $0x24] sm:$0xff] }
 0x32b   : > { %v5590_v60 = vmax.f32 %v5588_v13, %v5589_v57  ;;  %v5634_v16 = vld [vmem:[#allocation4 + $0x8] sm:$0xff]  ;;  %v5409_v0 = vmax.f32 %v9928_v58, 0.0  ;;  %v9936_v1 = vadd.f32 %v5221_v62, %v831_v22 }
 0x32c   : > { %v11697_v23 = vld [vmem:[#allocation4 + $0x9] sm:$0xff]  ;;  %v5643_v17 = vpack.c.bf16 %v5634_v16, %v11581_v29  ;;  %5447 = vst [vmem:[#allocation2 + $0xb0] sm:$0xff] %v5411_v30  ;;  %v5412_v7 = vmax.f32 %v9932_v61, 0.0  ;;  %v834_v29 = vadd.f32 %v11622_v45, %v11579_v28  ;;  %v837_v28 = vadd.f32 %v11587_v33, %v11622_v45 }
 0x32d   : > { %5591 = vst.msk [vmem:[#allocation4 + $0x15] sm:$0xff] %vm5568_vm9, %v5590_v60  ;;  %v11701_v24 = vld [vmem:[#allocation4 + $0xa] sm:$0xff]  ;;  %5445 = vst [vmem:[#allocation2 + $0xa0] sm:$0xff] %v5409_v0  ;;  %v5410_v10 = vmax.f32 %v9936_v1, 0.0  ;;  %v838_v61 = vadd.f32 %v11622_v45, %v11597_v36 }
 0x32e   : > { %v11703_v2 = vld [vmem:[#allocation4 + $0xb] sm:$0xff]  ;;  %9532 = vmatmul.mubr.msk.bf16.vlgmr.msra.gmra.mrb[36].mxu1 %vm5568_vm9, %v5643_v17  ;;  %5448 = vst [vmem:[#allocation2 + $0xb8] sm:$0xff] %v5412_v7  ;;  %v841_v17 = vadd.f32 %v11599_v37, %v11622_v45 }
 0x32f   : > { %v11705_v18 = vld [vmem:[#allocation4 + $0xc] sm:$0xff]  ;;  %9535 = vmatprep.mubr.msk.bf16.mxu1 %vm10829_vm10, %v12390_v26  ;;  %9552 = vmatpush3.bf16.msra.mxu1 %v10718_v63  ;;  %5446 = vst [vmem:[#allocation2 + $0xa8] sm:$0xff] %v5410_v10  ;;  %v9519_v48 = vpop.f32.mrb[24].mxu0  ;;  %v839_v10 = vadd.f32 %v11622_v45, %v11601_v3  ;;  %v844_v3 = vadd.f32 %v11603_v38, %v11622_v45 }
 0x330   : > { %7714 = vst.msk [vmem:[#allocation4 + $0x8] sm:$0xff] %vm5568_vm9, %v12390_v26  ;;  %v11711_v8 = vld [vmem:[#allocation2 + $0x90] ss:$2 sm:$0xff]  ;;  %v11713_v46 = vld [vmem:[#allocation2 + $0x91] ss:$2 sm:$0xff]  ;;  %9573 = vmatprep.subr.bf16.mxu1 %v12390_v26  ;;  %v9940_v49 = vadd.f32 %v9519_v48, %v836_v5  ;;  %v5234_v11 = vpop.f32.mrb[25].mxu0 }
 0x331   : > { %v5541_v47 = vmax.f32 %v11711_v8, %v11713_v46  ;;  %v5477_v27 = vld [vmem:[#allocation2 + $0x80] ss:$2 sm:$0xff]  ;;  %v5513_v14 = vld [vmem:[#allocation2 + $0x81] ss:$2 sm:$0xff]  ;;  %v9944_v56 = vadd.f32 %v5234_v11, %v834_v29  ;;  %v9520_v25 = vpop.f32.mrb[26].mxu0  ;;  %v5596_v29 = vld [vmem:[#allocation3 + $0x36] sm:$0xff] }
 0x332   : > { %v5540_v50 = vmax.f32 %v5477_v27, %v5513_v14  ;;  %v5593_v19 = vld [vmem:[#allocation3 + $0x2d] sm:$0xff]  ;;  %v5415_v12 = vmax.f32 %v9940_v49, 0.0  ;;  %v9948_v51 = vadd.f32 %v9520_v25, %v837_v28  ;;  %v5237_v52 = vpop.f32.mrb[27].mxu0 }
 0x333   : > { %v5594_v20 = vmax.f32 %v5592_v15, %v5593_v19  ;;  %v5413_v4 = vmax.f32 %v9944_v56, 0.0  ;;  %v9952_v54 = vadd.f32 %v5237_v52, %v835_v6 }
 0x334   : > { %5558 = vst [vmem:[#allocation3 + $0x40] sm:$0xff] %v5540_v50  ;;  %v11727_v53 = vld [vmem:[#allocation4 + $0x10] sm:$0xff]  ;;  %5451 = vst [vmem:[#allocation2 + $0xd0] sm:$0xff] %v5415_v12  ;;  %v5416_v9 = vmax.f32 %v9948_v51, 0.0 }
 0x335   : > { %5595 = vst.msk [vmem:[#allocation4 + $0x1f] sm:$0xff] %vm5568_vm9, %v5594_v20  ;;  %v11730_v33 = vld [vmem:[#allocation4 + $0x11] sm:$0xff]  ;;  %v5483_v60 = vld [vmem:[#allocation2 + $0xb0] ss:$2 sm:$0xff]  ;;  %v5519_v30 = vld [vmem:[#allocation2 + $0xb1] ss:$2 sm:$0xff]  ;;  %v842_v20 = vadd.f32 %v11622_v45, %v11605_v39 }
 0x336   : > { %v11732_v21 = vld [vmem:[#allocation4 + $0x13] sm:$0xff]  ;;  %5449 = vst [vmem:[#allocation2 + $0xc0] sm:$0xff] %v5413_v4  ;;  %v5414_v35 = vmax.f32 %v9952_v54, 0.0  ;;  %v5543_v62 = vmax.f32 %v5483_v60, %v5519_v30  ;;  %5452 = vst [vmem:[#allocation2 + $0xd8] sm:$0xff] %v5416_v9 }
 0x337   : > { %v11734_v55 = vld [vmem:[#allocation4 + $0x14] sm:$0xff]  ;;  %v9523_v1 = vpop.f32.mrb[28].mxu0 }
 0x338   : > { %v11738_v13 = vld [vmem:[#allocation4 + $0x12] sm:$0xff]  ;;  %5450 = vst [vmem:[#allocation2 + $0xc8] sm:$0xff] %v5414_v35  ;;  %5561 = vst [vmem:[#allocation3 + $0x58] sm:$0xff] %v5543_v62  ;;  %v9956_v5 = vadd.f32 %v9523_v1, %v840_v34  ;;  %v5250_v7 = vpop.f32.mrb[29].mxu0  ;;  %v845_v62 = vadd.f32 %v11607_v40, %v11622_v45 }
 0x339   : > { %v11744_v58 = vld [vmem:[#allocation4 + $0x15] sm:$0xff]  ;;  %v9960_v27 = vadd.f32 %v5250_v7, %v838_v61  ;;  %v9524_v14 = vpop.f32.mrb[30].mxu0 }
 0x33a   : > { %v11746_v59 = vld [vmem:[#allocation4 + $0x16] sm:$0xff]  ;;  %v5419_v48 = vmax.f32 %v9956_v5, 0.0  ;;  %v9964_v28 = vadd.f32 %v9524_v14, %v841_v17  ;;  %v5253_v49 = vpop.f32.mrb[31].mxu0 }
 0x33b   : > { %7715 = vst.msk [vmem:[#allocation4 + $0x10] sm:$0xff] %vm5568_vm9, %v12390_v26  ;;  %v5481_v16 = vld [vmem:[#allocation2 + $0xa0] ss:$2 sm:$0xff]  ;;  %v5517_v63 = vld [vmem:[#allocation2 + $0xa1] ss:$2 sm:$0xff]  ;;  %v5417_v15 = vmax.f32 %v9960_v27, 0.0  ;;  %v9968_v19 = vadd.f32 %v5253_v49, %v839_v10 }
 0x33c   : > { %v5542_v0 = vmax.f32 %v5481_v16, %v5517_v63  ;;  %v5597_v36 = vld [vmem:[#allocation3 + $0x3f] sm:$0xff]  ;;  %v5636_v11 = vld [vmem:[#allocation4 + $0x18] sm:$0xff]  ;;  %5455 = vst [vmem:[#allocation2 + $0xf0] sm:$0xff] %v5419_v48  ;;  %v5420_v12 = vmax.f32 %v9964_v28, 0.0  ;;  %v843_v63 = vadd.f32 %v11622_v45, %v11609_v41  ;;  %v5637_v14 = vld [vmem:[#allocation4 + $0x20] sm:$0xff] }
 0x33d   : > { %v5598_v50 = vmax.f32 %v5596_v29, %v5597_v36  ;;  %v5644_v6 = vpack.c.bf16 %v5636_v11, %v11727_v53  ;;  %v11758_v37 = vld [vmem:[#allocation4 + $0x19] sm:$0xff]  ;;  %v5523_v34 = vld [vmem:[#allocation2 + $0xd1] ss:$2 sm:$0xff]  ;;  %5453 = vst [vmem:[#allocation2 + $0xe0] sm:$0xff] %v5417_v15  ;;  %v5418_v9 = vmax.f32 %v9968_v19, 0.0 }
 0x33e   : > { %5560 = vst [vmem:[#allocation3 + $0x50] sm:$0xff] %v5542_v0  ;;  %v11760_v56 = vld [vmem:[#allocation4 + $0x1a] sm:$0xff]  ;;  %5456 = vst [vmem:[#allocation2 + $0xf8] sm:$0xff] %v5420_v12 }
 0x33f   : > { %5599 = vst.msk [vmem:[#allocation4 + $0x29] sm:$0xff] %vm5568_vm9, %v5598_v50  ;;  %v11762_v25 = vld [vmem:[#allocation4 + $0x1b] sm:$0xff]  ;;  %9536 = vmatmul.mubr.msk.bf16.gmra.mrb[40].mxu1 %vm5568_vm9, %v5644_v6  ;;  %5454 = vst [vmem:[#allocation2 + $0xe8] sm:$0xff] %v5418_v9  ;;  %v9527_v0 = vpop.f32.mrb[32].mxu0 }
 0x340   : > { %v11770_v52 = vld [vmem:[#allocation4 + $0x1c] sm:$0xff]  ;;  %9539 = vmatprep.mubr.msk.bf16.mxu1 %vm10829_vm10, %v12390_v26  ;;  %v9972_v1 = vadd.f32 %v9527_v0, %v844_v3  ;;  %v5266_v17 = vpop.f32.mrb[33].mxu0 }
 0x341   : > { %v11772_v53 = vld [vmem:[#allocation4 + $0x1d] sm:$0xff]  ;;  %v9976_v7 = vadd.f32 %v5266_v17, %v842_v20  ;;  %v9528_v29 = vpop.f32.mrb[34].mxu0 }
 0x342   : > { %v11774_v4 = vld [vmem:[#allocation4 + $0x1e] sm:$0xff]  ;;  %v5423_v36 = vmax.f32 %v9972_v1, 0.0  ;;  %v9980_v10 = vadd.f32 %v9528_v29, %v845_v62  ;;  %v5269_v27 = vpop.f32.mrb[35].mxu0 }
 0x343   : > { %v5487_v54 = vld [vmem:[#allocation2 + $0xd0] ss:$2 sm:$0xff]  ;;  %7716 = vst.msk [vmem:[#allocation4 + $0x18] sm:$0xff] %vm5568_vm9, %v12390_v26  ;;  %v5485_v61 = vld [vmem:[#allocation2 + $0xc0] ss:$2 sm:$0xff]  ;;  %v5421_v41 = vmax.f32 %v9976_v7, 0.0  ;;  %v9984_v45 = vadd.f32 %v5269_v27, %v843_v63 }
 0x344   : > { %v5545_v30 = vmax.f32 %v5487_v54, %v5523_v34  ;;  %v5521_v35 = vld [vmem:[#allocation2 + $0xc1] ss:$2 sm:$0xff]  ;;  %v11797_v49 = vld [vmem:[#allocation4 + $0x21] sm:$0xff]  ;;  %5459 = vst [vmem:[#allocation2 + $0x110] sm:$0xff] %v5423_v36  ;;  %v5424_v8 = vmax.f32 %v9980_v10, 0.0 }
 0x345   : > { %v5544_v16 = vmax.f32 %v5485_v61, %v5521_v35  ;;  %v5601_v5 = vld [vmem:[#allocation3 + $0x51] sm:$0xff]  ;;  %5457 = vst [vmem:[#allocation2 + $0x100] sm:$0xff] %v5421_v41  ;;  %v5422_v34 = vmax.f32 %v9984_v45, 0.0 }
 0x346   : > { %5563 = vst [vmem:[#allocation3 + $0x68] sm:$0xff] %v5545_v30  ;;  %v5602_v40 = vmax.f32 %v5541_v47, %v5601_v5  ;;  %v5638_v50 = vld [vmem:[#allocation4 + $0x28] sm:$0xff]  ;;  %v5489_v61 = vld [vmem:[#allocation2 + $0xe0] ss:$2 sm:$0xff]  ;;  %v5525_v35 = vld [vmem:[#allocation2 + $0xe1] ss:$2 sm:$0xff] }
 0x347   : > { %5562 = vst [vmem:[#allocation3 + $0x60] sm:$0xff] %v5544_v16  ;;  %v11794_v48 = vld [vmem:[#allocation4 + $0x22] sm:$0xff]  ;;  %v5645_v28 = vpack.c.bf16 %v5638_v50, %v5637_v14  ;;  %v11799_v11 = vld [vmem:[#allocation4 + $0x2a] sm:$0xff]  ;;  %5460 = vst [vmem:[#allocation2 + $0x118] sm:$0xff] %v5424_v8  ;;  %v5546_v62 = vmax.f32 %v5489_v61, %v5525_v35 }
 0x348   : > { %5603 = vst.msk [vmem:[#allocation4 + $0x33] sm:$0xff] %vm5568_vm9, %v5602_v40  ;;  %v11801_v15 = vld [vmem:[#allocation4 + $0x23] sm:$0xff]  ;;  %5458 = vst [vmem:[#allocation2 + $0x108] sm:$0xff] %v5422_v34  ;;  %v11824_v17 = vld [vmem:[#allocation4 + $0x2b] sm:$0xff] }
 0x349   : > { %v11809_v6 = vld [vmem:[#allocation4 + $0x24] sm:$0xff]  ;;  %9540 = vmatmul.mubr.msk.bf16.gmra.mrb[44].mxu1 %vm5568_vm9, %v5645_v28  ;;  %5564 = vst [vmem:[#allocation3 + $0x70] sm:$0xff] %v5546_v62 }
 0x34a   : > { %v11811_v3 = vld [vmem:[#allocation4 + $0x25] sm:$0xff]  ;;  %9543 = vmatprep.mubr.msk.bf16.mxu1 %vm10829_vm10, %v12390_v26 }
 0x34b   : > { %v11813_v20 = vld [vmem:[#allocation4 + $0x26] sm:$0xff] }
 0x34c   : > { %v5491_v12 = vld [vmem:[#allocation2 + $0xf0] ss:$2 sm:$0xff]  ;;  %v5527_v54 = vld [vmem:[#allocation2 + $0xf1] ss:$2 sm:$0xff]  ;;  %7717 = vst.msk [vmem:[#allocation4 + $0x20] sm:$0xff] %vm5568_vm9, %v12390_v26 }
 0x34d   : > { %v5547_v30 = vmax.f32 %v5491_v12, %v5527_v54  ;;  %v11835_v36 = vld [vmem:[#allocation4 + $0x29] sm:$0xff] }
 0x34e   : > { %v5604_v16 = vld [vmem:[#allocation3 + $0x5a] sm:$0xff]  ;;  %v5605_v63 = vld [vmem:[#allocation3 + $0x63] sm:$0xff] }
 0x34f   : > { %5565 = vst [vmem:[#allocation3 + $0x78] sm:$0xff] %v5547_v30  ;;  %v5606_v0 = vmax.f32 %v5604_v16, %v5605_v63  ;;  %v11822_v1 = vld [vmem:[#allocation4 + $0x32] sm:$0xff]  ;;  %v5495_v45 = vld [vmem:[#allocation2 + $0x110] ss:$2 sm:$0xff]  ;;  %v5531_v28 = vld [vmem:[#allocation2 + $0x111] ss:$2 sm:$0xff] }
 0x350   : > { %v11829_v7 = vld [vmem:[#allocation4 + $0x33] sm:$0xff]  ;;  %v5549_v54 = vmax.f32 %v5495_v45, %v5531_v28  ;;  %v5608_v35 = vld [vmem:[#allocation3 + $0x6c] sm:$0xff] }
 0x351   : > { %5607 = vst.msk [vmem:[#allocation4 + $0x3d] sm:$0xff] %vm5568_vm9, %v5606_v0  ;;  %v11831_v29 = vld [vmem:[#allocation4 + $0x2c] sm:$0xff]  ;;  %v11833_v40 = vld [vmem:[#allocation4 + $0x34] sm:$0xff] }
 0x352   : > { %v11843_v50 = vld [vmem:[#allocation4 + $0x2d] sm:$0xff]  ;;  %5567 = vst [vmem:[#allocation3 + $0x88] sm:$0xff] %v5549_v54  ;;  %v11857_v39 = vld [vmem:[#allocation4 + $0x35] sm:$0xff] }
 0x353   : > { %v11845_v41 = vld [vmem:[#allocation4 + $0x2e] sm:$0xff] }
 0x354   : > { %7718 = vst.msk [vmem:[#allocation4 + $0x28] sm:$0xff] %vm5568_vm9, %v12390_v26  ;;  %v5493_v34 = vld [vmem:[#allocation2 + $0x100] ss:$2 sm:$0xff]  ;;  %v5529_v30 = vld [vmem:[#allocation2 + $0x101] ss:$2 sm:$0xff] }
 0x355   : > { %v5548_v61 = vmax.f32 %v5493_v34, %v5529_v30  ;;  %v5639_v16 = vld [vmem:[#allocation4 + $0x30] sm:$0xff] }
 0x356   : > { %v5609_v62 = vld [vmem:[#allocation3 + $0x75] sm:$0xff]  ;;  %v11853_v60 = vld [vmem:[#allocation4 + $0x31] sm:$0xff] }
 0x357   : > { %5566 = vst [vmem:[#allocation3 + $0x80] sm:$0xff] %v5548_v61  ;;  %v5610_v63 = vmax.f32 %v5608_v35, %v5609_v62 }
 0x358   : > { %v5640_v0 = vld [vmem:[#allocation4 + $0x38] sm:$0xff] }
 0x359   : > { %v11855_v8 = vld [vmem:[#allocation4 + $0x3a] sm:$0xff]  ;;  %v5646_v12 = vpack.c.bf16 %v5640_v0, %v5639_v16  ;;  %5611 = vst.msk [vmem:[#allocation4 + $0x47] sm:$0xff] %vm5568_vm9, %v5610_v63 }
 0x35a   : > { %v11860_v45 = vld [vmem:[#allocation4 + $0x39] sm:$0xff] }
 0x35b   : > { %v11864_v54 = vld [vmem:[#allocation4 + $0x3c] sm:$0xff]  ;;  %9544 = vmatmul.mubr.msk.bf16.gmra.mrb[48].mxu1 %vm5568_vm9, %v5646_v12  ;;  %v5787_v51 = vpack.c.bf16 %v11860_v45, %v11853_v60  ;;  %v12399_v60 = vpack.c.bf16 %v11799_v11, %v11794_v48  ;;  %v12402_v45 = vpack.c.bf16 %v11822_v1, %v11799_v11  ;;  %v12409_v11 = vpack.c.bf16 %v11734_v55, %v11705_v18 }
 0x35c   : > { %v11866_v34 = vld [vmem:[#allocation4 + $0x3d] sm:$0xff]  ;;  %9547 = vmatprep.mubr.msk.bf16.mxu1 %vm10829_vm10, %v12390_v26 }
 0x35d   : > { %v11868_v30 = vld [vmem:[#allocation4 + $0x3b] sm:$0xff] }
 0x35e   : > { %v11874_v62 = vld [vmem:[#allocation4 + $0x36] sm:$0xff]  ;;  %v11876_v16 = vld [vmem:[#allocation4 + $0x3e] sm:$0xff]  ;;  %v5612_v0 = vld [vmem:[#allocation3 + $0x7e] sm:$0xff] }
 0x35f   : > { %12396 = vst [vmem:[#allocation13_spill] sm:$0xff] %v11874_v62  ;;  %7719 = vst.msk [vmem:[#allocation4 + $0x30] sm:$0xff] %vm5568_vm9, %v12390_v26  ;;  %v5613_v35 = vld [vmem:[#allocation3 + $0x87] sm:$0xff]  ;;  %v12397_v62 = vmov 0.0  }
 0x360   : > { %7720 = vst.msk [vmem:[#allocation4 + $0x38] sm:$0xff] %vm5568_vm9, %v12390_v26  ;;  %v5614_v61 = vmax.f32 %v5612_v0, %v5613_v35  ;;  %v5641_v14 = vld [vmem:[#allocation4 + $0x40] sm:$0xff]  ;;  %v5642_v38 = vld [vmem:[#allocation4 + $0x48] sm:$0xff] }
 0x361   : > { %v5647_v27 = vpack.c.bf16 %v5642_v38, %v5641_v14  ;;  %v5782_v9 = vld [vmem:[#allocation4 + $0x41] sm:$0xff]  ;;  %v5783_v46 = vld [vmem:[#allocation4 + $0x49] sm:$0xff] }
 0x362   : > { %5615 = vst.msk [vmem:[#allocation4 + $0x51] sm:$0xff] %vm5568_vm9, %v5614_v61  ;;  %v11888_v12 = vld [vmem:[#allocation4 + $0x42] sm:$0xff] }
 0x363   : > { %v11890_v63 = vld [vmem:[#allocation4 + $0x43] sm:$0xff]  ;;  %9548 = vmatmul.mubr.msk.bf16.gmra.mrb[52].mxu1 %vm5568_vm9, %v5647_v27  ;;  %v5784_v27 = vpack.c.bf16 %v11697_v23, %v11583_v31 }
 0x364   : > { %v11896_v19 = vld [vmem:[#allocation4 + $0x44] sm:$0xff]  ;;  %9553 = vmatprep.mubr.msk.bf16.mxu1 %vm10829_vm10, %v12390_v26 }
 0x365   : > { %v11898_v57 = vld [vmem:[#allocation4 + $0x45] sm:$0xff]  ;;  %v12412_v18 = vpack.c.bf16 %v11896_v19, %v11864_v54 }
 0x366   : > { %v11900_v35 = vld [vmem:[#allocation4 + $0x46] sm:$0xff] }
 0x367   : > { %7721 = vst.msk [vmem:[#allocation4 + $0x40] sm:$0xff] %vm5568_vm9, %v12390_v26  ;;  %v10719_v14 = vld [vmem:[%s12382_s4 + $0x10] sm:$0xff]  }
 0x369   : > { %v11912_v61 = vld [vmem:[#allocation4 + $0x4a] sm:$0xff]  ;;  %v11914_v0 = vld [vmem:[#allocation4 + $0x52] sm:$0xff] }
 0x36a   : > { %v11916_v10 = vld [vmem:[#allocation4 + $0x4b] sm:$0xff]  ;;  %v5930_v38 = vpack.c.bf16 %v11912_v61, %v11888_v12  ;;  %v6072_v22 = vpack.c.bf16 %v11914_v0, %v11912_v61  ;;  %v11924_v5 = vld [vmem:[#allocation4 + $0x53] sm:$0xff] }
 0x36b   : > { %v11926_v47 = vld [vmem:[#allocation4 + $0x4c] sm:$0xff]  ;;  %v11928_v28 = vld [vmem:[#allocation4 + $0x54] sm:$0xff]  ;;  %9554 = vmatmul.mubr.msk.bf16.vlgmr.msra.gmra.mrb[36].mxu1 %vm5568_vm9, %v5784_v27  ;;  %v5785_v27 = vpack.c.bf16 %v11758_v37, %v11730_v33  ;;  %v5788_v33 = vpack.c.bf16 %v5783_v46, %v5782_v9  ;;  %v6068_v9 = vpack.c.bf16 %v11738_v13, %v11701_v24 }
 0x36c   : > { %v6497_v31 = vpack.c.bf16 %v11926_v47, %v11896_v19  ;;  %v11936_v23 = vld [vmem:[#allocation4 + $0x4d] sm:$0xff]  ;;  %v11943_v0 = vld [vmem:[#allocation4 + $0x55] sm:$0xff]  ;;  %9574 = vmatpush3.bf16.msra.mxu1 %v10719_v14  ;;  %9557 = vmatprep.mubr.msk.bf16.mxu1 %vm10829_vm10, %v12397_v62  ;;  %v5786_v14 = vpack.c.bf16 %v11835_v36, %v11797_v49  ;;  %v5926_v49 = vpack.c.bf16 %v11701_v24, %v11585_v32 }
 0x36d   : > { %v11938_v44 = vld [vmem:[#allocation4 + $0x4e] sm:$0xff]  ;;  %v6639_v61 = vpack.c.bf16 %v11936_v23, %v11898_v57  ;;  %v11949_v26 = vld [vmem:[#allocation4 + $0x56] sm:$0xff]  ;;  %9595 = vmatprep.subr.bf16.mxu1 %v12397_v62  ;;  %v12400_v32 = vpack.c.bf16 %v11855_v8, %v11822_v1  ;;  %v12401_v36 = vpack.c.bf16 %v11794_v48, %v11760_v56  ;;  %v12403_v24 = vpack.c.bf16 %v11888_v12, %v11855_v8 }
 0x36e   : > { %7722 = vst.msk [vmem:[#allocation4 + $0x48] sm:$0xff] %vm5568_vm9, %v12397_v62  ;;  %7723 = vst.msk [vmem:[#allocation4 + $0x50] sm:$0xff] %vm5568_vm9, %v12397_v62  ;;  %v10720_v37 = vld [vmem:[%s12382_s4 + $0x18] sm:$0xff]   ;;  %v10721_v46 = vld [vmem:[%s12382_s4 + $0x20] sm:$0xff]   ;;  %v12406_v48 = vpack.c.bf16 %v11829_v7, %v11824_v17  ;;  %v12411_v1 = vpack.c.bf16 %v11833_v40, %v11831_v29  ;;  %v12413_v17 = vpack.c.bf16 %v11928_v28, %v11926_v47 }
 0x36f   : > { %7724 = vst.msk [vmem:[#allocation4 + $0x58] sm:$0xff] %vm5568_vm9, %v12397_v62  ;;  %v12414_v7 = vpack.c.bf16 %v11770_v52, %v11734_v55  ;;  %v12416_v8 = vpack.c.bf16 %v11864_v54, %v11833_v40  ;;  %v6498_v55 = vpack.c.bf16 %v11611_v42, %v11928_v28  ;;  %v12417_v47 = vpack.c.bf16 %v11772_v53, %v11744_v58  ;;  %v5649_v40 = vld [vmem:[#allocation2 + $0x8] sm:$0xff]  ;;  %v5651_v12 = vld [vmem:[#allocation2 + $0x18] sm:$0xff] }
 0x370   : > { %v12418_v42 = vpack.c.bf16 %v11843_v50, %v11811_v3  ;;  %v12419_v19 = vpack.c.bf16 %v11866_v34, %v11857_v39  ;;  %v6640_v58 = vpack.c.bf16 %v11613_v43, %v11943_v0  ;;  %v12420_v53 = vpack.c.bf16 %v11774_v4, %v11746_v59  ;;  %v12422_v43 = vld [vmem:[#allocation13_spill] sm:$0xff]  ;;  %v12425_v4 = vld [vmem:[#allocation12_spill] sm:$0xff] }
 0x371   : > { %v12421_v57 = vpack.c.bf16 %v11845_v41, %v11813_v20  ;;  %v12423_v39 = vpack.c.bf16 %v11876_v16, %v12422_v43  ;;  %v12424_v59 = vpack.c.bf16 %v11938_v44, %v11900_v35  ;;  %v10726_v3 = vld [vmem:[%s12384_s6] sm:$0xff]   ;;  %v12202_v44 = vld [vmem:[%s12384_s6 + $0x8] sm:$0xff]   ;;  %v5650_v16 = vld [vmem:[#allocation2 + $0x10] sm:$0xff] }
 0x372   : > { %v5648_v20 = vld [vmem:[#allocation2] sm:$0xff] }
 0x373   : > { %9558 = vmatmul.mubr.msk.bf16.gmra.mrb[40].mxu1 %vm5568_vm9, %v5785_v27 }
 0x374   : > { %9561 = vmatprep.mubr.msk.bf16.mxu1 %vm10829_vm10, %v12397_v62 }
 0x37b   : > { %9562 = vmatmul.mubr.msk.bf16.gmra.mrb[44].mxu1 %vm5568_vm9, %v5786_v14 }
 0x37c   : > { %9565 = vmatprep.mubr.msk.bf16.mxu1 %vm10829_vm10, %v12397_v62 }
 0x383   : > { %9566 = vmatmul.mubr.msk.bf16.gmra.mrb[48].mxu1 %vm5568_vm9, %v5787_v51  ;;  %v12398_v51 = vpack.c.bf16 %v11760_v56, %v11738_v13  ;;  %v10722_v13 = vld [vmem:[%s12382_s4 + $0x28] sm:$0xff]   ;;  %v12404_v56 = vpack.c.bf16 %v11732_v21, %v11703_v2  ;;  %v12407_v2 = vpack.c.bf16 %v11890_v63, %v11868_v30  ;;  %v12408_v21 = vpack.c.bf16 %v11924_v5, %v11916_v10  ;;  %v10724_v5 = vld [vmem:[%s12382_s4 + $0x38] sm:$0xff]  }
 0x384   : > { %9569 = vmatprep.mubr.msk.bf16.mxu1 %vm10829_vm10, %v12397_v62  ;;  %v12415_v10 = vpack.c.bf16 %v11831_v29, %v11809_v6 }
 0x38b   : > { %9570 = vmatmul.mubr.msk.bf16.gmra.mrb[52].mxu1 %vm5568_vm9, %v5788_v33 }
 0x38c   : > { %9575 = vmatprep.mubr.msk.bf16.mxu1 %vm10829_vm10, %v12397_v62 }
 0x393   : > { %9576 = vmatmul.mubr.msk.bf16.vlgmr.msra.gmra.mrb[36].mxu1 %vm5568_vm9, %v5926_v49 }
 0x394   : > { %9596 = vmatpush3.bf16.msra.mxu1 %v10720_v37  ;;  %9579 = vmatprep.mubr.msk.bf16.mxu1 %vm10829_vm10, %v12397_v62  ;;  %v5652_v37 = vld [vmem:[#allocation2 + $0x20] sm:$0xff] }
 0x395   : > { %9617 = vmatprep.subr.bf16.mxu1 %v12397_v62 }
 0x39b   : > { %9580 = vmatmul.mubr.msk.bf16.gmra.mrb[40].mxu1 %vm5568_vm9, %v12398_v51 }
 0x39c   : > { %9583 = vmatprep.mubr.msk.bf16.mxu1 %vm10829_vm10, %v12397_v62 }
 0x3a3   : > { %9584 = vmatmul.mubr.msk.bf16.gmra.mrb[44].mxu1 %vm5568_vm9, %v12399_v60  ;;  %v5653_v60 = vld [vmem:[#allocation2 + $0x28] sm:$0xff] }
 0x3a4   : > { %9587 = vmatprep.mubr.msk.bf16.mxu1 %vm10829_vm10, %v12397_v62 }
 0x3ab   : > { %9588 = vmatmul.mubr.msk.bf16.gmra.mrb[48].mxu1 %vm5568_vm9, %v12400_v32 }
 0x3ac   : > { %9591 = vmatprep.mubr.msk.bf16.mxu1 %vm10829_vm10, %v12397_v62 }
 0x3b3   : > { %9592 = vmatmul.mubr.msk.bf16.gmra.mrb[52].mxu1 %vm5568_vm9, %v5930_v38 }
 0x3b4   : > { %9597 = vmatprep.mubr.msk.bf16.mxu1 %vm10829_vm10, %v12397_v62 }
 0x3bb   : > { %9598 = vmatmul.mubr.msk.bf16.vlgmr.msra.gmra.mrb[36].mxu1 %vm5568_vm9, %v6068_v9 }
 0x3bc   : > { %9618 = vmatpush3.bf16.msra.mxu1 %v10721_v46  ;;  %9601 = vmatprep.mubr.msk.bf16.mxu1 %vm10829_vm10, %v12397_v62 }
 0x3bd   : > { %9639 = vmatprep.subr.bf16.mxu1 %v12397_v62 }
 0x3c3   : > { %9602 = vmatmul.mubr.msk.bf16.gmra.mrb[40].mxu1 %vm5568_vm9, %v12401_v36 }
 0x3c4   : > { %9605 = vmatprep.mubr.msk.bf16.mxu1 %vm10829_vm10, %v12397_v62 }
 0x3cb   : > { %9606 = vmatmul.mubr.msk.bf16.gmra.mrb[44].mxu1 %vm5568_vm9, %v12402_v45 }
 0x3cc   : > { %9609 = vmatprep.mubr.msk.bf16.mxu1 %vm10829_vm10, %v12397_v62 }
 0x3d3   : > { %9610 = vmatmul.mubr.msk.bf16.gmra.mrb[48].mxu1 %vm5568_vm9, %v12403_v24 }
 0x3d4   : > { %9613 = vmatprep.mubr.msk.bf16.mxu1 %vm10829_vm10, %v12397_v62 }
 0x3db   : > { %9614 = vmatmul.mubr.msk.bf16.gmra.mrb[52].mxu1 %vm5568_vm9, %v6072_v22  ;;  %v12405_v22 = vpack.c.bf16 %v11801_v15, %v11762_v25  ;;  %v10723_v25 = vld [vmem:[%s12382_s4 + $0x30] sm:$0xff]   ;;  %v12410_v15 = vpack.c.bf16 %v11809_v6, %v11770_v52  ;;  %v10725_v52 = vld [vmem:[%s12382_s4 + $0x40] sm:$0xff]   ;;  %v6782_v6 = vpack.c.bf16 %v12425_v4, %v11949_v26 }
 0x3dc   : > { %9619 = vmatprep.mubr.msk.bf16.mxu1 %vm10829_vm10, %v12397_v62 }
 0x3e3   : > { %9620 = vmatmul.mubr.msk.bf16.vlgmr.msra.gmra.mrb[36].mxu1 %vm5568_vm9, %v12404_v56 }
 0x3e4   : > { %9640 = vmatpush3.bf16.msra.mxu1 %v10722_v13  ;;  %9623 = vmatprep.mubr.msk.bf16.mxu1 %vm10829_vm10, %v12397_v62 }
 0x3e5   : > { %9661 = vmatprep.subr.bf16.mxu1 %v12397_v62 }
 0x3eb   : > { %9624 = vmatmul.mubr.msk.bf16.gmra.mrb[40].mxu1 %vm5568_vm9, %v12405_v22 }
 0x3ec   : > { %9627 = vmatprep.mubr.msk.bf16.mxu1 %vm10829_vm10, %v12397_v62 }
 0x3f3   : > { %9628 = vmatmul.mubr.msk.bf16.gmra.mrb[44].mxu1 %vm5568_vm9, %v12406_v48  ;;  %v5654_v48 = vld [vmem:[#allocation2 + $0x30] sm:$0xff] }
 0x3f4   : > { %9631 = vmatprep.mubr.msk.bf16.mxu1 %vm10829_vm10, %v12397_v62 }
 0x3fb   : > { %9632 = vmatmul.mubr.msk.bf16.gmra.mrb[48].mxu1 %vm5568_vm9, %v12407_v2 }
 0x3fc   : > { %9635 = vmatprep.mubr.msk.bf16.mxu1 %vm10829_vm10, %v12397_v62 }
 0x403   : > { %9636 = vmatmul.mubr.msk.bf16.gmra.mrb[52].mxu1 %vm5568_vm9, %v12408_v21 }
 0x404   : > { %9641 = vmatprep.mubr.msk.bf16.mxu1 %vm10829_vm10, %v12397_v62 }
 0x40b   : > { %9642 = vmatmul.mubr.msk.bf16.vlgmr.msra.gmra.mrb[36].mxu1 %vm5568_vm9, %v12409_v11 }
 0x40c   : > { %9662 = vmatpush3.bf16.msra.mxu1 %v10723_v25  ;;  %9645 = vmatprep.mubr.msk.bf16.mxu1 %vm10829_vm10, %v12397_v62  ;;  %v5655_v25 = vld [vmem:[#allocation2 + $0x38] sm:$0xff] }
 0x40d   : > { %9683 = vmatprep.subr.bf16.mxu1 %v12397_v62 }
 0x413   : > { %9646 = vmatmul.mubr.msk.bf16.gmra.mrb[40].mxu1 %vm5568_vm9, %v12410_v15 }
 0x414   : > { %9649 = vmatprep.mubr.msk.bf16.mxu1 %vm10829_vm10, %v12397_v62 }
 0x41b   : > { %9650 = vmatmul.mubr.msk.bf16.gmra.mrb[44].mxu1 %vm5568_vm9, %v12411_v1 }
 0x41c   : > { %9653 = vmatprep.mubr.msk.bf16.mxu1 %vm10829_vm10, %v12397_v62 }
 0x423   : > { %9654 = vmatmul.mubr.msk.bf16.gmra.mrb[48].mxu1 %vm5568_vm9, %v12412_v18 }
 0x424   : > { %9657 = vmatprep.mubr.msk.bf16.mxu1 %vm10829_vm10, %v12397_v62 }
 0x42b   : > { %9658 = vmatmul.mubr.msk.bf16.gmra.mrb[52].mxu1 %vm5568_vm9, %v12413_v17 }
 0x42c   : > { %9663 = vmatprep.mubr.msk.bf16.mxu1 %vm10829_vm10, %v12397_v62 }
 0x433   : > { %9664 = vmatmul.mubr.msk.bf16.vlgmr.msra.gmra.mrb[36].mxu1 %vm5568_vm9, %v12414_v7 }
 0x434   : > { %9684 = vmatpush3.bf16.msra.mxu1 %v10724_v5  ;;  %9667 = vmatprep.mubr.msk.bf16.mxu1 %vm10829_vm10, %v12397_v62 }
 0x435   : > { %9705 = vmatprep.subr.bf16.mxu1 %v12397_v62 }
 0x43b   : > { %9668 = vmatmul.mubr.msk.bf16.gmra.mrb[40].mxu1 %vm5568_vm9, %v12415_v10 }
 0x43c   : > { %9671 = vmatprep.mubr.msk.bf16.mxu1 %vm10829_vm10, %v12397_v62 }
 0x443   : > { %9672 = vmatmul.mubr.msk.bf16.gmra.mrb[44].mxu1 %vm5568_vm9, %v12416_v8 }
 0x444   : > { %9675 = vmatprep.mubr.msk.bf16.mxu1 %vm10829_vm10, %v12397_v62 }
 0x44b   : > { %9676 = vmatmul.mubr.msk.bf16.gmra.mrb[48].mxu1 %vm5568_vm9, %v6497_v31 }
 0x44c   : > { %9679 = vmatprep.mubr.msk.bf16.mxu1 %vm10829_vm10, %v12397_v62 }
 0x453   : > { %9680 = vmatmul.mubr.msk.bf16.gmra.mrb[52].mxu1 %vm5568_vm9, %v6498_v55  ;;  %v5656_v55 = vld [vmem:[#allocation2 + $0x40] sm:$0xff] }
 0x454   : > { %9685 = vmatprep.mubr.msk.bf16.mxu1 %vm10829_vm10, %v12397_v62 }
 0x45b   : > { %9686 = vmatmul.mubr.msk.bf16.vlgmr.msra.gmra.mrb[36].mxu1 %vm5568_vm9, %v12417_v47 }
 0x45c   : > { %9706 = vmatpush3.bf16.msra.mxu1 %v10725_v52  ;;  %9689 = vmatprep.mubr.msk.bf16.mxu1 %vm10829_vm10, %v12397_v62 }
 0x45d   : > { %9727 = vmatprep.subr.bf16.mxu1 %v10726_v3 }
 0x463   : > { %9690 = vmatmul.mubr.msk.bf16.gmra.mrb[40].mxu1 %vm5568_vm9, %v12418_v42  ;;  %v5657_v42 = vld [vmem:[#allocation2 + $0x48] sm:$0xff] }
 0x464   : > { %9693 = vmatprep.mubr.msk.bf16.mxu1 %vm10829_vm10, %v12397_v62 }
 0x46b   : > { %9694 = vmatmul.mubr.msk.bf16.gmra.mrb[44].mxu1 %vm5568_vm9, %v12419_v19 }
 0x46c   : > { %9697 = vmatprep.mubr.msk.bf16.mxu1 %vm10829_vm10, %v12397_v62 }
 0x473   : > { %9698 = vmatmul.mubr.msk.bf16.gmra.mrb[48].mxu1 %vm5568_vm9, %v6639_v61 }
 0x474   : > { %9701 = vmatprep.mubr.msk.bf16.mxu1 %vm10829_vm10, %v12397_v62 }
 0x47b   : > { %9702 = vmatmul.mubr.msk.bf16.gmra.mrb[52].mxu1 %vm5568_vm9, %v6640_v58 }
 0x47c   : > { %9707 = vmatprep.mubr.msk.bf16.mxu1 %vm10829_vm10, %v12397_v62 }
 0x483   : > { %9708 = vmatmul.mubr.msk.bf16.vlgmr.msra.gmra.mrb[36].mxu1 %vm5568_vm9, %v12420_v53 }
 0x484   : > { %9711 = vmatprep.mubr.msk.bf16.mxu1 %vm10829_vm10, %v12397_v62  ;;  %9728 = vmatpush3.bf16.msra.mxu1 %v10726_v3 }
 0x485   : > { %9733 = vmatprep.subr.bf16.mxu1 %v12202_v44 }
 0x48b   : > { %9712 = vmatmul.mubr.msk.bf16.gmra.mrb[40].mxu1 %vm5568_vm9, %v12421_v57 }
 0x48c   : > { %9715 = vmatprep.mubr.msk.bf16.mxu1 %vm10829_vm10, %v12397_v62 }
 0x493   : > { %9716 = vmatmul.mubr.msk.bf16.gmra.mrb[44].mxu1 %vm5568_vm9, %v12423_v39 }
 0x494   : > { %9719 = vmatprep.mubr.msk.bf16.mxu1 %vm10829_vm10, %v12397_v62 }
 0x49b   : > { %9720 = vmatmul.mubr.msk.bf16.gmra.mrb[48].mxu1 %vm5568_vm9, %v12424_v59 }
 0x49c   : > { %9723 = vmatprep.mubr.msk.bf16.mxu1 %vm10829_vm10, %v12397_v62 }
 0x4a3   : > { %9724 = vmatmul.mubr.msk.bf16.gmra.mrb[52].mxu1 %vm5568_vm9, %v6782_v6 }
 0x556   : > { %v6851_v29 = vpop.f32.mrb[36].mxu1 }
 0x557   : > { %v9987_v26 = vadd.f32 %v6851_v29, %v5648_v20  ;;  %v9709_v50 = vpop.f32.mrb[37].mxu1 }
 0x558   : > { %v6854_v41 = vpop.f32.mrb[38].mxu1 }
 0x559   : > { %v6920_v28 = vmax.f32 %v9987_v26, 0.0  ;;  %v9990_v54 = vadd.f32 %v6854_v41, %v5649_v40  ;;  %v9710_v34 = vpop.f32.mrb[39].mxu1 }
 0x55b   : > { %6930 = vst [vmem:[#allocation2] sm:$0xff] %v6920_v28  ;;  %v6921_v30 = vmax.f32 %v9990_v54, 0.0 }
 0x55d   : > { %6931 = vst [vmem:[#allocation2 + $0x8] sm:$0xff] %v6921_v30 }
 0x55e   : > { %v6859_v63 = vpop.f32.mrb[40].mxu1 }
 0x55f   : > { %v9993_v35 = vadd.f32 %v6859_v63, %v5650_v16  ;;  %v9713_v38 = vpop.f32.mrb[41].mxu1 }
 0x560   : > { %v6862_v31 = vpop.f32.mrb[42].mxu1 }
 0x561   : > { %v6922_v23 = vmax.f32 %v9993_v35, 0.0  ;;  %v9996_v61 = vadd.f32 %v6862_v31, %v5651_v12  ;;  %v9714_v0 = vpop.f32.mrb[43].mxu1 }
 0x563   : > { %6932 = vst [vmem:[#allocation2 + $0x10] sm:$0xff] %v6922_v23  ;;  %v6923_v27 = vmax.f32 %v9996_v61, 0.0 }
 0x564   : > { %v6940_v14 = vld [vmem:[#allocation2] ss:$2 sm:$0xff]  ;;  %v6949_v33 = vld [vmem:[#allocation2 + $0x1] ss:$2 sm:$0xff] }
 0x565   : > { %6933 = vst [vmem:[#allocation2 + $0x18] sm:$0xff] %v6923_v27  ;;  %v6954_v49 = vmax.f32 %v6940_v14, %v6949_v33 }
 0x566   : > { %v6867_v51 = vpop.f32.mrb[44].mxu1 }
 0x567   : > { %v9999_v32 = vadd.f32 %v6867_v51, %v5652_v37  ;;  %v9717_v46 = vpop.f32.mrb[45].mxu1  ;;  %6959 = vst [vmem:[#allocation3] sm:$0xff] %v6954_v49  ;;  %v10728_v37 = vld [vmem:[%s12384_s6 + $0x10] sm:$0xff]  }
 0x568   : > { %v6870_v9 = vpop.f32.mrb[46].mxu1 }
 0x569   : > { %v6924_v36 = vmax.f32 %v9999_v32, 0.0  ;;  %v10002_v45 = vadd.f32 %v6870_v9, %v5653_v60  ;;  %v9718_v24 = vpop.f32.mrb[47].mxu1  ;;  %v10729_v9 = vld [vmem:[%s12384_s6 + $0x18] sm:$0xff]  }
 0x56b   : > { %6934 = vst [vmem:[#allocation2 + $0x20] sm:$0xff] %v6924_v36  ;;  %v6925_v13 = vmax.f32 %v10002_v45, 0.0 }
 0x56c   : > { %v6942_v56 = vld [vmem:[#allocation2 + $0x10] ss:$2 sm:$0xff]  ;;  %v6950_v22 = vld [vmem:[#allocation2 + $0x11] ss:$2 sm:$0xff] }
 0x56d   : > { %v6955_v2 = vmax.f32 %v6942_v56, %v6950_v22  ;;  %6935 = vst [vmem:[#allocation2 + $0x28] sm:$0xff] %v6925_v13  ;;  %v10730_v56 = vld [vmem:[%s12384_s6 + $0x20] sm:$0xff]  }
 0x56e   : > { %v6875_v21 = vpop.f32.mrb[48].mxu1  ;;  %v6978_v19 = vld [vmem:[#allocation3] sm:$0xf] }
 0x56f   : > { %6960 = vst [vmem:[#allocation3 + $0x8] sm:$0xff] %v6955_v2  ;;  %v10005_v11 = vadd.f32 %v6875_v21, %v5654_v48  ;;  %v9721_v15 = vpop.f32.mrb[49].mxu1 }
 0x570   : > { %v6878_v1 = vpop.f32.mrb[50].mxu1 }
 0x571   : > { %v6926_v18 = vmax.f32 %v10005_v11, 0.0  ;;  %v10008_v17 = vadd.f32 %v6878_v1, %v5655_v25  ;;  %v9722_v5 = vpop.f32.mrb[51].mxu1  ;;  %v10731_v11 = vld [vmem:[%s12384_s6 + $0x28] sm:$0xff]  }
 0x573   : > { %6936 = vst [vmem:[#allocation2 + $0x30] sm:$0xff] %v6926_v18  ;;  %v6927_v7 = vmax.f32 %v10008_v17, 0.0  ;;  %v10732_v17 = vld [vmem:[%s12384_s6 + $0x30] sm:$0xff]  }
 0x574   : > { %v6944_v10 = vld [vmem:[#allocation2 + $0x20] ss:$2 sm:$0xff]  ;;  %v6951_v8 = vld [vmem:[#allocation2 + $0x21] ss:$2 sm:$0xff] }
 0x575   : > { %v6956_v52 = vmax.f32 %v6944_v10, %v6951_v8  ;;  %6937 = vst [vmem:[#allocation2 + $0x38] sm:$0xff] %v6927_v7 }
 0x576   : > { %v6883_v47 = vpop.f32.mrb[52].mxu1  ;;  %v6979_v58 = vld [vmem:[#allocation3 + $0x5] sm:$0xf]  ;;  %v6982_v26 = vld [vmem:[#allocation3 + $0xa] sm:$0xf] }
 0x577   : > { %6961 = vst [vmem:[#allocation3 + $0x10] sm:$0xff] %v6956_v52  ;;  %v10011_v53 = vadd.f32 %v6883_v47, %v5656_v55  ;;  %v9725_v57 = vpop.f32.mrb[53].mxu1  ;;  %v6980_v43 = vmax.f32 %v6978_v19, %v6979_v58  ;;  %v10733_v52 = vld [vmem:[%s12384_s6 + $0x38] sm:$0xff]  }
 0x578   : > { %v6886_v39 = vpop.f32.mrb[54].mxu1  ;;  %v10734_v57 = vld [vmem:[%s12384_s6 + $0x40] sm:$0xff]  }
 0x579   : > { %v6928_v59 = vmax.f32 %v10011_v53, 0.0  ;;  %v10014_v4 = vadd.f32 %v6886_v39, %v5657_v42  ;;  %v9726_v6 = vpop.f32.mrb[55].mxu1  ;;  %6981 = vst.msk [vmem:[#allocation5 + $0x7] sm:$0xf] %vm5582_vm11, %v6980_v43  ;;  %v7544_v39 = vld [vmem:[#allocation5 + $0x1d] sm:$0xff] }
 0x57a   : > { %v7621_v6 = vld [vmem:[#allocation5 + $0x1e] sm:$0xff] }
 0x57b   : > { %6938 = vst [vmem:[#allocation2 + $0x40] sm:$0xff] %v6928_v59  ;;  %v6929_v3 = vmax.f32 %v10014_v4, 0.0  ;;  %v7546_v59 = vpack.c.bf16 %v7544_v39, %v7544_v39 }
 0x57c   : > { %v6946_v20 = vld [vmem:[#allocation2 + $0x30] ss:$2 sm:$0xff]  ;;  %v6952_v29 = vld [vmem:[#allocation2 + $0x31] ss:$2 sm:$0xff] }
 0x57d   : > { %v6957_v40 = vmax.f32 %v6946_v20, %v6952_v29  ;;  %6939 = vst [vmem:[#allocation2 + $0x48] sm:$0xff] %v6929_v3  ;;  %v7623_v3 = vpack.c.bf16 %v7621_v6, %v7621_v6  ;;  %v10735_v20 = vld [vmem:[%s12386_s8] sm:$0xff]  }
 0x57e   : > { %v6983_v50 = vld [vmem:[#allocation3 + $0xf] sm:$0xf]  ;;  %v6986_v30 = vld [vmem:[#allocation3 + $0x14] sm:$0xf]  ;;  %v8831_v29 = vld [vmem:[%s12385_s7] ss:$0 sm:$0xff] }
 0x57f   : > { %6962 = vst [vmem:[#allocation3 + $0x18] sm:$0xff] %v6957_v40  ;;  %v6984_v41 = vmax.f32 %v6982_v26, %v6983_v50 }
 0x580   : > { %v7004_v12 = vld [vmem:[#allocation5] sm:$0xff] }
 0x581   : > { %6985 = vst.msk [vmem:[#allocation5 + $0xd] sm:$0xf] %vm5582_vm11, %v6984_v41  ;;  %v7080_v33 = vld [vmem:[#allocation5 + $0x1] sm:$0xff] }
 0x582   : > { %v7157_v46 = vld [vmem:[#allocation5 + $0x2] sm:$0xff] }
 0x584   : > { %v6948_v28 = vld [vmem:[#allocation2 + $0x40] ss:$2 sm:$0xff]  ;;  %v6953_v54 = vld [vmem:[#allocation2 + $0x41] ss:$2 sm:$0xff] }
 0x585   : > { %v6958_v34 = vmax.f32 %v6948_v28, %v6953_v54 }
 0x586   : > { %v6987_v16 = vld [vmem:[#allocation3 + $0x19] sm:$0xf] }
 0x587   : > { %6963 = vst [vmem:[#allocation3 + $0x20] sm:$0xff] %v6958_v34  ;;  %v6988_v63 = vmax.f32 %v6986_v30, %v6987_v16 }
 0x588   : > { %v7005_v35 = vld [vmem:[#allocation5 + $0x8] sm:$0xff] }
 0x589   : > { %v7007_v38 = vpack.c.bf16 %v7005_v35, %v7004_v12  ;;  %6989 = vst.msk [vmem:[#allocation5 + $0x13] sm:$0xf] %vm5582_vm11, %v6988_v63  ;;  %v7081_v61 = vld [vmem:[#allocation5 + $0x9] sm:$0xff] }
 0x58a   : > { %v7083_v49 = vpack.c.bf16 %v7081_v61, %v7080_v33  ;;  %v7158_v60 = vld [vmem:[#allocation5 + $0xa] sm:$0xff] }
 0x58b   : > { %9729 = vmatprep.mubr.msk.bf16.mxu1 %vm5568_vm9, %v7007_v38  ;;  %v7160_v36 = vpack.c.bf16 %v7158_v60, %v7157_v46  ;;  %v7234_v13 = vld [vmem:[#allocation5 + $0x6] sm:$0xff] }
 0x58c   : > { %v7311_v25 = vld [vmem:[#allocation5 + $0x7] sm:$0xff] }
 0x58d   : > { %v10736_v60 = vld [vmem:[%s12386_s8 + $0x8] sm:$0xff]  }
 0x58e   : > { %v6990_v31 = vld [vmem:[#allocation3 + $0x1e] sm:$0xf]  ;;  %v6991_v23 = vld [vmem:[#allocation3 + $0x23] sm:$0xf] }
 0x58f   : > { %v6992_v0 = vmax.f32 %v6990_v31, %v6991_v23 }
 0x590   : > { %v7006_v27 = vld [vmem:[#allocation5 + $0x10] sm:$0xff] }
 0x591   : > { %v7008_v14 = vpack.c.bf16 %v7006_v27, %v7006_v27  ;;  %6993 = vst.msk [vmem:[#allocation5 + $0x19] sm:$0xf] %vm5582_vm11, %v6992_v0  ;;  %v7082_v51 = vld [vmem:[#allocation5 + $0x11] sm:$0xff]  ;;  %v7391_v5 = vpack.c.bf16 %v7006_v27, %v7005_v35 }
 0x592   : > { %v7084_v32 = vpack.c.bf16 %v7082_v51, %v7082_v51  ;;  %v7312_v2 = vld [vmem:[#allocation5 + $0xf] sm:$0xff] }
 0x593   : > { %9730 = vmatmul.mubr.msk.bf16.vlgmr.msra.gmra.mrb[56].mxu1 %vm5568_vm9, %v7008_v14  ;;  %v7314_v15 = vpack.c.bf16 %v7312_v2, %v7311_v25  ;;  %v7465_v55 = vld [vmem:[#allocation5 + $0xc] sm:$0xff] }
 0x594   : > { %9734 = vmatpush3.bf16.msra.mxu1 %v12202_v44  ;;  %9735 = vmatprep.mubr.msk.bf16.mxu1 %vm5568_vm9, %v7083_v49  ;;  %v7235_v44 = vld [vmem:[#allocation5 + $0xe] sm:$0xff] }
 0x595   : > { %9739 = vmatprep.subr.bf16.mxu1 %v10728_v37  ;;  %v7237_v22 = vpack.c.bf16 %v7235_v44, %v7234_v13  ;;  %v7542_v53 = vld [vmem:[#allocation5 + $0xd] sm:$0xff] }
 0x596   : > { %v10740_v2 = vld [vmem:[%s12386_s8 + $0x28] sm:$0xff]  }
 0x598   : > { %v7159_v45 = vld [vmem:[#allocation5 + $0x12] sm:$0xff]  ;;  %v7467_v42 = vld [vmem:[#allocation5 + $0x1c] sm:$0xff] }
 0x599   : > { %v7161_v24 = vpack.c.bf16 %v7159_v45, %v7159_v45  ;;  %v7236_v48 = vld [vmem:[#allocation5 + $0x16] sm:$0xff]  ;;  %v7469_v58 = vpack.c.bf16 %v7467_v42, %v7467_v42 }
 0x59a   : > { %v7238_v21 = vpack.c.bf16 %v7236_v48, %v7236_v48  ;;  %v7313_v1 = vld [vmem:[#allocation5 + $0x17] sm:$0xff]  ;;  %v7622_v4 = vpack.c.bf16 %v7236_v48, %v7235_v44 }
 0x59b   : > { %v7315_v18 = vpack.c.bf16 %v7313_v1, %v7313_v1  ;;  %v7390_v7 = vld [vmem:[#allocation5 + $0x18] sm:$0xff] }
 0x59c   : > { %v7466_v10 = vld [vmem:[#allocation5 + $0x14] sm:$0xff]  ;;  %v7392_v8 = vpack.c.bf16 %v7390_v7, %v7390_v7  ;;  %v10743_v7 = vld [vmem:[%s12386_s8 + $0x40] sm:$0xff]  }
 0x59d   : > { %v7468_v47 = vpack.c.bf16 %v7466_v10, %v7465_v55  ;;  %v7543_v19 = vld [vmem:[#allocation5 + $0x15] sm:$0xff] }
 0x59e   : > { %v7545_v43 = vpack.c.bf16 %v7543_v19, %v7542_v53  ;;  %v10738_v44 = vld [vmem:[%s12386_s8 + $0x18] sm:$0xff]  }
 0x59f   : > { %9736 = vmatmul.mubr.msk.bf16.vlgmr.msra.gmra.mrb[56].mxu1 %vm5568_vm9, %v7084_v32 }
 0x5a0   : > { %9740 = vmatpush3.bf16.msra.mxu1 %v10728_v37  ;;  %9741 = vmatprep.mubr.msk.bf16.mxu1 %vm5568_vm9, %v7160_v36 }
 0x5a1   : > { %9745 = vmatprep.subr.bf16.mxu1 %v10729_v9 }
 0x5ab   : > { %9742 = vmatmul.mubr.msk.bf16.vlgmr.msra.gmra.mrb[56].mxu1 %vm5568_vm9, %v7161_v24 }
 0x5ac   : > { %9746 = vmatpush3.bf16.msra.mxu1 %v10729_v9  ;;  %9747 = vmatprep.mubr.msk.bf16.mxu1 %vm5568_vm9, %v7237_v22  ;;  %v10737_v9 = vld [vmem:[%s12386_s8 + $0x10] sm:$0xff]  }
 0x5ad   : > { %9751 = vmatprep.subr.bf16.mxu1 %v10730_v56 }
 0x5b7   : > { %9748 = vmatmul.mubr.msk.bf16.vlgmr.msra.gmra.mrb[56].mxu1 %vm5568_vm9, %v7238_v21 }
 0x5b8   : > { %9752 = vmatpush3.bf16.msra.mxu1 %v10730_v56  ;;  %9753 = vmatprep.mubr.msk.bf16.mxu1 %vm5568_vm9, %v7314_v15  ;;  %v10739_v56 = vld [vmem:[%s12386_s8 + $0x20] sm:$0xff]  }
 0x5b9   : > { %9757 = vmatprep.subr.bf16.mxu1 %v10731_v11 }
 0x5c3   : > { %9754 = vmatmul.mubr.msk.bf16.vlgmr.msra.gmra.mrb[56].mxu1 %vm5568_vm9, %v7315_v18  ;;  %v10742_v18 = vld [vmem:[%s12386_s8 + $0x38] sm:$0xff]  }
 0x5c4   : > { %9758 = vmatpush3.bf16.msra.mxu1 %v10731_v11  ;;  %9759 = vmatprep.mubr.msk.bf16.mxu1 %vm5568_vm9, %v7391_v5  ;;  %v10741_v11 = vld [vmem:[%s12386_s8 + $0x30] sm:$0xff]  }
 0x5c5   : > { %9763 = vmatprep.subr.bf16.mxu1 %v10732_v17 }
 0x5cf   : > { %9760 = vmatmul.mubr.msk.bf16.vlgmr.msra.gmra.mrb[56].mxu1 %vm5568_vm9, %v7392_v8 }
 0x5d0   : > { %9764 = vmatpush3.bf16.msra.mxu1 %v10732_v17  ;;  %9765 = vmatprep.mubr.msk.bf16.mxu1 %vm5568_vm9, %v7468_v47 }
 0x5d1   : > { %9769 = vmatprep.subr.bf16.mxu1 %v10733_v52 }
 0x5db   : > { %9766 = vmatmul.mubr.msk.bf16.vlgmr.msra.gmra.mrb[56].mxu1 %vm5568_vm9, %v7469_v58 }
 0x5dc   : > { %9770 = vmatpush3.bf16.msra.mxu1 %v10733_v52  ;;  %9771 = vmatprep.mubr.msk.bf16.mxu1 %vm5568_vm9, %v7545_v43  ;;  %v8875_v52 = vld [vmem:[%s12387_s9] ss:$0 sm:$0xff] }
 0x5dd   : > { %9775 = vmatprep.subr.bf16.mxu1 %v10734_v57 }
 0x5e7   : > { %9772 = vmatmul.mubr.msk.bf16.vlgmr.msra.gmra.mrb[56].mxu1 %vm5568_vm9, %v7546_v59 }
 0x5e8   : > { %9776 = vmatpush3.bf16.msra.mxu1 %v10734_v57  ;;  %9777 = vmatprep.mubr.msk.bf16.mxu1 %vm5568_vm9, %v7622_v4 }
 0x5e9   : > { %9781 = vmatprep.subr.bf16.mxu1 %v12397_v62 }
 0x5f3   : > { %9778 = vmatmul.mubr.msk.bf16.vlgmr.msra.gmra.mrb[56].mxu1 %vm5568_vm9, %v7623_v3 }
 0x5f4   : > { %9783 = vmatprep.mubr.msk.bf16.mxu1 %vm10829_vm10, %v12397_v62  ;;  %9782 = vmatpush3.bf16.msra.mxu1 %v10735_v20 }
 0x5f5   : > { %9787 = vmatprep.subr.bf16.mxu1 %v12397_v62 }
 0x6c6   : > { %v9779_v40 = vpop.f32.mrb[56].mxu1 }
 0x6c7   : > { %v10017_v26 = vadd.f32 %v9779_v40, %v8831_v29  ;;  %v7676_v50 = vpop.f32.mrb[57].mxu1 }
 0x6c8   : > { %v10020_v41 = vadd.f32 %v8831_v29, %v7676_v50  ;;  %v9780_v28 = vpop.f32.mrb[58].mxu1  ;;  %v8276_v50 = vld [vmem:[%s12388_s10 + $0x8] sm:$0xff] }
 0x6c9   : > { %v7701_v54 = vmax.f32 %v10017_v26, 0.0  ;;  %v7679_v34 = vpop.f32.mrb[59].mxu1  ;;  %v8275_v26 = vld [vmem:[%s12388_s10] sm:$0xff]  ;;  %v8278_v28 = vmul.f32 %v8276_v50, %v8276_v50 }
 0x6ca   : > { %v7699_v30 = vmax.f32 %v10020_v41, 0.0  ;;  %v10023_v16 = vadd.f32 %v8831_v29, %v7679_v34  ;;  %v8277_v41 = vmul.f32 %v8275_v26, %v8275_v26 }
 0x6cb   : > { %7704 = vst [vmem:[#allocation2 + $0x10] sm:$0xff] %v7701_v54 }
 0x6cc   : > { %7702 = vst [vmem:[#allocation2] sm:$0xff] %v7699_v30  ;;  %v7700_v63 = vmax.f32 %v10023_v16, 0.0  ;;  %v8279_v34 = vadd.f32 %v8278_v28, %v8277_v41 }
 0x6ce   : > { %7703 = vst [vmem:[#allocation2 + $0x8] sm:$0xff] %v7700_v63  ;;  %v8280_v30 = vrot.slane %v8279_v34, 4 }
 0x6d0   : > { %v8281_v16 = vadd.f32 %v8280_v30, %v8279_v34 }
 0x6d2   : > { %v7706_v12 = vld [vmem:[#allocation2 + $0x10] ss:$2 sm:$0xf]  ;;  %v7708_v35 = vld [vmem:[#allocation2 + $0x11] ss:$2 sm:$0xf] }
 0x6d3   : > { %v7710_v38 = vmax.f32 %v7706_v12, %v7708_v35  ;;  %v8282_v63 = vrot.slane %v8281_v16, 2 }
 0x6d5   : > { %7712 = vst [vmem:[#allocation3 + $0x8] sm:$0xf] %v7710_v38  ;;  %v7705_v31 = vld [vmem:[#allocation2] ss:$2 sm:$0xff]  ;;  %v7707_v23 = vld [vmem:[#allocation2 + $0x1] ss:$2 sm:$0xff]  ;;  %v8283_v12 = vadd.f32 %v8282_v63, %v8281_v16 }
 0x6d6   : > { %v7709_v61 = vmax.f32 %v7705_v31, %v7707_v23 }
 0x6d7   : > { %v8284_v35 = vrot.slane %v8283_v12, 1 }
 0x6d8   : > { %7711 = vst [vmem:[#allocation3] sm:$0xff] %v7709_v61 }
 0x6d9   : > { %v8285_v38 = vadd.f32 %v8284_v35, %v8283_v12 }
 0x6db   : > { %v8286_v31 = vadd.f32 1e-12, %v8285_v38 }
 0x6dc   : > { %v7733_v0 = vld [vmem:[#allocation3 + $0x9] sm:$0x3] }
 0x6dd   : > { %10744 = vrsqrt.f32 %v8286_v31 }
 0x6df   : > { %v7727_v27 = vld [vmem:[#allocation3] sm:$0x3]  ;;  %v7728_v14 = vld [vmem:[#allocation3 + $0x3] sm:$0x3]  ;;  %v7732_v33 = vld [vmem:[#allocation3 + $0x6] sm:$0x3] }
 0x6e0   : > { %v7729_v37 = vmax.f32 %v7727_v27, %v7728_v14  ;;  %v7734_v49 = vmax.f32 %v7732_v33, %v7733_v0 }
 0x6e2   : > { %7731 = vst.msk [vmem:[#allocation4 + $0x5] sm:$0x3] %vm7730_vm12, %v7729_v37  ;;  %7735 = vst.msk [vmem:[#allocation4 + $0x9] sm:$0x3] %vm7730_vm12, %v7734_v49 }
 0x6e7   : > { %v10745_v23 = vpop.eup %10744 }
 0x6e8   : > { %v8288_v61 = vmul.f32 %v10745_v23, %v8275_v26  ;;  %v8289_v0 = vmul.f32 %v10745_v23, %v8276_v50 }
 0x6e9   : > { %v7744_v51 = vld [vmem:[#allocation4] sm:$0xff]  ;;  %v8085_v1 = vld [vmem:[#allocation4 + $0x8] sm:$0xff] }
 0x6ea   : > { %v7745_v32 = vpack.c.bf16 %v7744_v51, %v7744_v51  ;;  %v7800_v46 = vld [vmem:[#allocation4 + $0x1] sm:$0xff]  ;;  %v8086_v17 = vpack.c.bf16 %v8085_v1, %v8085_v1  ;;  %v8142_v5 = vld [vmem:[#allocation4 + $0x9] sm:$0xff]  ;;  %v8291_v27 = vpack.c.bf16 %v8289_v0, %v8288_v61 }
 0x6eb   : > { %v7801_v36 = vpack.c.bf16 %v7800_v46, %v7800_v46  ;;  %v7857_v45 = vld [vmem:[#allocation4 + $0x2] sm:$0xff]  ;;  %v8143_v10 = vpack.c.bf16 %v8142_v5, %v8142_v5  ;;  %v8199_v8 = vld [vmem:[#allocation4 + $0xa] sm:$0xff]  ;;  %v8338_v46 = vstv %s8335_s16  ;;  %s10766_s16 = scalar_lea.vmem %s10765_s15, 32 }
 0x6ec   : > { %9784 = vmatmul.mubr.msk.bf16.vlgmr.msra.gmra.mrb[60].mxu1 %vm5568_vm9, %v7745_v32  ;;  %v7858_v24 = vpack.c.bf16 %v7857_v45, %v7857_v45  ;;  %v7914_v13 = vld [vmem:[#allocation4 + $0x4] sm:$0xff]  ;;  %v8200_v55 = vpack.c.bf16 %v8199_v8, %v8199_v8  ;;  %p10768_p6 = scmp.lt.s32.totalorder %s10766_s16, %s10760_s25 }
 0x6ed   : > { %9788 = vmatpush3.bf16.msra.mxu1 %v10736_v60  ;;  %9789 = vmatprep.mubr.msk.bf16.mxu1 %vm10829_vm10, %v12397_v62  ;;  %v7915_v22 = vpack.c.bf16 %v7914_v13, %v7914_v13  ;;  %v7971_v48 = vld [vmem:[#allocation4 + $0x5] sm:$0xff]  ;;  %v8336_v60 = vlaneseq }
 0x6ee   : > { %9793 = vmatprep.subr.bf16.mxu1 %v12397_v62  ;;  %v7972_v21 = vpack.c.bf16 %v7971_v48, %v7971_v48  ;;  %v8028_v25 = vld [vmem:[#allocation4 + $0x6] sm:$0xff]  ;;  %p10769_p7 = por %p10768_p6, %p10767_p5 }
 0x6ef   : > { %v8029_v15 = vpack.c.bf16 %v8028_v25, %v8028_v25  ;;  %v8337_v32 = vand.u32 127, %v8336_v60 }
 0x6f0   : > { %p10770_p8 = pnand %p10769_p7, %p10763_p4 }
 0x6f1   : > { %vm8339_vm13 = vcmp.eq.s32.totalorder %v8337_v32, %v8338_v46 }
 0x6f8   : > { %9790 = vmatmul.mubr.msk.bf16.vlgmr.msra.gmra.mrb[60].mxu1 %vm5568_vm9, %v7801_v36 }
 0x6f9   : > { %9794 = vmatpush3.bf16.msra.mxu1 %v10737_v9  ;;  %9795 = vmatprep.mubr.msk.bf16.mxu1 %vm10829_vm10, %v12397_v62  ;;  %v8911_v9 = vsel %vm8339_vm13, 1.0, %v12397_v62 }
 0x6fa   : > { %9799 = vmatprep.subr.bf16.mxu1 %v12397_v62  ;;  %v8343_v36 = vmul.f32 2.0, %v8911_v9 }
 0x704   : > { %9796 = vmatmul.mubr.msk.bf16.vlgmr.msra.gmra.mrb[60].mxu1 %vm5568_vm9, %v7858_v24 }
 0x705   : > { %9800 = vmatpush3.bf16.msra.mxu1 %v10738_v44  ;;  %9801 = vmatprep.mubr.msk.bf16.mxu1 %vm10829_vm10, %v12397_v62 }
 0x706   : > { %9805 = vmatprep.subr.bf16.mxu1 %v12397_v62 }
 0x710   : > { %9802 = vmatmul.mubr.msk.bf16.vlgmr.msra.gmra.mrb[60].mxu1 %vm5568_vm9, %v7915_v22 }
 0x711   : > { %9806 = vmatpush3.bf16.msra.mxu1 %v10739_v56  ;;  %9807 = vmatprep.mubr.msk.bf16.mxu1 %vm10829_vm10, %v12397_v62 }
 0x712   : > { %9811 = vmatprep.subr.bf16.mxu1 %v12397_v62 }
 0x71c   : > { %9808 = vmatmul.mubr.msk.bf16.vlgmr.msra.gmra.mrb[60].mxu1 %vm5568_vm9, %v7972_v21 }
 0x71d   : > { %9812 = vmatpush3.bf16.msra.mxu1 %v10740_v2  ;;  %9813 = vmatprep.mubr.msk.bf16.mxu1 %vm10829_vm10, %v12397_v62 }
 0x71e   : > { %9817 = vmatprep.subr.bf16.mxu1 %v12397_v62 }
 0x728   : > { %9814 = vmatmul.mubr.msk.bf16.vlgmr.msra.gmra.mrb[60].mxu1 %vm5568_vm9, %v8029_v15 }
 0x729   : > { %9818 = vmatpush3.bf16.msra.mxu1 %v10741_v11  ;;  %9819 = vmatprep.mubr.msk.bf16.mxu1 %vm10829_vm10, %v12397_v62 }
 0x72a   : > { %9823 = vmatprep.subr.bf16.mxu1 %v12397_v62 }
 0x734   : > { %9820 = vmatmul.mubr.msk.bf16.vlgmr.msra.gmra.mrb[60].mxu1 %vm5568_vm9, %v8086_v17 }
 0x735   : > { %9824 = vmatpush3.bf16.msra.mxu1 %v10742_v18  ;;  %9825 = vmatprep.mubr.msk.bf16.mxu1 %vm10829_vm10, %v12397_v62 }
 0x736   : > { %9829 = vmatprep.subr.bf16.mxu1 %v12397_v62 }
 0x740   : > { %9826 = vmatmul.mubr.msk.bf16.vlgmr.msra.gmra.mrb[60].mxu1 %vm5568_vm9, %v8143_v10 }
 0x741   : > { %9830 = vmatpush3.bf16.msra.mxu1 %v10743_v7  ;;  %9831 = vmatprep.mubr.msk.bf16.mxu1 %vm10829_vm10, %v12397_v62 }
 0x742   : > { %9835 = vmatprep.subr.bf16.mxu1 %v12397_v62 }
 0x74c   : > { %9832 = vmatmul.mubr.msk.bf16.vlgmr.msra.gmra.mrb[60].mxu1 %vm5568_vm9, %v8200_v55 }
 0x74d   : > { %9837 = vmatprep.mubr.msk.bf16.mxu1 %vm10829_vm10, %v12397_v62  ;;  %9836 = vmatpush3.bf16.msra.mxu1 %v8291_v27 }
 0x81f   : > { %v8248_v47 = vpop.f32.mrb[60].mxu1 }
 0x820   : > { %v10026_v42 = vadd.f32 %v8875_v52, %v8248_v47  ;;  %v9833_v19 = vpop.f32.mrb[61].mxu1 }
 0x821   : > { %v8251_v58 = vpop.f32.mrb[62].mxu1 }
 0x822   : > { %v8257_v53 = vmax.f32 %v10026_v42, 0.0  ;;  %v9834_v57 = vpop.f32.mrb[63].mxu1 }
 0x824   : > { %8258 = vst [vmem:[#allocation2] sm:$0xff] %v8257_v53 }
 0x82b   : > { %v8259_v43 = vld [vmem:[#allocation2] ss:$2 sm:$0xf]  ;;  %v8260_v39 = vld [vmem:[#allocation2 + $0x1] ss:$2 sm:$0xf] }
 0x82c   : > { %v8261_v59 = vmax.f32 %v8259_v43, %v8260_v39 }
 0x82e   : > { %8262 = vst [vmem:[#allocation3] sm:$0xf] %v8261_v59 }
 0x835   : > { %v8263_v4 = vld [vmem:[#allocation3] sm:$0x1]  ;;  %v8264_v6 = vld [vmem:[#allocation3 + $0x2] sm:$0x1] }
 0x836   : > { %v8265_v3 = vmax.f32 %v8263_v4, %v8264_v6 }
 0x838   : > { %v8266_v20 = vpack.c.bf16 %v8265_v3, %v8265_v3 }
 0x83a   : > { %v8267_v29 = vunpack.c.l.bf16 %v8266_v20 }
 0x83c   : > { %v8268_v40 = vmul.f32 %v8267_v29, %v8267_v29 }
 0x83e   : > { %v8269_v54 = vsel %vm626_vm0, %v8268_v40, 0.0 }
 0x83f   : > { %8270 = vadd.xlane.f32.xlu0 %v8269_v54 }
 0x8cc   : > { %v8271_v14 = vpop.xlane.xlu0 %8270 }
 0x8cd   : > { %v8272_v33 = vadd.f32 1e-12, %v8271_v14 }
 0x8cf   : > { %10746 = vrsqrt.f32 %v8272_v33 }
 0x8d9   : > { %v10747_v37 = vpop.eup %10746 }
 0x8da   : > { %v8274_v49 = vmul.f32 %v10747_v37, %v8267_v29 }
 0x8dc   : > { %v8290_v51 = vpack.c.bf16 %v8274_v49, %v8274_v49 }
 0x8de   : > { %9838 = vmatmul.mubr.msk.bf16.vlgmr.msra.gmra.mrb[64].mxu1 %vm5568_vm9, %v8290_v51 }
 0x9b1   : > { %v8329_v45 = vpop.f32.mrb[64].mxu1 }
 0x9b2   : > { %v8342_v44 = vmul.f32 10.0, %v8329_v45  ;;  %v9839_v24 = vpop.f32.mrb[65].mxu1 }
 0x9b3   : > { %v8332_v13 = vpop.f32.mrb[66].mxu1 }
 0x9b4   : > { %v8344_v56 = vsub.f32 %v8342_v44, %v8343_v36  ;;  %v9840_v22 = vpop.f32.mrb[67].mxu1 }
 0x9b6   : > { %8345 = vst [vmem:[%s358_s18] sm:$0x1] %v8344_v56 }
 0x9b7   : > { %10773 = shalt.err (!%p10770_p8)
}
 0x9b8   : > { %s10774_s17 = scalar_lea.hbm %s12336_s28, 16  ;;  %s10778_s20 = scalar_lea.hbm %s12389_s11, 32 }
 0x9b9   : > { %p10775_p9 = scmp.ne.s32.totalorder %s12336_s28, %s10774_s17  ;;  %p10779_p0 = scmp.lt.u32.totalorder %s12336_s28, %s12389_s11 }
 0x9ba   : > { %p10780_p1 = scmp.lt.u32.totalorder %s10778_s20, %s10774_s17  ;;  %p10782_p3 = scmp.lt.u32.totalorder %s10774_s17, %s12336_s28 }
 0x9bb   : > { %p10776_p12 = pnand %p10775_p9, %p10932_p10 }
 0x9bc   : > { %p10781_p2 = por %p10780_p1, %p10779_p0 }
 0x9bd   : > { %p10777_p13 = pneg %p10776_p12 }
 0x9be   : > { %p10783_p4 = por %p10782_p3, %p10781_p2 }
 0x9c0   : > { %p10784_p5 = pnand %p10783_p4, %p10777_p13 }
 0x9c2   : > { %10787 = shalt.err (!%p10784_p5)
}
 0x9c3   : > { %10504 = dma.vmem_to_hbm [thread:$0]  (%p10932_p10), %s12338_s19, 16, %s12336_s28, %s8347_s29  }
 0x9c4 PF: > { %p10510_p6 = scmp.ge.s32.totalorder %s10824_s24, 2  ;;  %s8371_s25 = sand.u32 1, %s10812_s22  }
 0x9c5   : > { %s8372_s15 = scalar_lea.sflag [#allocation9], %s8371_s25 }
 0x9c6   : > { %p10507_p7 = pnand %p10510_p6, %p10936_p11 }
 0x9c8   : > { %10807 = dma.done.wait (!%p10507_p7), %s8372_s15, 16  }
 0x9c9   : > { %10809 = vsyncadd (!%p10507_p7), %s8372_s15, 4294967280  ;;  %p27_p8 = scmp.ge.s32.totalorder %s10919_s27, 4   ;;  %s12426_s22 = smov %s10816_s23 }
 0x9ca   : > { %s12427_s23 = smov %s10820_s0  ;;  %s12428_s0 = smov %s10930_s30 }
 0x9cb   : > { %s12429_s24 = smov %s10919_s27  ;;  %29 = sbr.rel (!%p27_p8) target bundleno = 18 (0x12), region = 166 }
 0x9d2   :  { %8376 = vsyncpa [#allocation9], 1 }
 0x9d3   :  { %8378 = vsyncpa [#allocation9 + $0x1], 1 }

</bundles_post_ra>
